<compile_context>
chip_gen: v6e
topology: v6e:2x2x1
jax: 0.10.0
libtpu: 0.0.40
codegen_flags: <defaults>
</compile_context>

<pallas_src>
import functools

import jax
import jax.numpy as jnp
import numpy as np
from jax.experimental import pallas as pl
from jax.experimental.pallas import tpu as pltpu

KSIZE = 7
PAD = KSIZE // 2
IN_CH = 2  # [avg, max]

# Use the MXU conv-as-matmul path while the banded matrix stays small.
_MXU_MATRIX_BYTES_CAP = 8 * 1024 * 1024  # (2, HW, HW) f32 -> HW <= ~1024


# ---------------------------------------------------------------------------
# Kernels
# ---------------------------------------------------------------------------
def _channel_reduce(x_ref, sum_ref, max_ref):
    """Running channel sum / max over the channel-chunk grid axis."""
    c_idx = pl.program_id(1)

    @pl.when(c_idx == 0)
    def _init():
        sum_ref[...] = jnp.zeros_like(sum_ref)
        max_ref[...] = jnp.full(max_ref.shape, -jnp.inf, dtype=max_ref.dtype)

    xf = x_ref[...].astype(jnp.float32)                  # (bt, ct, HW)
    sum_ref[...] = sum_ref[...] + jnp.sum(xf, axis=1)
    max_ref[...] = jnp.maximum(max_ref[...], jnp.max(xf, axis=1))


def sa_kernel_mxu(x_ref, m_ref, o_ref, sum_ref, max_ref, *, C):
    # x_ref  : (bt, ct, HW) VMEM block (bt batch rows folded into sublanes)
    # m_ref  : (2, HW, HW)  VMEM banded conv matrix (weights + edge masks baked in)
    # o_ref  : (bt, HW)     VMEM block (lane-dense output)
    _channel_reduce(x_ref, sum_ref, max_ref)

    @pl.when(pl.program_id(1) == pl.num_programs(1) - 1)
    def _finalize():
        avg = sum_ref[...] * (1.0 / C)                   # (bt, HW)
        mx = max_ref[...]
        # Whole 7x7 SAME conv (zero padding already in m) as two MXU matmuls;
        # HIGHEST precision keeps f32 accuracy vs the f32 reference.
        y = (jnp.dot(avg, m_ref[0], preferred_element_type=jnp.float32,
                     precision=jax.lax.Precision.HIGHEST)
             + jnp.dot(mx, m_ref[1], preferred_element_type=jnp.float32,
                       precision=jax.lax.Precision.HIGHEST))
        o_ref[...] = jax.nn.sigmoid(y).astype(o_ref.dtype)


def sa_kernel_roll(x_ref, w_ref, mask_ref, o_ref, sum_ref, max_ref, *, H, W, C):
    # Fallback for large spatial planes: 49 XLU lane-rolls on a sublane-stacked
    # [avg; mx] slab + separable precomputed edge masks.
    _channel_reduce(x_ref, sum_ref, max_ref)

    @pl.when(pl.program_id(1) == pl.num_programs(1) - 1)
    def _finalize():
        HW = H * W
        bt = sum_ref.shape[0]
        avg = sum_ref[...] * (1.0 / C)
        mx = max_ref[...]
        both = jnp.concatenate([avg, mx], axis=0)        # (2*bt, HW) sublane stack

        masks = mask_ref[...]                            # (2*KSIZE, HW) 0/1 masks
        # Hoist all 98 scalar weight reads (SMEM) off the MAC chain.
        w_avg = [w_ref[k] for k in range(KSIZE * KSIZE)]
        w_max = [w_ref[KSIZE * KSIZE + k] for k in range(KSIZE * KSIZE)]

        acc = jnp.zeros((bt, HW), jnp.float32)
        for ky in range(KSIZE):
            dy = ky - PAD
            row_acc = jnp.zeros((bt, HW), jnp.float32)
            for kx in range(KSIZE):
                dx = kx - PAD
                shift = (-(dy * W + dx)) % HW
                # One roll per tap for BOTH maps (XLU slot, co-issues with VPU).
                rolled = pltpu.roll(both, shift, axis=1) if shift else both
                ra = rolled[:bt]
                rm = rolled[bt:]
                k = ky * KSIZE + kx
                col_ok = masks[KSIZE + kx:KSIZE + kx + 1]        # (1, HW)
                row_acc = row_acc + col_ok * (w_avg[k] * ra + w_max[k] * rm)
            acc = acc + masks[ky:ky + 1] * row_acc               # row_ok[ky]
        o_ref[...] = jax.nn.sigmoid(acc).astype(o_ref.dtype)
        # TODO(synk): lane-tile (spatial-chunk) this loop for HW >~ 1024 so the
        # unrolled live set stays under 64 vregs; optional bf16 MAC path for
        # v6e/v7x with relaxed tolerance.


# ---------------------------------------------------------------------------
# Host-side weight / mask preprocessing
# ---------------------------------------------------------------------------
def _build_conv_matrix(w, H, W):
    """Bake the 7x7 cross-correlation + zero padding into a banded matrix.

    Returns M of shape (2, HW, HW) with
      y[b, p_out] = sum_p avg[b, p] * M[0, p, p_out] + mx[b, p] * M[1, p, p_out]
    equal to conv2d(cat([avg, mx]), w, padding=SAME).  Built once on the host
    from the concrete conv weights (a weight-preprocessing step).
    """
    HW = H * W
    wn = np.asarray(w, dtype=np.float32).reshape(IN_CH, KSIZE, KSIZE)
    m = np.zeros((IN_CH, HW, HW), dtype=np.float32)
    rows = np.arange(H)
    cols = np.arange(W)
    for ky in range(KSIZE):
        dy = ky - PAD
        rv = rows[(rows + dy >= 0) & (rows + dy < H)]
        for kx in range(KSIZE):
            dx = kx - PAD
            cv = cols[(cols + dx >= 0) & (cols + dx < W)]
            if rv.size == 0 or cv.size == 0:
                continue
            p_out = (rv[:, None] * W + cv[None, :]).ravel()
            p_in = ((rv[:, None] + dy) * W + (cv[None, :] + dx)).ravel()
            m[0, p_in, p_out] += wn[0, ky, kx]
            m[1, p_in, p_out] += wn[1, ky, kx]
    return jnp.asarray(m)


def _build_edge_masks(H, W):
    """(2*KSIZE, HW) 0/1 masks: rows [0,7) = row-validity per dy, [7,14) = col per dx."""
    HW = H * W
    pos = np.arange(HW)
    row = pos // W
    col = pos % W
    m = np.zeros((2 * KSIZE, HW), dtype=np.float32)
    for t, d in enumerate(range(-PAD, PAD + 1)):
        m[t] = ((row + d >= 0) & (row + d < H)).astype(np.float32)
        m[KSIZE + t] = ((col + d >= 0) & (col + d < W)).astype(np.float32)
    return jnp.asarray(m)


# ---------------------------------------------------------------------------
# Tiling heuristics (VMEM-budget / generation aware)
# ---------------------------------------------------------------------------
def _vmem_limit_bytes():
    """Scoped-VMEM limit: half of physical VMEM, capped (v7x ~32 MiB, v5e/v6e ~64 MiB)."""
    try:
        cap = int(pltpu.get_tpu_info().vmem_capacity_bytes)
    except Exception:
        cap = 64 * 1024 * 1024           # conservative fallback: v7x per-core VMEM
    return max(16 * 1024 * 1024, min(cap // 2, 64 * 1024 * 1024))


def _pick_tiles(N, C, HW, itemsize, vmem_limit, fixed_bytes):
    # Batch tile: fold batches into sublanes (<= 8), but keep >= 2 steps on the
    # "parallel" grid axis whenever N >= 2 so both v7x TensorCores get work
    # (negligible cost on the single-core v5e/v6e parts).
    bt_cap = 8 if N < 2 else min(8, max(1, N // 2))
    bt = next(d for d in range(min(N, bt_cap), 0, -1) if N % d == 0)

    # Channel chunk: largest divisor of C whose double-buffered input block
    # fits the budget (big blocks -> HBM roofline for the streaming reduction).
    # Prefer ct == C or ct % 8 == 0 so the (ct, HW) trailing dims obey the
    # (8, 128) block-tiling rule.
    fixed = fixed_bytes + 4 * bt * HW * 4            # scratch (x2) + dbl-buffered out
    budget = int(0.7 * vmem_limit) - fixed

    def fits(d):
        return 2 * bt * d * HW * itemsize <= budget

    ct = None
    for d in range(C, 0, -1):
        if C % d == 0 and (d == C or d % 8 == 0) and fits(d):
            ct = d
            break
    if ct is None:
        ct = next((d for d in range(C, 0, -1) if C % d == 0 and fits(d)), 1)
    return bt, ct


# ---------------------------------------------------------------------------
# Wrapper
# ---------------------------------------------------------------------------
def spatial_attention(x, w, *, force_path=None):
    """x: (N, C, H, W) float32; w: (1, 2, KSIZE, KSIZE) conv weight (OIHW)."""
    N, C, H, W = x.shape
    HW = H * W
    itemsize = x.dtype.itemsize

    use_mxu = IN_CH * HW * HW * 4 <= _MXU_MATRIX_BYTES_CAP
    if force_path is not None:
        use_mxu = force_path == "mxu"

    if use_mxu:
        conv_mat = _build_conv_matrix(w, H, W)                # (2, HW, HW) f32
        fixed_bytes = 2 * int(conv_mat.size) * 4
    else:
        w_flat = jnp.asarray(w, jnp.float32).reshape(-1)      # (2*K*K,), order [c, ky, kx]
        masks = _build_edge_masks(H, W)                       # (2*K, HW) f32
        fixed_bytes = 2 * int(masks.size) * 4

    vmem_limit = _vmem_limit_bytes()
    bt, ct = _pick_tiles(N, C, HW, itemsize, vmem_limit, fixed_bytes)

    # Group batches so every BlockSpec's trailing dims equal the full array
    # dims (valid for any bt, including bt == 1 for the v7x megacore split).
    x_r = x.reshape(N // bt, bt, C, HW)
    grid = (N // bt, C // ct)                                 # reduction (channel) axis last

    x_spec = pl.BlockSpec((pl.Squeezed(), bt, ct, HW), lambda b, c: (b, 0, c, 0))
    out_spec = pl.BlockSpec((pl.Squeezed(), bt, HW), lambda b, c: (b, 0, 0))

    cost = pl.CostEstimate(
        flops=int(N * HW * (2 * C + 6 * KSIZE * KSIZE)),
        transcendentals=int(N * HW),
        bytes_accessed=int(x.size * itemsize + N * HW * itemsize + fixed_bytes // 2),
    )

    if use_mxu:
        kernel = functools.partial(sa_kernel_mxu, C=C)
        in_specs = [x_spec,
                    pl.BlockSpec((IN_CH, HW, HW), lambda b, c: (0, 0, 0))]
        operands = (x_r, conv_mat)
    else:
        kernel = functools.partial(sa_kernel_roll, H=H, W=W, C=C)
        in_specs = [x_spec,
                    pl.BlockSpec(memory_space=pltpu.MemorySpace.SMEM),
                    pl.BlockSpec((2 * KSIZE, HW), lambda b, c: (0, 0))]
        operands = (x_r, w_flat, masks)

    out = pl.pallas_call(
        kernel,
        out_shape=jax.ShapeDtypeStruct((N // bt, bt, HW), x.dtype),
        grid=grid,
        in_specs=in_specs,
        out_specs=out_spec,
        scratch_shapes=[
            pltpu.VMEM((bt, HW), jnp.float32),   # running channel sum
            pltpu.VMEM((bt, HW), jnp.float32),   # running channel max
        ],
        compiler_params=pltpu.CompilerParams(
            dimension_semantics=("parallel", "arbitrary"),
            vmem_limit_bytes=int(vmem_limit)),
        cost_estimate=cost,
    )(*operands)

    return out.reshape(N, 1, H, W)


# ---------------------------------------------------------------------------
# Reference + test
# ---------------------------------------------------------------------------
def reference(x, w):
    avg = jnp.mean(x, axis=1, keepdims=True)
    mx = jnp.max(x, axis=1, keepdims=True)
    cat = jnp.concatenate([avg, mx], axis=1)
    y = jax.lax.conv_general_dilated(
        cat, w, window_strides=(1, 1), padding="SAME",
        dimension_numbers=("NCHW", "OIHW", "NCHW"),
        precision=jax.lax.Precision.HIGHEST)
    return jax.nn.sigmoid(y)


if __name__ == "__main__":
    key = jax.random.PRNGKey(0)
    kx_key, kw_key = jax.random.split(key)

    N, C, H, W = 2, 4, 16, 16
    x = jax.random.normal(kx_key, (N, C, H, W), dtype=jnp.float32)

    # Deterministic Conv2d(2, 1, 7, bias=False) weight init (PyTorch default:
    # kaiming-uniform with a=sqrt(5) -> U(-1/sqrt(fan_in), 1/sqrt(fan_in))).
    fan_in = IN_CH * KSIZE * KSIZE
    bound = 1.0 / np.sqrt(fan_in)
    w = jax.random.uniform(kw_key, (1, IN_CH, KSIZE, KSIZE),
                           dtype=jnp.float32, minval=-bound, maxval=bound)

    ref = jax.block_until_ready(reference(x, w))

    # Default path at this shape: conv-as-matmul on the MXU.  Tolerance leaves
    # headroom for MXU bf16-pass rounding in case HIGHEST lowers to fewer passes.
    out = jax.block_until_ready(spatial_attention(x, w))
    np.testing.assert_allclose(np.asarray(out), np.asarray(ref),
                               rtol=2e-3, atol=2e-3)

    # Large-plane fallback (stacked-roll + separable precomputed masks), forced
    # here at the small shape purely to validate it; pure-f32 VPU path.
    out_roll = jax.block_until_ready(spatial_attention(x, w, force_path="roll"))
    np.testing.assert_allclose(np.asarray(out_roll), np.asarray(ref),
                               rtol=1e-4, atol=1e-5)

    print("KERNEL_OK")
</pallas_src>

<mosaic_0001>
module attributes {stable_mosaic.version = 11 : i64} {
  func.func @sa_kernel_mxu(%arg0: i32, %arg1: i32, %arg2: memref<1x1x4x256xf32, #tpu.memory_space<vmem>>, %arg3: memref<2x256x256xf32, #tpu.memory_space<vmem>>, %arg4: memref<1x1x256xf32, #tpu.memory_space<vmem>>, %arg5: memref<1x256xf32, #tpu.memory_space<vmem>>, %arg6: memref<1x256xf32, #tpu.memory_space<vmem>>) attributes {dimension_semantics = [#tpu.dimension_semantics<parallel>, #tpu.dimension_semantics<arbitrary>], iteration_bounds = array<i64: 2, 1>, scalar_prefetch = 0 : i64, scratch_operands = 2 : i64, tpu.core_type = #tpu.core_type<tc>, window_params = [{transform_indices = @transform_0, window_bounds = array<i64: 1, 1, 4, 256>}, {pipeline_mode = #tpu.pipeline_mode<synchronous>, transform_indices = @transform_1, window_bounds = array<i64: 2, 256, 256>}, {transform_indices = @transform_2, window_bounds = array<i64: 1, 1, 256>}]} {
    %c0_i32 = arith.constant 0 : i32
    %0 = arith.cmpi eq, %arg1, %c0_i32 : i32
    %1 = arith.extui %0 : i1 to i32
    %c0_i32_0 = arith.constant 0 : i32
    %2 = arith.cmpi ne, %1, %c0_i32_0 : i32
    scf.if %2 {
      %cst_15 = arith.constant 0.000000e+00 : f32
      %16 = vector.broadcast %cst_15 : f32 to vector<1x256xf32>
      %c0_16 = arith.constant 0 : index
      %c0_17 = arith.constant 0 : index
      %17 = vector.load %arg5[%c0_16, %c0_17] : memref<1x256xf32, #tpu.memory_space<vmem>>, vector<1x256xf32>
      tpu.vector_store %arg5[%c0_16, %c0_17], %16 {strides = array<i32>} : memref<1x256xf32, #tpu.memory_space<vmem>>, vector<1x256xf32>,
      %cst_18 = arith.constant 0xFF800000 : f32
      %18 = vector.broadcast %cst_18 : f32 to vector<1x256xf32>
      %c0_19 = arith.constant 0 : index
      %c0_20 = arith.constant 0 : index
      %19 = vector.load %arg6[%c0_19, %c0_20] : memref<1x256xf32, #tpu.memory_space<vmem>>, vector<1x256xf32>
      tpu.vector_store %arg6[%c0_19, %c0_20], %18 {strides = array<i32>} : memref<1x256xf32, #tpu.memory_space<vmem>>, vector<1x256xf32>,
    } else {
    }
    %c0 = arith.constant 0 : index
    %c0_1 = arith.constant 0 : index
    %c0_2 = arith.constant 0 : index
    %c0_3 = arith.constant 0 : index
    %3 = vector.load %arg2[%c0, %c0_1, %c0_2, %c0_3] : memref<1x1x4x256xf32, #tpu.memory_space<vmem>>, vector<1x1x4x256xf32>
    %4 = vector.shape_cast %3 : vector<1x1x4x256xf32> to vector<1x4x256xf32>
    %c0_4 = arith.constant 0 : index
    %c0_5 = arith.constant 0 : index
    %5 = vector.load %arg5[%c0_4, %c0_5] : memref<1x256xf32, #tpu.memory_space<vmem>>, vector<1x256xf32>
    %cst = arith.constant dense<0.000000e+00> : vector<1x256xf32>
    %6 = vector.multi_reduction <add>, %4, %cst [1] : vector<1x4x256xf32> to vector<1x256xf32>
    %7 = arith.addf %5, %6 : vector<1x256xf32>
    %c0_6 = arith.constant 0 : index
    %c0_7 = arith.constant 0 : index
    %8 = vector.load %arg5[%c0_6, %c0_7] : memref<1x256xf32, #tpu.memory_space<vmem>>, vector<1x256xf32>
    tpu.vector_store %arg5[%c0_6, %c0_7], %7 {strides = array<i32>} : memref<1x256xf32, #tpu.memory_space<vmem>>, vector<1x256xf32>,
    %c0_8 = arith.constant 0 : index
    %c0_9 = arith.constant 0 : index
    %9 = vector.load %arg6[%c0_8, %c0_9] : memref<1x256xf32, #tpu.memory_space<vmem>>, vector<1x256xf32>
    %cst_10 = arith.constant dense<0xFF800000> : vector<1x256xf32>
    %10 = vector.multi_reduction <maximumf>, %4, %cst_10 [1] : vector<1x4x256xf32> to vector<1x256xf32>
    %11 = arith.maximumf %9, %10 : vector<1x256xf32>
    %c0_11 = arith.constant 0 : index
    %c0_12 = arith.constant 0 : index
    %12 = vector.load %arg6[%c0_11, %c0_12] : memref<1x256xf32, #tpu.memory_space<vmem>>, vector<1x256xf32>
    tpu.vector_store %arg6[%c0_11, %c0_12], %11 {strides = array<i32>} : memref<1x256xf32, #tpu.memory_space<vmem>>, vector<1x256xf32>,
    %c0_i32_13 = arith.constant 0 : i32
    %13 = arith.cmpi eq, %arg1, %c0_i32_13 : i32
    %14 = arith.extui %13 : i1 to i32
    %c0_i32_14 = arith.constant 0 : i32
    %15 = arith.cmpi ne, %14, %c0_i32_14 : i32
    scf.if %15 {
      %c0_15 = arith.constant 0 : index
      %c0_16 = arith.constant 0 : index
      %16 = vector.load %arg5[%c0_15, %c0_16] : memref<1x256xf32, #tpu.memory_space<vmem>>, vector<1x256xf32>
      %cst_17 = arith.constant 2.500000e-01 : f32
      %17 = vector.broadcast %cst_17 : f32 to vector<1x256xf32>
      %18 = arith.mulf %16, %17 : vector<1x256xf32>
      %c0_18 = arith.constant 0 : index
      %c0_19 = arith.constant 0 : index
      %19 = vector.load %arg6[%c0_18, %c0_19] : memref<1x256xf32, #tpu.memory_space<vmem>>, vector<1x256xf32>
      %c0_20 = arith.constant 0 : index
      %c0_21 = arith.constant 0 : index
      %c0_22 = arith.constant 0 : index
      %20 = vector.load %arg3[%c0_20, %c0_21, %c0_22] : memref<2x256x256xf32, #tpu.memory_space<vmem>>, vector<1x256x256xf32>
      %21 = vector.shape_cast %20 : vector<1x256x256xf32> to vector<256x256xf32>
      %cst_23 = arith.constant dense<0.000000e+00> : vector<1x256xf32>
      %22 = tpu.matmul %18, %21, %cst_23 {dimension_numbers = #tpu.dot_dimension_numbers<[1], [0], [0], [1], [0, 0, 1, 1], [], []>, precision = #tpu.contract_precision<fp32>} : vector<1x256xf32>, vector<256x256xf32>, vector<1x256xf32> -> vector<1x256xf32>
      %c1 = arith.constant 1 : index
      %c0_24 = arith.constant 0 : index
      %c0_25 = arith.constant 0 : index
      %23 = vector.load %arg3[%c1, %c0_24, %c0_25] : memref<2x256x256xf32, #tpu.memory_space<vmem>>, vector<1x256x256xf32>
      %24 = vector.shape_cast %23 : vector<1x256x256xf32> to vector<256x256xf32>
      %cst_26 = arith.constant dense<0.000000e+00> : vector<1x256xf32>
      %25 = tpu.matmul %19, %24, %cst_26 {dimension_numbers = #tpu.dot_dimension_numbers<[1], [0], [0], [1], [0, 0, 1, 1], [], []>, precision = #tpu.contract_precision<fp32>} : vector<1x256xf32>, vector<256x256xf32>, vector<1x256xf32> -> vector<1x256xf32>
      %26 = arith.addf %22, %25 : vector<1x256xf32>
      %27 = arith.negf %26 : vector<1x256xf32>
      %28 = math.exp %27 : vector<1x256xf32>
      %cst_27 = arith.constant 1.000000e+00 : f32
      %29 = vector.broadcast %cst_27 : f32 to vector<1x256xf32>
      %30 = arith.addf %29, %28 : vector<1x256xf32>
      %31 = arith.divf %29, %30 : vector<1x256xf32>
      %c0_28 = arith.constant 0 : index
      %c0_29 = arith.constant 0 : index
      %c0_30 = arith.constant 0 : index
      %32 = vector.load %arg4[%c0_28, %c0_29, %c0_30] : memref<1x1x256xf32, #tpu.memory_space<vmem>>, vector<1x1x256xf32>
      %33 = vector.shape_cast %32 : vector<1x1x256xf32> to vector<1x256xf32>
      %34 = vector.shape_cast %31 : vector<1x256xf32> to vector<1x1x256xf32>
      tpu.vector_store %arg4[%c0_28, %c0_29, %c0_30], %34 {strides = array<i32>} : memref<1x1x256xf32, #tpu.memory_space<vmem>>, vector<1x1x256xf32>,
    } else {
    }
    return
  }
  func.func @transform_0(%arg0: i32, %arg1: i32) -> (i32, i32, i32, i32) {
    %c0_i32 = arith.constant 0 : i32
    %c0_i32_0 = arith.constant 0 : i32
    %c0_i32_1 = arith.constant 0 : i32
    return %arg0, %c0_i32, %arg1, %c0_i32_0 : i32, i32, i32, i32
  }
  func.func @transform_1(%arg0: i32, %arg1: i32) -> (i32, i32, i32) {
    %c0_i32 = arith.constant 0 : i32
    %c0_i32_0 = arith.constant 0 : i32
    %c0_i32_1 = arith.constant 0 : i32
    %c0_i32_2 = arith.constant 0 : i32
    return %c0_i32, %c0_i32_0, %c0_i32_1 : i32, i32, i32
  }
  func.func @transform_2(%arg0: i32, %arg1: i32) -> (i32, i32, i32) {
    %c0_i32 = arith.constant 0 : i32
    %c0_i32_0 = arith.constant 0 : i32
    %c0_i32_1 = arith.constant 0 : i32
    return %arg0, %c0_i32, %c0_i32_0 : i32, i32, i32
  }
}

</mosaic_0001>

<bundles_post_ra>
// kernel: tpu_custom_call.1
= control target key start
LH: loop header
LB: loop body
LE: loop exit
PB: predicated region body
PF: predicated region fallthrough
CT: control target
= control target key end

     0   :  { %7 = vsyncpa [#allocation5], 0  ;;  %s6045_s0 = inlined_call_operand.hbm [shape: f32[2,1,4,256], index: 0, kind: input, shape index: {}]   ;;  %s6046_s1 = inlined_call_operand.hbm [shape: f32[2,256,256], index: 1, kind: input, shape index: {}]   ;;  %s6047_s2 = inlined_call_operand.hbm [shape: f32[2,1,256], index: 2, kind: output, shape index: {}]  }
   0x1   :  { %9 = vsyncpa [#allocation5 + $0x1], 0 }
   0x2   :  { %10 = vsyncpa [#allocation8], 0 }
   0x3   :  { %11 = vsyncpa [#allocation6], 0 }
   0x4   :  { %13 = vsyncpa [#allocation6 + $0x1], 0  ;;  %s3413_s9 = smov 0   ;;  %s3415_s10 = smov 0  }
   0x5   :  { %s3417_s11 = smov 0   ;;  %s3419_s12 = smov 0  }
   0x6   :  { %s3421_s13 = smov 0   ;;  %s3423_s14 = smov 0  }
   0x7 LB: > { %s3142_s15 = sadd.s32 4294967295, %s3388_s14   ;;  %s3143_s16 = sadd.s32 4294967294, %s3388_s14   ;;  %s3388_s14 = sphi %s3423_s14, %s19_s14   ;;  %s3384_s13 = sphi %s3421_s13, %s7274_s13   ;;  %s3380_s12 = sphi %s3419_s12, %s7273_s12   ;;  %s3376_s11 = sphi %s3417_s11, %s7272_s11   ;;  %s3372_s10 = sphi %s3415_s10, %s7271_s10   ;;  %s3368_s9 = sphi %s3413_s9, %s7270_s9  }
   0x8   : > { %p53_p0 = scmp.ne.s32.totalorder %s3372_s10, %s3368_s9  ;;  %p3447_p1 = scmp.eq.s32.totalorder %s3142_s15, 0 }
   0x9   : > { %p3451_p2 = scmp.eq.s32.totalorder %s3142_s15, 1  ;;  %p104_p3 = scmp.eq.s32.totalorder %s3143_s16, 1 }
   0xa   : > { %p3457_p4 = por %p3447_p1, %p53_p0  ;;  %p3144_p5 = scmp.ge.s32.totalorder %s3388_s14, 1 }
   0xb   : > { %p3462_p6 = por %p104_p3, %p53_p0  ;;  %p111_p7 = scmp.lt.s32.totalorder %s3388_s14, 3 }
   0xc   : > { %s6470_s19 = scalar_select %p3457_p4, 1, 0 }
   0xd   : > { %s6471_s20 = scalar_select %p3462_p6, 1, 0 }
   0xe   : > { %p3467_p8 = pnand %p3144_p5, %p111_p7  ;;  %s3390_s22 = smov [#allocation7]  }
   0xf   : > { %s123_s23 = sshll.u32 %s3390_s22, 4  ;;  %s31_s25 = sadd.s32 1, %s3384_s13  ;;  %s124_s23 = int_to_ptr.vmem [resolvable:$true] %s123_s23 }
  0x10   : > { %p3171_p9 = pneg %p3467_p8  ;;  %s3261_s26 = scalar_lea.vmem %s124_s23, 16384 }
  0x11   : > { %p3262_p13 = scmp.ne.s32.totalorder %s124_s23, %s3261_s26  ;;  %p3269_p5 = scmp.lt.s32.totalorder %s124_s23, %s124_s23 }
  0x12   : > { %p3476_p11 = pnand %p3171_p9, %p3447_p1  ;;  %p3270_p7 = scmp.lt.s32.totalorder %s3261_s26, %s3261_s26 }
  0x14   : > { %p3252_p12 = pneg %p3476_p11  ;;  %p3271_p6 = por %p3270_p7, %p3269_p5 }
  0x16   : > { %p3264_p0 = pnand %p3262_p13, %p3252_p12 }
  0x18   : > { %p3265_p3 = pneg %p3264_p0 }
  0x1a   : > { %p3272_p4 = pnand %p3271_p6, %p3265_p3 }
  0x1c   : > { %3275 = shalt.err (!%p3272_p4)
}
  0x1d   : > { %s3391_s27 = smov 256   ;;  %s3392_s28 = smov 16  }
  0x1e   : > { %3174 = dma.hbm_to_vmem [thread:$0]  (!%p3476_p11), %s6046_s1, 16384, %s124_s23, [#allocation8], %s3391_s27, %s3391_s27, %s3392_s28  }
  0x1f   : > { %p33_p6 = scmp.ge.s32.totalorder %s31_s25, 2  ;;  %s40_s3 = sadd.s32 1, %s3376_s11 }
  0x20   : > { %p47_p4 = scmp.ne.s32.totalorder %s3376_s11, %s3372_s10  ;;  %p48_p9 = scmp.eq.s32.totalorder %s3388_s14, 0 }
  0x21   : > { %s7276_s25 = smov (%p33_p6, %s31_s25), 0  ;;  %p3184_p0 = scmp.lt.s32.totalorder %s3388_s14, 2 }
  0x22   : > { %p3494_p12 = por %p48_p9, %p47_p4  ;;  %p3500_p13 = por %p3451_p2, %p47_p4 }
  0x23   : > { %s35_s6 = ssub.s32 %s3384_s13, %s7276_s25  ;;  %s137_s7 = sand.u32 1, %s3376_s11  }
  0x24   : > { %p38_p11 = scmp.eq.s32.totalorder %s35_s6, 0  ;;  %s3147_s8 = sshll.u32 %s137_s7, 3 }
  0x25   : > { %s3161_s16 = sshll.u32 %s3384_s13, 7  ;;  %s141_s26 = scalar_lea.vmem [#allocation4], %s3147_s8 }
  0x26   : > { %s3509_s15 = scalar_select %p38_p11, %s3376_s11, %s40_s3  }
  0x27   : > { %s149_s24 = scalar_lea.hbm %s6045_s0, %s3161_s16  ;;  %s151_s27 = sshll.u32 %s141_s26, 4  ;;  %s152_s27 = int_to_ptr.vmem [resolvable:$true] %s151_s27 }
  0x28   : > { %p3517_p2 = pnand %p3184_p0, %p3494_p12  ;;  %s138_s28 = scalar_lea.sflag [#allocation5], %s137_s7 }
  0x29   : > { %s3289_s29 = scalar_lea.vmem %s152_s27, 128  ;;  %s3393_s30 = smov [#allocation4]  }
  0x2a   : > { %p3278_p3 = pneg %p3517_p2  ;;  %p3290_p5 = scmp.ne.s32.totalorder %s152_s27, %s3289_s29 }
  0x2b   : > { %s3294_s3 = sshll.u32 %s3393_s30, 4  ;;  %s3295_s3 = int_to_ptr.vmem [resolvable:$false] %s3294_s3 }
  0x2c   : > { %p3292_p7 = pnand %p3290_p5, %p3278_p3  ;;  %s3296_s6 = scalar_lea.vmem %s3295_s3, 256 }
  0x2d   : > { %p3297_p4 = scmp.lt.s32.totalorder %s152_s27, %s3295_s3  ;;  %p3298_p9 = scmp.lt.s32.totalorder %s3296_s6, %s3289_s29 }
  0x2e   : > { %p3293_p6 = pneg %p3292_p7 }
  0x2f   : > { %p3299_p11 = por %p3298_p9, %p3297_p4 }
  0x31   : > { %p3300_p10 = pnand %p3299_p11, %p3293_p6 }
  0x33   : > { %3303 = shalt.err (!%p3300_p10)
}
  0x34   : > { %3178 = dma.hbm_to_vmem [thread:$0]  (!%p3517_p2), %s149_s24, 128, %s152_s27, %s138_s28  }
  0x35   : > { %160 = sbr.rel (%p3467_p8) target bundleno = 772 (0x304), region = 28 }
  0x3a   : > { %s3528_s4 = sand.u32 1, %s3372_s10   ;;  %p6477_p12 = scmp.ne.s32.totalorder %s6470_s19, 0 }
  0x3b   : > { %s3151_s7 = sshll.u32 %s3528_s4, 3  ;;  %s163_s8 = scalar_lea.sflag [#allocation5], %s3528_s4 }
  0x3c   : > { %s3532_s16 = scalar_lea.vmem [#allocation4], %s3151_s7 }
  0x3d   : > { %3355 = dma.done.wait (%p6477_p12), %s163_s8, 128  }
  0x3e   : > { %3357 = vsyncadd (%p6477_p12), %s163_s8, 4294967168 }
  0x3f   : > { %3359 = dma.done.wait (%p3447_p1), [#allocation8], 16384  }
  0x40   : > { %3361 = vsyncadd (%p3447_p1), [#allocation8], 4294950912  ;;  %v195_v0 = vlaneseq  ;;  %v6478_v1 = vmov 0  ;;  %v3394_v2 = vmov 1966171168   ;;  %v3395_v4 = vmov 0.0  }
  0x41   : > { %v225_v3 = vunpack.c.l.s4 %v3394_v2  ;;  %v3396_v5 = vmov -inf   ;;  %v382_v8 = vld [vmem:[#allocation7 + $0x2f8] sm:$0xff]  ;;  %v381_v9 = vld [vmem:[#allocation7 + $0x2f0] sm:$0xff]  ;;  %v380_v10 = vld [vmem:[#allocation7 + $0x2e8] sm:$0xff]  ;;  %vm206_vm1 = vcmask 1043456   ;;  %s3153_s17 = sshll.u32 %s3528_s4, 1 }
  0x42   : > { %vm3542_vm0 = vcmp.lt.s32.totalorder %v195_v0, 256  ;;  %v3550_v7 = vshrl.u32 %v195_v0, 7  ;;  %v3552_v11 = vand.u32 4294901760, %v382_v8  ;;  %v3554_v12 = vand.u32 4294901760, %v381_v9  ;;  %v379_v14 = vld [vmem:[#allocation7 + $0x2e0] sm:$0xff]  ;;  %v378_v15 = vld [vmem:[#allocation7 + $0x2d8] sm:$0xff] }
  0x43   : > { %v6479_v1 = vsel %vm3542_vm0, 4294967295, %v6478_v1  ;;  %199 = vst.msk [vmem:[#allocation2] sm:$0x3] %vm3542_vm0, %v3395_v4  ;;  %200 = vst.msk [vmem:[#allocation3] sm:$0x3] %vm3542_vm0, %v3396_v5  ;;  %v226_v6 = vunpack.c.0.s8 %v225_v3  ;;  %v3556_v13 = vand.u32 4294901760, %v380_v10 }
  0x44   : > { %6480 = vst [vmem:[#allocation13_spill] sm:$0xff] %v6479_v1  ;;  %6481 = vst [vmem:[#allocation14_spill] sm:$0xff] %v3550_v7  ;;  %v377_v16 = vld [vmem:[#allocation7 + $0x2d0] sm:$0xff]  ;;  %v3558_v17 = vand.u32 4294901760, %v379_v14  ;;  %v3560_v18 = vand.u32 4294901760, %v378_v15  ;;  %v376_v20 = vld [vmem:[#allocation7 + $0x2c8] sm:$0xff]  ;;  %427 = vmatprep.subr.mxu0 %v3552_v11  ;;  %v3578_v27 = vsub.f32 %v382_v8, %v3552_v11  ;;  %v3591_v32 = vsub.f32 %v381_v9, %v3554_v12 }
  0x45   : > { %v3562_v19 = vand.u32 4294901760, %v377_v16  ;;  %v375_v21 = vld [vmem:[#allocation7 + $0x2c0] sm:$0xff]  ;;  %v3564_v22 = vld [vmem:[#allocation7 + $0x2b8] sm:$0xff]  ;;  %v3567_v23 = vsub.s32 %v226_v6, %v3550_v7  ;;  %v3570_v24 = vand.u32 4294901760, %v376_v20  ;;  %v3580_v28 = vld [vmem:[#allocation7 + $0x2b0] sm:$0xff]  ;;  %429 = vmatpush1.msra.mxu0 %v3554_v12  ;;  %v3597_v34 = vsub.f32 %v380_v10, %v3556_v13  ;;  %s3162_s19 = sshll.u32 %s3380_s12, 5 }
  0x46   : > { %v3572_v25 = vand.u32 4294901760, %v375_v21  ;;  %v3575_v26 = vand.u32 4294901760, %v3564_v22  ;;  %6483 = vst [vmem:[#allocation16_spill] sm:$0xff] %v3578_v27  ;;  %v3582_v29 = vld [vmem:[#allocation7 + $0x2a8] sm:$0xff]  ;;  %v3584_v30 = vld [vmem:[#allocation7 + $0x2a0] sm:$0xff]  ;;  %v3588_v31 = vand.u32 4294901760, %v3580_v28  ;;  %431 = vmatprep.subr.mxu0 %v3556_v13  ;;  %v3611_v40 = vsub.f32 %v379_v14, %v3558_v17  ;;  %s3049_s26 = scalar_lea.hbm %s6047_s2, %s3162_s19 }
  0x47   : > { %6482 = vst [vmem:[#allocation15_spill] sm:$0xff] %v3567_v23  ;;  %v3594_v33 = vand.u32 4294901760, %v3582_v29  ;;  %v3599_v35 = vld [vmem:[#allocation7 + $0x298] sm:$0xff]  ;;  %v3601_v36 = vld [vmem:[#allocation7 + $0x290] sm:$0xff]  ;;  %v3603_v37 = vld [vmem:[#allocation7 + $0x288] sm:$0xff]  ;;  %v6060_v38 = vand.u32 4294901760, %v3578_v27  ;;  %433 = vmatpush1.msra.mxu0 %v3558_v17  ;;  %v3620_v44 = vsub.f32 %v378_v15, %v3560_v18  ;;  %v3633_v49 = vsub.f32 %v377_v16, %v3562_v19 }
  0x48   : > { %v3608_v39 = vand.u32 4294901760, %v3584_v30  ;;  %v3614_v41 = vand.u32 4294901760, %v3599_v35  ;;  %v6058_v42 = vand.u32 4294901760, %v3591_v32  ;;  %v6057_v43 = vand.u32 4294901760, %v3597_v34  ;;  %v3625_v46 = vld [vmem:[#allocation7 + $0x280] sm:$0xff]  ;;  %435 = vmatprep.subr.mxu0 %v3560_v18  ;;  %v3649_v55 = vld [vmem:[#allocation7 + $0x278] sm:$0xff] }
  0x49   : > { %v3623_v45 = vand.u32 4294901760, %v3601_v36  ;;  %v574_v47 = vsub.f32 %v3578_v27, %v6060_v38  ;;  %v6055_v48 = vand.u32 4294901760, %v3611_v40  ;;  %v3636_v50 = vand.u32 4294901760, %v3603_v37  ;;  %437 = vmatpush1.msra.mxu0 %v3562_v19  ;;  %v3659_v60 = vld [vmem:[#allocation7 + $0x270] sm:$0xff]  ;;  %v3666_v2 = vld [vmem:[#allocation7 + $0x268] sm:$0xff]  ;;  %v3678_v8 = vld [vmem:[#allocation7 + $0x260] sm:$0xff] }
  0x4a   : > { %v580_v51 = vsub.f32 %v3591_v32, %v6058_v42  ;;  %v586_v52 = vsub.f32 %v3597_v34, %v6057_v43  ;;  %v6053_v53 = vand.u32 4294901760, %v3620_v44  ;;  %v3647_v54 = vsub.f32 %v376_v20, %v3570_v24  ;;  %439 = vmatprep.subr.mxu0 %v3570_v24  ;;  %v3691_v16 = vld [vmem:[#allocation7 + $0x258] sm:$0xff]  ;;  %v3769_v43 = vld [vmem:[#allocation7 + $0x230] sm:$0xff]  ;;  %v3782_v38 = vld [vmem:[#allocation7 + $0x228] sm:$0xff]  ;;  %s190_s21 = scalar_lea.vmem [#allocation9], %s3153_s17  ;;  %s3037_s27 = scalar_lea.sflag [#allocation6], %s3528_s4 }
  0x4b   : > { %v575_v56 = vand.u32 4294901760, %v574_v47  ;;  %v592_v57 = vsub.f32 %v3611_v40, %v6055_v48  ;;  %v6052_v58 = vand.u32 4294901760, %v3633_v49  ;;  %v3657_v59 = vand.u32 4294901760, %v3625_v46  ;;  %441 = vmatpush1.msra.mxu0 %v3572_v25  ;;  %s3051_s22 = sshll.u32 %s190_s21, 4  ;;  %s3397_s12 = smov [#allocation9]   ;;  %s3052_s22 = int_to_ptr.vmem [resolvable:$true] %s3051_s22 }
  0x4c   : > { %v581_v61 = vand.u32 4294901760, %v580_v51  ;;  %v587_v62 = vand.u32 4294901760, %v586_v52  ;;  %v598_v63 = vsub.f32 %v3620_v44, %v6053_v53  ;;  %v6050_v0 = vand.u32 4294901760, %v3647_v54  ;;  %443 = vmatprep.subr.mxu0 %v3575_v26  ;;  %s3304_s18 = scalar_lea.vmem %s3052_s22, 32  ;;  %s3308_s28 = sshll.u32 %s3397_s12, 4  ;;  %s3309_s28 = int_to_ptr.vmem [resolvable:$false] %s3308_s28 }
  0x4d   : > { %576 = vmatprep.subr.mxu1 %v575_v56  ;;  %v593_v3 = vand.u32 4294901760, %v592_v57  ;;  %v604_v4 = vsub.f32 %v3633_v49, %v6052_v58  ;;  %v3673_v5 = vsub.f32 %v375_v21, %v3572_v25  ;;  %v3676_v6 = vand.u32 4294901760, %v3649_v55  ;;  %445 = vmatpush1.msra.mxu0 %v3588_v31  ;;  %v3748_v58 = vld [vmem:[#allocation7 + $0x240] sm:$0xff]  ;;  %p3305_p1 = scmp.ne.s32.totalorder %s3052_s22, %s3304_s18  ;;  %s3310_s29 = scalar_lea.vmem %s3309_s28, 64 }
  0x4e   : > { %582 = vmatpush1.msra.mxu1 %v581_v61  ;;  %v599_v9 = vand.u32 4294901760, %v598_v63  ;;  %v610_v10 = vsub.f32 %v3647_v54, %v6050_v0  ;;  %v3686_v14 = vsub.f32 %v3564_v22, %v3575_v26  ;;  %v3689_v15 = vand.u32 4294901760, %v3659_v60  ;;  %447 = vmatprep.subr.mxu0 %v3594_v33  ;;  %v3702_v22 = vld [vmem:[#allocation7 + $0x250] sm:$0xff]  ;;  %p3311_p0 = scmp.lt.s32.totalorder %s3052_s22, %s3309_s28  ;;  %p3312_p2 = scmp.lt.s32.totalorder %s3310_s29, %s3304_s18 }
  0x4f   : > { %6484 = vst [vmem:[#allocation17_spill] sm:$0xff] %v3676_v6  ;;  %588 = vmatprep.subr.mxu1 %v587_v62  ;;  %v605_v20 = vand.u32 4294901760, %v604_v4  ;;  %v6049_v21 = vand.u32 4294901760, %v3673_v5  ;;  %v3697_v47 = vsub.f32 %v3580_v28, %v3588_v31  ;;  %v3700_v51 = vand.u32 4294901760, %v3666_v2  ;;  %449 = vmatpush1.msra.mxu0 %v3608_v39  ;;  %p3306_p8 = pnand %p3305_p1, %p3500_p13 }
  0x50   : > { %6485 = vst [vmem:[#allocation18_spill] sm:$0xff] %v3689_v15  ;;  %594 = vmatpush1.msra.mxu1 %v593_v3  ;;  %v611_v52 = vand.u32 4294901760, %v610_v10  ;;  %v6051_v56 = vand.u32 4294901760, %v3686_v14  ;;  %v3708_v57 = vsub.f32 %v3582_v29, %v3594_v33  ;;  %v3711_v61 = vand.u32 4294901760, %v3678_v8  ;;  %451 = vmatprep.subr.mxu0 %v3614_v41  ;;  %v3725_v29 = vld [vmem:[#allocation7 + $0x248] sm:$0xff]  ;;  %p3313_p3 = por %p3312_p2, %p3311_p0 }
  0x51   : > { %6486 = vst [vmem:[#allocation19_spill] sm:$0xff] %v3697_v47  ;;  %6487 = vst [vmem:[#allocation20_spill] sm:$0xff] %v3700_v51  ;;  %600 = vmatprep.subr.mxu1 %v599_v9  ;;  %v616_v28 = vsub.f32 %v3673_v5, %v6049_v21  ;;  %v6054_v62 = vand.u32 4294901760, %v3697_v47  ;;  %v3720_v63 = vsub.f32 %v3584_v30, %v3608_v39  ;;  %v3723_v3 = vand.u32 4294901760, %v3691_v16  ;;  %p3307_p10 = pneg %p3306_p8 }
  0x52   : > { %6488 = vst [vmem:[#allocation21_spill] sm:$0xff] %v3708_v57  ;;  %6489 = vst [vmem:[#allocation22_spill] sm:$0xff] %v3711_v61  ;;  %453 = vmatpush1.msra.mxu0 %v3623_v45  ;;  %606 = vmatpush1.msra.mxu1 %v605_v20  ;;  %v622_v4 = vsub.f32 %v3686_v14, %v6051_v56  ;;  %v6056_v9 = vand.u32 4294901760, %v3708_v57  ;;  %v3734_v10 = vsub.f32 %v3599_v35, %v3614_v41 }
  0x53   : > { %6490 = vst [vmem:[#allocation23_spill] sm:$0xff] %v3720_v63  ;;  %6491 = vst [vmem:[#allocation24_spill] sm:$0xff] %v3723_v3  ;;  %v3737_v30 = vand.u32 4294901760, %v3702_v22  ;;  %455 = vmatprep.subr.mxu0 %v3636_v50  ;;  %612 = vmatprep.subr.mxu1 %v611_v52  ;;  %v617_v21 = vand.u32 4294901760, %v616_v28  ;;  %v628_v20 = vsub.f32 %v3697_v47, %v6054_v62  ;;  %v6059_v0 = vand.u32 4294901760, %v3720_v63  ;;  %v3758_v62 = vld [vmem:[#allocation7 + $0x238] sm:$0xff]  ;;  %p3314_p5 = pnand %p3313_p3, %p3307_p10 }
  0x54   : > { %6492 = vst [vmem:[#allocation25_spill] sm:$0xff] %v3734_v10  ;;  %v3746_v56 = vsub.f32 %v3601_v36, %v3623_v45  ;;  %457 = vmatpush1.msra.mxu0 %v3657_v59  ;;  %v623_v35 = vand.u32 4294901760, %v622_v4  ;;  %v634_v52 = vsub.f32 %v3708_v57, %v6056_v9  ;;  %v6061_v28 = vand.u32 4294901760, %v3734_v10 }
  0x55   : > { %6493 = vst [vmem:[#allocation26_spill] sm:$0xff] %v3737_v30  ;;  %v3756_v53 = vand.u32 4294901760, %v3725_v29  ;;  %618 = vmatpush1.msra.mxu1 %v617_v21  ;;  %459 = vmatprep.subr.mxu0 %v3676_v6  ;;  %v629_v36 = vand.u32 4294901760, %v628_v20  ;;  %v640_v48 = vsub.f32 %v3720_v63, %v6059_v0  ;;  %v3767_v9 = vsub.f32 %v3603_v37, %v3636_v50 }
  0x56   : > { %6494 = vst [vmem:[#allocation27_spill] sm:$0xff] %v3746_v56  ;;  %v6066_v4 = vand.u32 4294901760, %v3746_v56  ;;  %624 = vmatprep.subr.mxu1 %v623_v35  ;;  %461 = vmatpush1.msra.mxu0 %v3689_v15  ;;  %v635_v42 = vand.u32 4294901760, %v634_v52  ;;  %v646_v21 = vsub.f32 %v3734_v10, %v6061_v28  ;;  %v3776_v20 = vand.u32 4294901760, %v3748_v58  ;;  %v3792_v10 = vld [vmem:[#allocation7 + $0x220] sm:$0xff] }
  0x57   : > { %6495 = vst [vmem:[#allocation28_spill] sm:$0xff] %v3756_v53  ;;  %6496 = vst [vmem:[#allocation29_spill] sm:$0xff] %v3767_v9  ;;  %v3780_v0 = vsub.f32 %v3625_v46, %v3657_v59  ;;  %630 = vmatpush1.msra.mxu1 %v629_v36  ;;  %463 = vmatprep.subr.mxu0 %v3700_v51  ;;  %v641_v37 = vand.u32 4294901760, %v640_v48  ;;  %v3790_v28 = vand.u32 4294901760, %v3758_v62  ;;  %v3801_v63 = vand.u32 4294901760, %v3769_v43 }
  0x58   : > { %6497 = vst [vmem:[#allocation30_spill] sm:$0xff] %v3776_v20  ;;  %v652_v35 = vsub.f32 %v3746_v56, %v6066_v4  ;;  %636 = vmatprep.subr.mxu1 %v635_v42  ;;  %465 = vmatpush1.msra.mxu0 %v3711_v61  ;;  %v647_v46 = vand.u32 4294901760, %v646_v21  ;;  %v3798_v48 = vsub.f32 %v3649_v55, %v3676_v6  ;;  %v3803_v4 = vld [vmem:[#allocation7 + $0x218] sm:$0xff]  ;;  %v6502_v42 = vand.u32 4294901760, %v3767_v9 }
  0x59   : > { %6498 = vst [vmem:[#allocation31_spill] sm:$0xff] %v3780_v0  ;;  %6499 = vst [vmem:[#allocation32_spill] sm:$0xff] %v3790_v28  ;;  %v6073_v36 = vand.u32 4294901760, %v3780_v0  ;;  %642 = vmatpush1.msra.mxu1 %v641_v37  ;;  %467 = vmatprep.subr.mxu0 %v3723_v3  ;;  %v3811_v21 = vsub.f32 %v3659_v60, %v3689_v15  ;;  %v3814_v55 = vand.u32 4294901760, %v3782_v38  ;;  %v3828_v60 = vld [vmem:[#allocation7 + $0x210] sm:$0xff] }
  0x5a   : > { %6500 = vst [vmem:[#allocation33_spill] sm:$0xff] %v3798_v48  ;;  %6501 = vst [vmem:[#allocation34_spill] sm:$0xff] %v3801_v63  ;;  %v653_v52 = vand.u32 4294901760, %v652_v35  ;;  %v658_v56 = vsub.f32 %v3767_v9, %v6502_v42  ;;  %648 = vmatprep.subr.mxu1 %v647_v46  ;;  %469 = vmatpush1.msra.mxu0 %v3737_v30  ;;  %v3823_v57 = vsub.f32 %v3666_v2, %v3700_v51  ;;  %v3839_v2 = vld [vmem:[#allocation7 + $0x208] sm:$0xff] }
  0x5b   : > { %6503 = vst [vmem:[#allocation35_spill] sm:$0xff] %v3811_v21  ;;  %6504 = vst [vmem:[#allocation36_spill] sm:$0xff] %v3814_v55  ;;  %v664_v37 = vsub.f32 %v3780_v0, %v6073_v36  ;;  %v3826_v42 = vand.u32 4294901760, %v3792_v10  ;;  %471 = vmatprep.subr.mxu0 %v3756_v53  ;;  %v3834_v36 = vsub.f32 %v3678_v8, %v3711_v61  ;;  %v3837_v35 = vand.u32 4294901760, %v3803_v4 }
  0x5c   : > { %6505 = vst [vmem:[#allocation37_spill] sm:$0xff] %v3823_v57  ;;  %654 = vmatpush1.msra.mxu1 %v653_v52  ;;  %v659_v46 = vand.u32 4294901760, %v658_v56  ;;  %473 = vmatpush1.msra.mxu0 %v3776_v20  ;;  %v6509_v51 = vand.u32 4294901760, %v3798_v48  ;;  %v3848_v9 = vsub.f32 %v3691_v16, %v3723_v3  ;;  %v6511_v8 = vand.u32 4294901760, %v3811_v21  ;;  %v3862_v56 = vld [vmem:[#allocation7 + $0x200] sm:$0xff] }
  0x5d   : > { %6506 = vst [vmem:[#allocation38_spill] sm:$0xff] %v3826_v42  ;;  %6507 = vst [vmem:[#allocation39_spill] sm:$0xff] %v3834_v36  ;;  %v665_v0 = vand.u32 4294901760, %v664_v37  ;;  %475 = vmatprep.subr.mxu0 %v3790_v28  ;;  %v3856_v37 = vand.u32 4294901760, %v3828_v60  ;;  %v3870_v15 = vand.u32 4294901760, %v3839_v2  ;;  %v3890_v47 = vand.u32 4294901760, %v3862_v56 }
  0x5e   : > { %6508 = vst [vmem:[#allocation40_spill] sm:$0xff] %v3837_v35  ;;  %v670_v52 = vsub.f32 %v3798_v48, %v6509_v51  ;;  %6510 = vst [vmem:[#allocation41_spill] sm:$0xff] %v3848_v9  ;;  %660 = vmatprep.subr.mxu1 %v659_v46  ;;  %v676_v61 = vsub.f32 %v3811_v21, %v6511_v8  ;;  %v3860_v51 = vsub.f32 %v3702_v22, %v3737_v30  ;;  %v3872_v21 = vld [vmem:[#allocation7 + $0x3f8] sm:$0xff] }
  0x5f   : > { %6512 = vst [vmem:[#allocation42_spill] sm:$0xff] %v3856_v37  ;;  %666 = vmatpush1.msra.mxu1 %v665_v0  ;;  %477 = vmatpush1.msra.mxu0 %v3801_v63  ;;  %v6514_v46 = vand.u32 4294901760, %v3823_v57  ;;  %6515 = vst [vmem:[#allocation44_spill] sm:$0xff] %v3870_v15  ;;  %v6516_v22 = vand.u32 4294901760, %v3834_v36  ;;  %v3881_v30 = vsub.f32 %v3725_v29, %v3756_v53 }
  0x60   : > { %6513 = vst [vmem:[#allocation43_spill] sm:$0xff] %v3860_v51  ;;  %v671_v16 = vand.u32 4294901760, %v670_v52  ;;  %v677_v3 = vand.u32 4294901760, %v676_v61  ;;  %479 = vmatprep.subr.mxu0 %v3814_v55  ;;  %v6518_v61 = vand.u32 4294901760, %v3848_v9  ;;  %6519 = vst [vmem:[#allocation46_spill] sm:$0xff] %v3890_v47  ;;  %v3896_v52 = vld [vmem:[#allocation7 + $0x3e8] sm:$0xff] }
  0x61   : > { %v682_v48 = vsub.f32 %v3823_v57, %v6514_v46  ;;  %v688_v0 = vsub.f32 %v3834_v36, %v6516_v22  ;;  %6517 = vst [vmem:[#allocation45_spill] sm:$0xff] %v3881_v30  ;;  %v3883_v46 = vld [vmem:[#allocation7 + $0x3f0] sm:$0xff]  ;;  %481 = vmatpush1.msra.mxu0 %v3826_v42  ;;  %v3894_v22 = vsub.f32 %v3748_v58, %v3776_v20 }
  0x62   : > { %672 = vmatprep.subr.mxu1 %v671_v16  ;;  %v694_v57 = vsub.f32 %v3848_v9, %v6518_v61  ;;  %483 = vmatprep.subr.mxu0 %v3837_v35  ;;  %v3904_v61 = vand.u32 4294901760, %v3872_v21  ;;  %v3906_v9 = vld [vmem:[#allocation7 + $0x3e0] sm:$0xff]  ;;  %v3915_v20 = vand.u32 4294901760, %v3883_v46  ;;  %v6623_v1 = vld [vmem:[#allocation35_spill] sm:$0xff] }
  0x63   : > { %v683_v8 = vand.u32 4294901760, %v682_v48  ;;  %6520 = vst [vmem:[#allocation47_spill] sm:$0xff] %v3894_v22  ;;  %678 = vmatpush1.msra.mxu1 %v677_v3  ;;  %v689_v29 = vand.u32 4294901760, %v688_v0  ;;  %v6521_v48 = vand.u32 4294901760, %v3860_v51  ;;  %485 = vmatpush1.msra.mxu0 %v3856_v37  ;;  %v3912_v0 = vsub.f32 %v3758_v62, %v3790_v28 }
  0x64   : > { %6522 = vst [vmem:[#allocation48_spill] sm:$0xff] %v3904_v61  ;;  %v695_v58 = vand.u32 4294901760, %v694_v57  ;;  %6524 = vst [vmem:[#allocation50_spill] sm:$0xff] %v3915_v20  ;;  %487 = vmatprep.subr.mxu0 %v3870_v15  ;;  %v3925_v3 = vsub.f32 %v3769_v43, %v3801_v63  ;;  %v3928_v62 = vand.u32 4294901760, %v3896_v52  ;;  %v3937_v28 = vsub.f32 %v3782_v38, %v3814_v55  ;;  %v3942_v43 = vld [vmem:[#allocation7 + $0x3d0] sm:$0xff]  ;;  %v3953_v38 = vld [vmem:[#allocation7 + $0x3c8] sm:$0xff] }
  0x65   : > { %v700_v16 = vsub.f32 %v3860_v51, %v6521_v48  ;;  %684 = vmatprep.subr.mxu1 %v683_v8  ;;  %6523 = vst [vmem:[#allocation49_spill] sm:$0xff] %v3912_v0  ;;  %v3917_v48 = vld [vmem:[#allocation7 + $0x3d8] sm:$0xff]  ;;  %v6525_v8 = vand.u32 4294901760, %v3881_v30  ;;  %489 = vmatpush1.msra.mxu0 %v3890_v47  ;;  %v6528_v51 = vand.u32 4294901760, %v3894_v22  ;;  %v6533_v55 = vand.u32 4294901760, %v3912_v0 }
  0x66   : > { %690 = vmatpush1.msra.mxu1 %v689_v29  ;;  %6526 = vst [vmem:[#allocation51_spill] sm:$0xff] %v3925_v3  ;;  %6527 = vst [vmem:[#allocation52_spill] sm:$0xff] %v3928_v62  ;;  %491 = vmatprep.subr.mxu0 %v3904_v61 }
  0x67   : > { %v701_v36 = vand.u32 4294901760, %v700_v16  ;;  %v706_v57 = vsub.f32 %v3881_v30, %v6525_v8  ;;  %696 = vmatprep.subr.mxu1 %v695_v58  ;;  %v712_v29 = vsub.f32 %v3894_v22, %v6528_v51  ;;  %6529 = vst [vmem:[#allocation53_spill] sm:$0xff] %v3937_v28  ;;  %v3940_v8 = vand.u32 4294901760, %v3906_v9  ;;  %493 = vmatpush2.msra.mxu0 %v3915_v20 }
  0x68   : > { %v6116_v58 = vand.u32 4294901760, %v3925_v3  ;;  %v3948_v51 = vsub.f32 %v3792_v10, %v3826_v42  ;;  %v3951_v16 = vand.u32 4294901760, %v3917_v48  ;;  %v718_v63 = vsub.f32 %v3912_v0, %v6533_v55  ;;  %495 = vmatprep.subr.mxu0 %v3928_v62 }
  0x69   : > { %6530 = vst [vmem:[#allocation54_spill] sm:$0xff] %v3940_v8  ;;  %702 = vmatpush1.msra.mxu1 %v701_v36  ;;  %v707_v30 = vand.u32 4294901760, %v706_v57  ;;  %v713_v22 = vand.u32 4294901760, %v712_v29  ;;  %v3962_v57 = vsub.f32 %v3803_v4, %v3837_v35  ;;  %v3970_v42 = vand.u32 4294901760, %v3942_v43  ;;  %v3976_v36 = vld [vmem:[#allocation7 + $0x3c0] sm:$0xff]  ;;  %497 = vmatpush2.msra.mxu0 %v3940_v8 }
  0x6a   : > { %6531 = vst [vmem:[#allocation55_spill] sm:$0xff] %v3948_v51  ;;  %6532 = vst [vmem:[#allocation56_spill] sm:$0xff] %v3951_v16  ;;  %v724_v10 = vsub.f32 %v3925_v3, %v6116_v58  ;;  %v3974_v55 = vsub.f32 %v3828_v60, %v3856_v37  ;;  %v719_v4 = vand.u32 4294901760, %v718_v63  ;;  %v3984_v29 = vand.u32 4294901760, %v3953_v38  ;;  %v3986_v3 = vld [vmem:[#allocation7 + $0x3b8] sm:$0xff]  ;;  %499 = vmatprep.subr.mxu0 %v3951_v16 }
  0x6b   : > { %6534 = vst [vmem:[#allocation57_spill] sm:$0xff] %v3962_v57  ;;  %708 = vmatprep.subr.mxu1 %v707_v30  ;;  %6535 = vst [vmem:[#allocation58_spill] sm:$0xff] %v3970_v42  ;;  %v6537_v30 = vand.u32 4294901760, %v3937_v28  ;;  %v6539_v60 = vand.u32 4294901760, %v3948_v51  ;;  %501 = vmatpush2.msra.mxu0 %v3970_v42  ;;  %v4008_v63 = vsub.f32 %v3862_v56, %v3890_v47 }
  0x6c   : > { %6536 = vst [vmem:[#allocation59_spill] sm:$0xff] %v3974_v55  ;;  %714 = vmatpush1.msra.mxu1 %v713_v22  ;;  %6538 = vst [vmem:[#allocation60_spill] sm:$0xff] %v3984_v29  ;;  %v725_v35 = vand.u32 4294901760, %v724_v10  ;;  %v3995_v22 = vsub.f32 %v3839_v2, %v3870_v15  ;;  %503 = vmatprep.subr.mxu0 %v3984_v29  ;;  %v4020_v15 = vld [vmem:[#allocation7 + $0x3a0] sm:$0xff] }
  0x6d   : > { %v730_v0 = vsub.f32 %v3937_v28, %v6537_v30  ;;  %v736_v37 = vsub.f32 %v3948_v51, %v6539_v60  ;;  %v3997_v30 = vld [vmem:[#allocation7 + $0x3b0] sm:$0xff]  ;;  %720 = vmatprep.subr.mxu1 %v719_v4  ;;  %v6541_v28 = vand.u32 4294901760, %v3962_v57  ;;  %v4004_v60 = vand.u32 4294901760, %v3976_v36  ;;  %6543 = vst [vmem:[#allocation63_spill] sm:$0xff] %v4008_v63  ;;  %v4010_v51 = vld [vmem:[#allocation7 + $0x3a8] sm:$0xff] }
  0x6e   : > { %6540 = vst [vmem:[#allocation61_spill] sm:$0xff] %v3995_v22  ;;  %726 = vmatpush1.msra.mxu1 %v725_v35  ;;  %v6544_v4 = vand.u32 4294901760, %v3974_v55  ;;  %v6139_v35 = vand.u32 4294901760, %v4008_v63  ;;  %v6548_v47 = vand.u32 4294901760, %v3995_v22 }
  0x6f   : > { %v731_v58 = vand.u32 4294901760, %v730_v0  ;;  %v742_v10 = vsub.f32 %v3962_v57, %v6541_v28  ;;  %6542 = vst [vmem:[#allocation62_spill] sm:$0xff] %v4004_v60  ;;  %v737_v2 = vand.u32 4294901760, %v736_v37  ;;  %v4018_v57 = vand.u32 4294901760, %v3986_v3  ;;  %505 = vmatpush2.msra.mxu0 %v4004_v60 }
  0x70   : > { %v748_v0 = vsub.f32 %v3974_v55, %v6544_v4  ;;  %v4026_v37 = vsub.f32 %v3872_v21, %v3904_v61  ;;  %v4029_v4 = vand.u32 4294901760, %v3997_v30  ;;  %v4031_v55 = vld [vmem:[#allocation7 + $0x398] sm:$0xff]  ;;  %v4042_v21 = vand.u32 4294901760, %v4010_v51 }
  0x71   : > { %6545 = vst [vmem:[#allocation64_spill] sm:$0xff] %v4018_v57  ;;  %732 = vmatprep.subr.mxu1 %v731_v58  ;;  %v743_v56 = vand.u32 4294901760, %v742_v10  ;;  %v754_v58 = vsub.f32 %v3995_v22, %v6548_v47  ;;  %507 = vmatprep.subr.mxu0 %v4018_v57  ;;  %v4039_v10 = vsub.f32 %v3883_v46, %v3915_v20  ;;  %v4056_v46 = vld [vmem:[#allocation7 + $0x390] sm:$0xff] }
  0x72   : > { %6546 = vst [vmem:[#allocation65_spill] sm:$0xff] %v4026_v37  ;;  %6547 = vst [vmem:[#allocation66_spill] sm:$0xff] %v4029_v4  ;;  %738 = vmatpush1.msra.mxu1 %v737_v2  ;;  %v749_v28 = vand.u32 4294901760, %v748_v0  ;;  %v760_v61 = vsub.f32 %v4008_v63, %v6139_v35  ;;  %509 = vmatpush2.msra.mxu0 %v4029_v4  ;;  %v4051_v47 = vsub.f32 %v3896_v52, %v3928_v62  ;;  %v4067_v52 = vld [vmem:[#allocation7 + $0x388] sm:$0xff] }
  0x73   : > { %6549 = vst [vmem:[#allocation67_spill] sm:$0xff] %v4039_v10  ;;  %6550 = vst [vmem:[#allocation68_spill] sm:$0xff] %v4042_v21  ;;  %744 = vmatprep.subr.mxu1 %v743_v56  ;;  %v4054_v0 = vand.u32 4294901760, %v4020_v15  ;;  %v755_v22 = vand.u32 4294901760, %v754_v58  ;;  %v6150_v56 = vand.u32 4294901760, %v4039_v10  ;;  %511 = vmatprep.subr.mxu0 %v4042_v21  ;;  %v4062_v35 = vsub.f32 %v3906_v9, %v3940_v8 }
  0x74   : > { %6551 = vst [vmem:[#allocation69_spill] sm:$0xff] %v4051_v47  ;;  %750 = vmatpush1.msra.mxu1 %v749_v28  ;;  %v4065_v2 = vand.u32 4294901760, %v4031_v55  ;;  %v761_v63 = vand.u32 4294901760, %v760_v61  ;;  %v6555_v62 = vand.u32 4294901760, %v4026_v37  ;;  %v4076_v58 = vsub.f32 %v3917_v48, %v3951_v16  ;;  %v4090_v28 = vld [vmem:[#allocation7 + $0x380] sm:$0xff] }
  0x75   : > { %6552 = vst [vmem:[#allocation70_spill] sm:$0xff] %v4054_v0  ;;  %6553 = vst [vmem:[#allocation71_spill] sm:$0xff] %v4062_v35  ;;  %513 = vmatpush2.msra.mxu0 %v4054_v0  ;;  %756 = vmatprep.subr.mxu1 %v755_v22  ;;  %v772_v9 = vsub.f32 %v4039_v10, %v6150_v56  ;;  %v4084_v61 = vand.u32 4294901760, %v4056_v46  ;;  %v6559_v22 = vand.u32 4294901760, %v4051_v47  ;;  %v4097_v8 = vand.u32 4294901760, %v4067_v52  ;;  %v4099_v10 = vld [vmem:[#allocation7 + $0x378] sm:$0xff] }
  0x76   : > { %6554 = vst [vmem:[#allocation72_spill] sm:$0xff] %v4065_v2  ;;  %v766_v20 = vsub.f32 %v4026_v37, %v6555_v62  ;;  %6556 = vst [vmem:[#allocation73_spill] sm:$0xff] %v4076_v58  ;;  %515 = vmatprep.subr.mxu0 %v4065_v2  ;;  %v4088_v62 = vsub.f32 %v3942_v43, %v3970_v42  ;;  %762 = vmatpush1.msra.mxu1 %v761_v63  ;;  %v6561_v53 = vand.u32 4294901760, %v4062_v35 }
  0x77   : > { %6557 = vst [vmem:[#allocation74_spill] sm:$0xff] %v4084_v61  ;;  %v778_v37 = vsub.f32 %v4051_v47, %v6559_v22  ;;  %6560 = vst [vmem:[#allocation76_spill] sm:$0xff] %v4097_v8  ;;  %v773_v16 = vand.u32 4294901760, %v772_v9  ;;  %517 = vmatpush2.msra.mxu0 %v4084_v61  ;;  %v4108_v63 = vsub.f32 %v3953_v38, %v3984_v29  ;;  %v4110_v22 = vld [vmem:[#allocation7 + $0x370] sm:$0xff]  ;;  %v6563_v47 = vand.u32 4294901760, %v4076_v58 }
  0x78   : > { %6558 = vst [vmem:[#allocation75_spill] sm:$0xff] %v4088_v62  ;;  %v767_v48 = vand.u32 4294901760, %v766_v20  ;;  %v784_v43 = vsub.f32 %v4062_v35, %v6561_v53  ;;  %519 = vmatprep.subr.mxu0 %v4097_v8  ;;  %v4117_v53 = vand.u32 4294901760, %v4090_v28  ;;  %v4121_v20 = vsub.f32 %v3976_v36, %v4004_v60  ;;  %v4123_v35 = vld [vmem:[#allocation7 + $0x368] sm:$0xff] }
  0x79   : > { %6562 = vst [vmem:[#allocation77_spill] sm:$0xff] %v4108_v63  ;;  %v779_v56 = vand.u32 4294901760, %v778_v37  ;;  %v790_v9 = vsub.f32 %v4076_v58, %v6563_v47  ;;  %v4130_v47 = vand.u32 4294901760, %v4099_v10  ;;  %v4132_v58 = vld [vmem:[#allocation7 + $0x360] sm:$0xff] }
  0x7a   : > { %768 = vmatprep.subr.mxu1 %v767_v48  ;;  %6564 = vst [vmem:[#allocation78_spill] sm:$0xff] %v4117_v53  ;;  %6565 = vst [vmem:[#allocation79_spill] sm:$0xff] %v4121_v20  ;;  %v785_v38 = vand.u32 4294901760, %v784_v43  ;;  %v6566_v48 = vand.u32 4294901760, %v4088_v62  ;;  %521 = vmatpush2.msra.mxu0 %v4117_v53  ;;  %v6173_v36 = vand.u32 4294901760, %v4121_v20  ;;  %v4141_v43 = vand.u32 4294901760, %v4110_v22 }
  0x7b   : > { %774 = vmatpush2.msra.mxu1 %v773_v16  ;;  %6567 = vst [vmem:[#allocation80_spill] sm:$0xff] %v4130_v47  ;;  %v791_v42 = vand.u32 4294901760, %v790_v9  ;;  %v4138_v16 = vsub.f32 %v3986_v3, %v4018_v57  ;;  %523 = vmatprep.subr.mxu0 %v4130_v47  ;;  %v4151_v9 = vsub.f32 %v3997_v30, %v4029_v4  ;;  %v4154_v3 = vand.u32 4294901760, %v4123_v35  ;;  %v4168_v30 = vld [vmem:[#allocation7 + $0x350] sm:$0xff] }
  0x7c   : > { %v796_v37 = vsub.f32 %v4088_v62, %v6566_v48  ;;  %780 = vmatprep.subr.mxu1 %v779_v56  ;;  %6569 = vst [vmem:[#allocation82_spill] sm:$0xff] %v4141_v43  ;;  %v4143_v48 = vld [vmem:[#allocation7 + $0x358] sm:$0xff]  ;;  %v6570_v62 = vand.u32 4294901760, %v4108_v63  ;;  %v808_v57 = vsub.f32 %v4121_v20, %v6173_v36  ;;  %525 = vmatpush2.msra.mxu0 %v4141_v43 }
  0x7d   : > { %6568 = vst [vmem:[#allocation81_spill] sm:$0xff] %v4138_v16  ;;  %786 = vmatpush2.msra.mxu1 %v785_v38  ;;  %6571 = vst [vmem:[#allocation83_spill] sm:$0xff] %v4151_v9  ;;  %527 = vmatprep.subr.mxu0 %v4154_v3  ;;  %v4174_v36 = vsub.f32 %v4020_v15, %v4054_v0  ;;  %v4177_v38 = vand.u32 4294901760, %v4143_v48 }
  0x7e   : > { %v797_v29 = vand.u32 4294901760, %v796_v37  ;;  %v802_v56 = vsub.f32 %v4108_v63, %v6570_v62  ;;  %6572 = vst [vmem:[#allocation84_spill] sm:$0xff] %v4154_v3  ;;  %792 = vmatprep.subr.mxu1 %v791_v42  ;;  %v4163_v62 = vsub.f32 %v4010_v51, %v4042_v21  ;;  %v4166_v37 = vand.u32 4294901760, %v4132_v58  ;;  %v4179_v51 = vld [vmem:[#allocation7 + $0x348] sm:$0xff] }
  0x7f   : > { %v6184_v42 = vand.u32 4294901760, %v4151_v9  ;;  %6575 = vst [vmem:[#allocation87_spill] sm:$0xff] %v4174_v36  ;;  %6576 = vst [vmem:[#allocation88_spill] sm:$0xff] %v4177_v38  ;;  %v809_v20 = vand.u32 4294901760, %v808_v57  ;;  %v6577_v21 = vand.u32 4294901760, %v4138_v16  ;;  %v4196_v57 = vand.u32 4294901760, %v4168_v30 }
  0x80   : > { %6573 = vst [vmem:[#allocation85_spill] sm:$0xff] %v4163_v62  ;;  %6574 = vst [vmem:[#allocation86_spill] sm:$0xff] %v4166_v37  ;;  %798 = vmatpush2.msra.mxu1 %v797_v29  ;;  %v803_v63 = vand.u32 4294901760, %v802_v56  ;;  %529 = vmatpush2.msra.mxu0 %v4166_v37  ;;  %v4188_v56 = vsub.f32 %v4031_v55, %v4065_v2  ;;  %v4202_v29 = vld [vmem:[#allocation7 + $0x340] sm:$0xff]  ;;  %v4209_v0 = vand.u32 4294901760, %v4179_v51  ;;  %v6583_v60 = vand.u32 4294901760, %v4174_v36 }
  0x81   : > { %v814_v4 = vsub.f32 %v4138_v16, %v6577_v21  ;;  %v820_v15 = vsub.f32 %v4151_v9, %v6184_v42  ;;  %531 = vmatprep.subr.mxu0 %v4177_v38  ;;  %6579 = vst [vmem:[#allocation90_spill] sm:$0xff] %v4196_v57  ;;  %v4200_v21 = vsub.f32 %v4056_v46, %v4084_v61  ;;  %v4211_v9 = vld [vmem:[#allocation7 + $0x338] sm:$0xff] }
  0x82   : > { %6578 = vst [vmem:[#allocation89_spill] sm:$0xff] %v4188_v56  ;;  %804 = vmatprep.subr.mxu1 %v803_v63  ;;  %v6581_v63 = vand.u32 4294901760, %v4163_v62  ;;  %6582 = vst [vmem:[#allocation92_spill] sm:$0xff] %v4209_v0  ;;  %v832_v46 = vsub.f32 %v4174_v36, %v6583_v60  ;;  %533 = vmatpush2.msra.mxu0 %v4196_v57  ;;  %v4229_v60 = vand.u32 4294901760, %v4202_v29  ;;  %v4235_v36 = vld [vmem:[#allocation7 + $0x328] sm:$0xff] }
  0x83   : > { %6580 = vst [vmem:[#allocation91_spill] sm:$0xff] %v4200_v21  ;;  %810 = vmatpush2.msra.mxu1 %v809_v20  ;;  %v815_v55 = vand.u32 4294901760, %v814_v4  ;;  %v821_v2 = vand.u32 4294901760, %v820_v15  ;;  %v4220_v20 = vsub.f32 %v4067_v52, %v4097_v8  ;;  %535 = vmatprep.subr.mxu0 %v4209_v0  ;;  %v4233_v4 = vsub.f32 %v4090_v28, %v4117_v53 }
  0x84   : > { %v826_v16 = vsub.f32 %v4163_v62, %v6581_v63  ;;  %v4222_v63 = vld [vmem:[#allocation7 + $0x330] sm:$0xff]  ;;  %v6585_v62 = vand.u32 4294901760, %v4188_v56  ;;  %6586 = vst [vmem:[#allocation94_spill] sm:$0xff] %v4229_v60  ;;  %v833_v52 = vand.u32 4294901760, %v832_v46  ;;  %537 = vmatpush2.msra.mxu0 %v4229_v60 }
  0x85   : > { %6584 = vst [vmem:[#allocation93_spill] sm:$0xff] %v4220_v20  ;;  %816 = vmatprep.subr.mxu1 %v815_v55  ;;  %6587 = vst [vmem:[#allocation95_spill] sm:$0xff] %v4233_v4  ;;  %v6588_v55 = vand.u32 4294901760, %v4200_v21  ;;  %v6207_v28 = vand.u32 4294901760, %v4233_v4  ;;  %v4253_v46 = vand.u32 4294901760, %v4222_v63 }
  0x86   : > { %v827_v42 = vand.u32 4294901760, %v826_v16  ;;  %v838_v15 = vsub.f32 %v4188_v56, %v6585_v62  ;;  %822 = vmatpush2.msra.mxu1 %v821_v2  ;;  %v4242_v62 = vand.u32 4294901760, %v4211_v9  ;;  %v4244_v56 = vld [vmem:[#allocation7 + $0x320] sm:$0xff]  ;;  %v4250_v2 = vsub.f32 %v4099_v10, %v4130_v47 }
  0x87   : > { %v844_v16 = vsub.f32 %v4200_v21, %v6588_v55  ;;  %v4255_v55 = vld [vmem:[#allocation7 + $0x318] sm:$0xff]  ;;  %v6591_v21 = vand.u32 4294901760, %v4220_v20  ;;  %v4266_v10 = vand.u32 4294901760, %v4235_v36  ;;  %v856_v47 = vsub.f32 %v4233_v4, %v6207_v28 }
  0x88   : > { %6589 = vst [vmem:[#allocation96_spill] sm:$0xff] %v4242_v62  ;;  %828 = vmatprep.subr.mxu1 %v827_v42  ;;  %v839_v61 = vand.u32 4294901760, %v838_v15  ;;  %6590 = vst [vmem:[#allocation97_spill] sm:$0xff] %v4250_v2  ;;  %539 = vmatprep.subr.mxu0 %v4242_v62  ;;  %v4263_v15 = vsub.f32 %v4110_v22, %v4141_v43  ;;  %v4280_v22 = vld [vmem:[#allocation7 + $0x310] sm:$0xff]  ;;  %v4286_v28 = vsub.f32 %v4132_v58, %v4166_v37 }
  0x89   : > { %834 = vmatpush2.msra.mxu1 %v833_v52  ;;  %v845_v8 = vand.u32 4294901760, %v844_v16  ;;  %v850_v42 = vsub.f32 %v4220_v20, %v6591_v21  ;;  %541 = vmatpush2.msra.mxu0 %v4253_v46  ;;  %v4275_v21 = vsub.f32 %v4123_v35, %v4154_v3  ;;  %v4278_v16 = vand.u32 4294901760, %v4244_v56  ;;  %v4291_v35 = vld [vmem:[#allocation7 + $0x308] sm:$0xff] }
  0x8a   : > { %6592 = vst [vmem:[#allocation98_spill] sm:$0xff] %v4263_v15  ;;  %840 = vmatprep.subr.mxu1 %v839_v61  ;;  %v6218_v61 = vand.u32 4294901760, %v4263_v15  ;;  %543 = vmatprep.subr.mxu0 %v4266_v10  ;;  %6595 = vst [vmem:[#allocation101_spill] sm:$0xff] %v4286_v28  ;;  %v4289_v52 = vand.u32 4294901760, %v4255_v55  ;;  %v857_v4 = vand.u32 4294901760, %v856_v47  ;;  %v6596_v3 = vand.u32 4294901760, %v4250_v2 }
  0x8b   : > { %6593 = vst [vmem:[#allocation99_spill] sm:$0xff] %v4275_v21  ;;  %6594 = vst [vmem:[#allocation100_spill] sm:$0xff] %v4278_v16  ;;  %846 = vmatpush2.msra.mxu1 %v845_v8  ;;  %v851_v20 = vand.u32 4294901760, %v850_v42  ;;  %545 = vmatpush2.msra.mxu0 %v4278_v16  ;;  %v4300_v42 = vsub.f32 %v4143_v48, %v4177_v38  ;;  %v4312_v8 = vsub.f32 %v4168_v30, %v4196_v57 }
  0x8c   : > { %v862_v43 = vsub.f32 %v4250_v2, %v6596_v3  ;;  %v868_v58 = vsub.f32 %v4263_v15, %v6218_v61  ;;  %547 = vmatprep.subr.mxu0 %v4289_v52  ;;  %v4308_v3 = vand.u32 4294901760, %v4280_v22  ;;  %v4314_v2 = vld [vmem:[#allocation7 + $0x300] sm:$0xff]  ;;  %v4321_v47 = vand.u32 4294901760, %v4291_v35  ;;  %v201_v15 = vld [vmem:[%s3532_s16] sm:$0xff] }
  0x8d   : > { %6597 = vst [vmem:[#allocation102_spill] sm:$0xff] %v4300_v42  ;;  %852 = vmatprep.subr.mxu1 %v851_v20  ;;  %6598 = vst [vmem:[#allocation103_spill] sm:$0xff] %v4312_v8  ;;  %v6599_v20 = vand.u32 4294901760, %v4275_v21  ;;  %v6229_v61 = vand.u32 4294901760, %v4300_v42  ;;  %v6600_v53 = vand.u32 4294901760, %v4286_v28 }
  0x8e   : > { %858 = vmatpush2.msra.mxu1 %v857_v4  ;;  %v863_v48 = vand.u32 4294901760, %v862_v43  ;;  %v869_v37 = vand.u32 4294901760, %v868_v58  ;;  %549 = vmatpush2.msra.mxu0 %v4308_v3  ;;  %v4331_v43 = vsub.f32 %v4179_v51, %v4209_v0  ;;  %v4338_v58 = vand.u32 4294901760, %v4314_v2 }
  0x8f   : > { %v874_v38 = vsub.f32 %v4275_v21, %v6599_v20  ;;  %v880_v30 = vsub.f32 %v4286_v28, %v6600_v53  ;;  %v886_v21 = vsub.f32 %v4300_v42, %v6229_v61  ;;  %551 = vmatprep.subr.mxu0 %v4321_v47  ;;  %v4342_v53 = vsub.f32 %v4202_v29, %v4229_v60 }
  0x90   : > { %6601 = vst [vmem:[#allocation104_spill] sm:$0xff] %v4331_v43  ;;  %864 = vmatprep.subr.mxu1 %v863_v48  ;;  %v6603_v51 = vand.u32 4294901760, %v4312_v8  ;;  %v204_v28 = vcombine.high %v201_v15, %v201_v15  ;;  %553 = vmatpush2.msra.mxu0 %v4338_v58  ;;  %v207_v0 = vsel %vm206_vm1, %v201_v15, 0.0  ;;  %v246_v29 = vsel %vm206_vm1, %v201_v15, -inf }
  0x91   : > { %v875_v20 = vand.u32 4294901760, %v874_v38  ;;  %6602 = vst [vmem:[#allocation105_spill] sm:$0xff] %v4342_v53  ;;  %870 = vmatpush2.msra.mxu1 %v869_v37  ;;  %v881_v4 = vand.u32 4294901760, %v880_v30  ;;  %v6240_v38 = vand.u32 4294901760, %v4331_v43  ;;  %v887_v61 = vand.u32 4294901760, %v886_v21  ;;  %966 = vmatprep.subr.mxu0 %v3578_v27 }
  0x92   : > { %v892_v48 = vsub.f32 %v4312_v8, %v6603_v51  ;;  %v6246_v42 = vand.u32 4294901760, %v4342_v53  ;;  %v208_v51 = vrot.slane %v207_v0, 4  ;;  %v214_v8 = vsel %vm206_vm1, %v204_v28, 0.0 }
  0x93   : > { %876 = vmatprep.subr.mxu1 %v875_v20  ;;  %v898_v30 = vsub.f32 %v4331_v43, %v6240_v38  ;;  %v215_v20 = vrot.slane %v214_v8, 4  ;;  %v247_v60 = vrot.slane %v246_v29, 4  ;;  %v253_v15 = vsel %vm206_vm1, %v204_v28, -inf }
  0x94   : > { %882 = vmatpush2.msra.mxu1 %v881_v4  ;;  %v893_v37 = vand.u32 4294901760, %v892_v48  ;;  %v904_v21 = vsub.f32 %v4342_v53, %v6246_v42  ;;  %v209_v48 = vadd.f32 %v208_v51, %v207_v0  ;;  %v254_v57 = vrot.slane %v253_v15, 4 }
  0x95   : > { %888 = vmatprep.subr.mxu1 %v887_v61  ;;  %v899_v4 = vand.u32 4294901760, %v898_v30  ;;  %v4363_v38 = vsub.f32 %v4211_v9, %v4242_v62  ;;  %v216_v6 = vadd.f32 %v215_v20, %v214_v8  ;;  %v248_v27 = vmax.f32 %v246_v29, %v247_v60 }
  0x96   : > { %894 = vmatpush2.msra.mxu1 %v893_v37  ;;  %v905_v43 = vand.u32 4294901760, %v904_v21  ;;  %v4367_v61 = vsub.f32 %v4222_v63, %v4253_v46  ;;  %v210_v42 = vrot.slane %v209_v48, 2  ;;  %v255_v53 = vmax.f32 %v253_v15, %v254_v57 }
  0x97   : > { %900 = vmatprep.subr.mxu1 %v899_v4  ;;  %v6249_v28 = vand.u32 4294901760, %v4363_v38  ;;  %v4372_v0 = vsub.f32 %v4235_v36, %v4266_v10  ;;  %v217_v37 = vrot.slane %v216_v6, 2  ;;  %v249_v9 = vrot.slane %v248_v27, 2 }
  0x98   : > { %906 = vmatpush2.msra.mxu1 %v905_v43  ;;  %v6250_v30 = vand.u32 4294901760, %v4367_v61  ;;  %v4377_v60 = vsub.f32 %v4244_v56, %v4278_v16  ;;  %v211_v63 = vadd.f32 %v210_v42, %v209_v48  ;;  %v256_v8 = vrot.slane %v255_v53, 2 }
  0x99   : > { %v910_v57 = vsub.f32 %v4363_v38, %v6249_v28  ;;  %v6251_v29 = vand.u32 4294901760, %v4372_v0  ;;  %v218_v51 = vadd.f32 %v217_v37, %v216_v6  ;;  %v250_v36 = vmax.f32 %v248_v27, %v249_v9 }
  0x9a   : > { %v916_v43 = vsub.f32 %v4367_v61, %v6250_v30  ;;  %v6252_v21 = vand.u32 4294901760, %v4377_v60  ;;  %v212_v20 = vrot.slane %v211_v63, 1  ;;  %v257_v15 = vmax.f32 %v255_v53, %v256_v8 }
  0x9b   : > { %v911_v56 = vand.u32 4294901760, %v910_v57  ;;  %v922_v42 = vsub.f32 %v4372_v0, %v6251_v29  ;;  %v219_v4 = vrot.slane %v218_v51, 1  ;;  %v251_v48 = vrot.slane %v250_v36, 1 }
  0x9c   : > { %v917_v28 = vand.u32 4294901760, %v916_v43  ;;  %v928_v27 = vsub.f32 %v4377_v60, %v6252_v21  ;;  %v213_v6 = vadd.f32 %v212_v20, %v211_v63  ;;  %v258_v37 = vrot.slane %v257_v15, 1 }
  0x9d   : > { %912 = vmatprep.subr.mxu1 %v911_v56  ;;  %v923_v9 = vand.u32 4294901760, %v922_v42  ;;  %v4395_v30 = vsub.f32 %v4255_v55, %v4289_v52  ;;  %v220_v53 = vadd.f32 %v219_v4, %v218_v51  ;;  %v252_v8 = vmax.f32 %v250_v36, %v251_v48  ;;  %v202_v56 = vld [vmem:[#allocation2] sm:$0x3] }
  0x9e   : > { %918 = vmatpush2.msra.mxu1 %v917_v28  ;;  %v929_v57 = vand.u32 4294901760, %v928_v27  ;;  %v4399_v29 = vsub.f32 %v4280_v22, %v4308_v3  ;;  %v259_v43 = vmax.f32 %v257_v15, %v258_v37  ;;  %v4404_v63 = vsub.f32 %v4291_v35, %v4321_v47  ;;  %v245_v37 = vld [vmem:[#allocation3] sm:$0x3] }
  0x9f   : > { %924 = vmatprep.subr.mxu1 %v923_v9  ;;  %v6257_v21 = vand.u32 4294901760, %v4395_v30  ;;  %v4408_v55 = vsub.f32 %v4314_v2, %v4338_v58  ;;  %v223_v51 = vcombine.low %v213_v6, %v220_v53 }
  0xa0   : > { %930 = vmatpush2.msra.mxu1 %v929_v57  ;;  %v6256_v28 = vand.u32 4294901760, %v4399_v29  ;;  %v262_v36 = vcombine.low %v252_v8, %v259_v43  ;;  %v6255_v20 = vand.u32 4294901760, %v4404_v63 }
  0xa1   : > { %v934_v22 = vsub.f32 %v4395_v30, %v6257_v21  ;;  %v6254_v15 = vand.u32 4294901760, %v4408_v55  ;;  %v230_v35 = vrot.slane %v223_v51, %v3567_v23  ;;  %v6620_v21 = vld [vmem:[#allocation30_spill] sm:$0xff] }
  0xa2   : > { %v940_v2 = vsub.f32 %v4399_v29, %v6256_v28  ;;  %v269_v42 = vrot.slane %v262_v36, %v3567_v23  ;;  %v946_v48 = vsub.f32 %v4404_v63, %v6255_v20  ;;  %v6258_v36 = vsub.s32 0, %v3550_v7  ;;  %v6618_v20 = vld [vmem:[#allocation28_spill] sm:$0xff]  ;;  %v6619_v28 = vld [vmem:[#allocation31_spill] sm:$0xff] }
  0xa3   : > { %v935_v4 = vand.u32 4294901760, %v934_v22  ;;  %v952_v27 = vsub.f32 %v4408_v55, %v6254_v15  ;;  %v237_v6 = vrot.slane %v230_v35, %v3567_v23  ;;  %v6253_v22 = vsub.s32 1, %v3550_v7  ;;  %v6617_v15 = vld [vmem:[#allocation29_spill] sm:$0xff]  ;;  %v6627_v7 = vld [vmem:[#allocation39_spill] sm:$0xff] }
  0xa4   : > { %v941_v9 = vand.u32 4294901760, %v940_v2  ;;  %v276_v53 = vrot.slane %v269_v42, %v3567_v23  ;;  %v947_v8 = vand.u32 4294901760, %v946_v48  ;;  %v6624_v23 = vld [vmem:[#allocation34_spill] sm:$0xff] }
  0xa5   : > { %936 = vmatprep.subr.mxu1 %v935_v4  ;;  %v953_v57 = vand.u32 4294901760, %v952_v27  ;;  %v239_v43 = vadd.f32 %v237_v6, %v202_v56 }
  0xa6   : > { %942 = vmatpush2.msra.mxu1 %v941_v9  ;;  %v278_v51 = vmax.f32 %v245_v37, %v276_v53 }
  0xa7   : > { %948 = vmatprep.subr.mxu1 %v947_v8  ;;  %244 = vst.msk [vmem:[#allocation2] sm:$0x3] %vm3542_vm0, %v239_v43  ;;  %v6606_v43 = vld [vmem:[#allocation17_spill] sm:$0xff] }
  0xa8   : > { %954 = vmatpush2.msra.mxu1 %v953_v57  ;;  %279 = vst.msk [vmem:[#allocation3] sm:$0x3] %vm3542_vm0, %v278_v51  ;;  %v6607_v51 = vld [vmem:[#allocation19_spill] sm:$0xff] }
  0xa9   : > { %1168 = vmatprep.subr.mxu1 %v3552_v11 }
  0xaf   : > { %v285_v35 = vld [vmem:[#allocation3] sm:$0x3] }
  0xb0   : > { %v419_v2 = vrot.slane %v285_v35, %v6258_v36  ;;  %v423_v56 = vrot.slane %v285_v35, %v6253_v22  ;;  %v6608_v35 = vld [vmem:[#allocation18_spill] sm:$0xff]  ;;  %v6621_v36 = vld [vmem:[#allocation33_spill] sm:$0xff] }
  0xb1   : > { %v6616_v22 = vld [vmem:[#allocation26_spill] sm:$0xff] }
  0xb2   : > { %v4440_v42 = vand.u32 4294901760, %v423_v56  ;;  %v4442_v4 = vand.u32 4294901760, %v419_v2 }
  0xb4   : > { %6604 = vst [vmem:[#allocation106_spill] sm:$0xff] %v4440_v42  ;;  %6605 = vst [vmem:[#allocation107_spill] sm:$0xff] %v4442_v4  ;;  %v4445_v48 = vsub.f32 %v423_v56, %v4440_v42  ;;  %v4448_v27 = vsub.f32 %v419_v2, %v4442_v4  ;;  %956 = vmatprep.mubr.f32.mxu1 %v4440_v42  ;;  %v6609_v2 = vld [vmem:[#allocation21_spill] sm:$0xff]  ;;  %v6610_v56 = vld [vmem:[#allocation20_spill] sm:$0xff] }
  0xb5   : > { %958 = vmatmul.mubr.f32.vlgmr.msra.gmra.mxu1 %v4442_v4  ;;  %v6625_v4 = vld [vmem:[#allocation37_spill] sm:$0xff]  ;;  %v6626_v42 = vld [vmem:[#allocation36_spill] sm:$0xff] }
  0xb6   : > { %v556_v6 = vand.u32 4294901760, %v4445_v48  ;;  %v6259_v37 = vand.u32 4294901760, %v4448_v27  ;;  %1170 = vmatpush1.msra.mxu1 %v3554_v12 }
  0xb7   : > { %1172 = vmatprep.subr.mxu1 %v3556_v13 }
  0xb8   : > { %v557_v9 = vsub.f32 %v4445_v48, %v556_v6  ;;  %v563_v53 = vsub.f32 %v4448_v27, %v6259_v37  ;;  %1174 = vmatpush1.msra.mxu1 %v3558_v17  ;;  %1298 = vmatprep.mubr.f32.mxu1 %v556_v6  ;;  %v6611_v6 = vld [vmem:[#allocation23_spill] sm:$0xff]  ;;  %v6622_v37 = vld [vmem:[#allocation32_spill] sm:$0xff] }
  0xb9   : > { %1176 = vmatprep.subr.mxu1 %v3560_v18 }
  0xba   : > { %v558_v8 = vand.u32 4294901760, %v557_v9  ;;  %v564_v57 = vand.u32 4294901760, %v563_v53  ;;  %1178 = vmatpush1.msra.mxu1 %v3562_v19  ;;  %v6612_v9 = vld [vmem:[#allocation22_spill] sm:$0xff]  ;;  %v6613_v53 = vld [vmem:[#allocation25_spill] sm:$0xff] }
  0xbb   : > { %1180 = vmatprep.subr.mxu1 %v3570_v24 }
  0xbc   : > { %559 = vmatprep.mubr.f32.mxu0 %v558_v8  ;;  %1182 = vmatpush1.msra.mxu1 %v3572_v25  ;;  %v6614_v8 = vld [vmem:[#allocation24_spill] sm:$0xff] }
  0xbd   : > { %565 = vmatmul.mubr.f32.vlgmr.msra.gmra.mxu0 %v564_v57  ;;  %1184 = vmatprep.subr.mxu1 %v3575_v26  ;;  %v6615_v57 = vld [vmem:[#allocation27_spill] sm:$0xff] }
  0xbe   : > { %969 = vmatpush1.msra.mxu0 %v3591_v32  ;;  %1186 = vmatpush1.msra.mxu1 %v3588_v31 }
  0xbf   : > { %972 = vmatprep.subr.mxu0 %v3597_v34  ;;  %1188 = vmatprep.subr.mxu1 %v3594_v33 }
  0xc0   : > { %975 = vmatpush1.msra.mxu0 %v3611_v40  ;;  %1190 = vmatpush1.msra.mxu1 %v3608_v39 }
  0xc1   : > { %978 = vmatprep.subr.mxu0 %v3620_v44  ;;  %1192 = vmatprep.subr.mxu1 %v3614_v41 }
  0xc2   : > { %981 = vmatpush1.msra.mxu0 %v3633_v49  ;;  %1194 = vmatpush1.msra.mxu1 %v3623_v45 }
  0xc3   : > { %984 = vmatprep.subr.mxu0 %v3647_v54  ;;  %1196 = vmatprep.subr.mxu1 %v3636_v50 }
  0xc4   : > { %987 = vmatpush1.msra.mxu0 %v3673_v5  ;;  %1198 = vmatpush1.msra.mxu1 %v3657_v59 }
  0xc5   : > { %990 = vmatprep.subr.mxu0 %v3686_v14  ;;  %1200 = vmatprep.subr.mxu1 %v6606_v43 }
  0xc6   : > { %993 = vmatpush1.msra.mxu0 %v6607_v51  ;;  %1202 = vmatpush1.msra.mxu1 %v6608_v35 }
  0xc7   : > { %996 = vmatprep.subr.mxu0 %v6609_v2  ;;  %1204 = vmatprep.subr.mxu1 %v6610_v56 }
  0xc8   : > { %999 = vmatpush1.msra.mxu0 %v6611_v6  ;;  %1206 = vmatpush1.msra.mxu1 %v6612_v9 }
  0xc9   : > { %1002 = vmatprep.subr.mxu0 %v6613_v53  ;;  %1208 = vmatprep.subr.mxu1 %v6614_v8  ;;  %v6630_v8 = vld [vmem:[#allocation40_spill] sm:$0xff] }
  0xca   : > { %1005 = vmatpush1.msra.mxu0 %v6615_v57  ;;  %1210 = vmatpush1.msra.mxu1 %v6616_v22  ;;  %v6628_v22 = vld [vmem:[#allocation38_spill] sm:$0xff] }
  0xcb   : > { %1008 = vmatprep.subr.mxu0 %v6617_v15  ;;  %1212 = vmatprep.subr.mxu1 %v6618_v20  ;;  %v6629_v20 = vld [vmem:[#allocation41_spill] sm:$0xff] }
  0xcc   : > { %1011 = vmatpush1.msra.mxu0 %v6619_v28  ;;  %1214 = vmatpush1.msra.mxu1 %v6620_v21  ;;  %v6631_v21 = vld [vmem:[#allocation43_spill] sm:$0xff] }
  0xcd   : > { %1014 = vmatprep.subr.mxu0 %v6621_v36  ;;  %1216 = vmatprep.subr.mxu1 %v6622_v37  ;;  %v6632_v36 = vld [vmem:[#allocation42_spill] sm:$0xff]  ;;  %v6633_v37 = vld [vmem:[#allocation45_spill] sm:$0xff] }
  0xce   : > { %1017 = vmatpush1.msra.mxu0 %v6623_v1  ;;  %1218 = vmatpush1.msra.mxu1 %v6624_v23  ;;  %v6634_v1 = vld [vmem:[#allocation44_spill] sm:$0xff]  ;;  %v6635_v23 = vld [vmem:[#allocation47_spill] sm:$0xff] }
  0xcf   : > { %1020 = vmatprep.subr.mxu0 %v6625_v4  ;;  %1220 = vmatprep.subr.mxu1 %v6626_v42  ;;  %v6636_v4 = vld [vmem:[#allocation46_spill] sm:$0xff]  ;;  %v6637_v42 = vld [vmem:[#allocation49_spill] sm:$0xff] }
  0xd0   : > { %1023 = vmatpush1.msra.mxu0 %v6627_v7  ;;  %1222 = vmatpush1.msra.mxu1 %v6628_v22  ;;  %v6638_v7 = vld [vmem:[#allocation48_spill] sm:$0xff]  ;;  %v6639_v22 = vld [vmem:[#allocation51_spill] sm:$0xff] }
  0xd1   : > { %1026 = vmatprep.subr.mxu0 %v6629_v20  ;;  %1224 = vmatprep.subr.mxu1 %v6630_v8  ;;  %v6640_v20 = vld [vmem:[#allocation50_spill] sm:$0xff]  ;;  %v6641_v8 = vld [vmem:[#allocation53_spill] sm:$0xff] }
  0xd2   : > { %1029 = vmatpush1.msra.mxu0 %v6631_v21  ;;  %1226 = vmatpush1.msra.mxu1 %v6632_v36  ;;  %v6642_v21 = vld [vmem:[#allocation52_spill] sm:$0xff]  ;;  %v6643_v36 = vld [vmem:[#allocation55_spill] sm:$0xff] }
  0xd3   : > { %1032 = vmatprep.subr.mxu0 %v6633_v37  ;;  %1228 = vmatprep.subr.mxu1 %v6634_v1  ;;  %v6644_v37 = vld [vmem:[#allocation54_spill] sm:$0xff]  ;;  %v6645_v1 = vld [vmem:[#allocation57_spill] sm:$0xff] }
  0xd4   : > { %1035 = vmatpush1.msra.mxu0 %v6635_v23  ;;  %1230 = vmatpush1.msra.mxu1 %v6636_v4  ;;  %v6646_v23 = vld [vmem:[#allocation56_spill] sm:$0xff]  ;;  %v6647_v4 = vld [vmem:[#allocation59_spill] sm:$0xff] }
  0xd5   : > { %1038 = vmatprep.subr.mxu0 %v6637_v42  ;;  %1232 = vmatprep.subr.mxu1 %v6638_v7  ;;  %v6648_v42 = vld [vmem:[#allocation58_spill] sm:$0xff]  ;;  %v6649_v7 = vld [vmem:[#allocation61_spill] sm:$0xff] }
  0xd6   : > { %1041 = vmatpush1.msra.mxu0 %v6639_v22  ;;  %1234 = vmatpush2.msra.mxu1 %v6640_v20  ;;  %v6650_v22 = vld [vmem:[#allocation60_spill] sm:$0xff]  ;;  %v6651_v20 = vld [vmem:[#allocation63_spill] sm:$0xff] }
  0xd7   : > { %1044 = vmatprep.subr.mxu0 %v6641_v8  ;;  %1236 = vmatprep.subr.mxu1 %v6642_v21  ;;  %v6652_v8 = vld [vmem:[#allocation62_spill] sm:$0xff]  ;;  %v6653_v21 = vld [vmem:[#allocation65_spill] sm:$0xff] }
  0xd8   : > { %1047 = vmatpush1.msra.mxu0 %v6643_v36  ;;  %1238 = vmatpush2.msra.mxu1 %v6644_v37  ;;  %v6654_v36 = vld [vmem:[#allocation64_spill] sm:$0xff]  ;;  %v6655_v37 = vld [vmem:[#allocation67_spill] sm:$0xff] }
  0xd9   : > { %1050 = vmatprep.subr.mxu0 %v6645_v1  ;;  %1240 = vmatprep.subr.mxu1 %v6646_v23  ;;  %v6656_v1 = vld [vmem:[#allocation66_spill] sm:$0xff]  ;;  %v6657_v23 = vld [vmem:[#allocation69_spill] sm:$0xff] }
  0xda   : > { %1053 = vmatpush1.msra.mxu0 %v6647_v4  ;;  %1242 = vmatpush2.msra.mxu1 %v6648_v42  ;;  %v6658_v4 = vld [vmem:[#allocation68_spill] sm:$0xff]  ;;  %v6659_v42 = vld [vmem:[#allocation71_spill] sm:$0xff] }
  0xdb   : > { %1056 = vmatprep.subr.mxu0 %v6649_v7  ;;  %1244 = vmatprep.subr.mxu1 %v6650_v22  ;;  %v6660_v7 = vld [vmem:[#allocation70_spill] sm:$0xff]  ;;  %v6661_v22 = vld [vmem:[#allocation73_spill] sm:$0xff] }
  0xdc   : > { %1059 = vmatpush1.msra.mxu0 %v6651_v20  ;;  %1246 = vmatpush2.msra.mxu1 %v6652_v8  ;;  %v6662_v20 = vld [vmem:[#allocation72_spill] sm:$0xff]  ;;  %v6663_v8 = vld [vmem:[#allocation75_spill] sm:$0xff] }
  0xdd   : > { %1062 = vmatprep.subr.mxu0 %v6653_v21  ;;  %1248 = vmatprep.subr.mxu1 %v6654_v36  ;;  %v6664_v21 = vld [vmem:[#allocation74_spill] sm:$0xff]  ;;  %v6665_v36 = vld [vmem:[#allocation77_spill] sm:$0xff] }
  0xde   : > { %1065 = vmatpush2.msra.mxu0 %v6655_v37  ;;  %1250 = vmatpush2.msra.mxu1 %v6656_v1  ;;  %v6666_v37 = vld [vmem:[#allocation76_spill] sm:$0xff]  ;;  %v6667_v1 = vld [vmem:[#allocation79_spill] sm:$0xff] }
  0xdf   : > { %1068 = vmatprep.subr.mxu0 %v6657_v23  ;;  %1252 = vmatprep.subr.mxu1 %v6658_v4  ;;  %v6668_v23 = vld [vmem:[#allocation78_spill] sm:$0xff]  ;;  %v6669_v4 = vld [vmem:[#allocation81_spill] sm:$0xff] }
  0xe0   : > { %1071 = vmatpush2.msra.mxu0 %v6659_v42  ;;  %1254 = vmatpush2.msra.mxu1 %v6660_v7  ;;  %v6670_v42 = vld [vmem:[#allocation80_spill] sm:$0xff]  ;;  %v6671_v7 = vld [vmem:[#allocation83_spill] sm:$0xff] }
  0xe1   : > { %1074 = vmatprep.subr.mxu0 %v6661_v22  ;;  %1256 = vmatprep.subr.mxu1 %v6662_v20  ;;  %v6672_v22 = vld [vmem:[#allocation82_spill] sm:$0xff]  ;;  %v6673_v20 = vld [vmem:[#allocation85_spill] sm:$0xff] }
  0xe2   : > { %1077 = vmatpush2.msra.mxu0 %v6663_v8  ;;  %1258 = vmatpush2.msra.mxu1 %v6664_v21  ;;  %v6674_v8 = vld [vmem:[#allocation84_spill] sm:$0xff]  ;;  %v6675_v21 = vld [vmem:[#allocation87_spill] sm:$0xff] }
  0xe3   : > { %1080 = vmatprep.subr.mxu0 %v6665_v36  ;;  %1260 = vmatprep.subr.mxu1 %v6666_v37  ;;  %v6676_v36 = vld [vmem:[#allocation86_spill] sm:$0xff]  ;;  %v6677_v37 = vld [vmem:[#allocation89_spill] sm:$0xff] }
  0xe4   : > { %1083 = vmatpush2.msra.mxu0 %v6667_v1  ;;  %1262 = vmatpush2.msra.mxu1 %v6668_v23  ;;  %v6678_v1 = vld [vmem:[#allocation88_spill] sm:$0xff]  ;;  %v6679_v23 = vld [vmem:[#allocation91_spill] sm:$0xff] }
  0xe5   : > { %1086 = vmatprep.subr.mxu0 %v6669_v4  ;;  %1264 = vmatprep.subr.mxu1 %v6670_v42  ;;  %v6680_v4 = vld [vmem:[#allocation90_spill] sm:$0xff]  ;;  %v6681_v42 = vld [vmem:[#allocation93_spill] sm:$0xff] }
  0xe6   : > { %1089 = vmatpush2.msra.mxu0 %v6671_v7  ;;  %1266 = vmatpush2.msra.mxu1 %v6672_v22  ;;  %v6682_v7 = vld [vmem:[#allocation92_spill] sm:$0xff]  ;;  %v6683_v22 = vld [vmem:[#allocation95_spill] sm:$0xff] }
  0xe7   : > { %1092 = vmatprep.subr.mxu0 %v6673_v20  ;;  %1268 = vmatprep.subr.mxu1 %v6674_v8  ;;  %v6684_v8 = vld [vmem:[#allocation97_spill] sm:$0xff] }
  0xe8   : > { %1095 = vmatpush2.msra.mxu0 %v6675_v21  ;;  %1270 = vmatpush2.msra.mxu1 %v6676_v36  ;;  %v6685_v21 = vld [vmem:[#allocation94_spill] sm:$0xff] }
  0xe9   : > { %1098 = vmatprep.subr.mxu0 %v6677_v37  ;;  %1272 = vmatprep.subr.mxu1 %v6678_v1  ;;  %v6686_v36 = vld [vmem:[#allocation98_spill] sm:$0xff]  ;;  %v6687_v1 = vld [vmem:[#allocation99_spill] sm:$0xff] }
  0xea   : > { %1101 = vmatpush2.msra.mxu0 %v6679_v23  ;;  %1274 = vmatpush2.msra.mxu1 %v6680_v4  ;;  %v6688_v4 = vld [vmem:[#allocation101_spill] sm:$0xff] }
  0xeb   : > { %1104 = vmatprep.subr.mxu0 %v6681_v42  ;;  %1276 = vmatprep.subr.mxu1 %v6682_v7  ;;  %v6689_v7 = vld [vmem:[#allocation102_spill] sm:$0xff] }
  0xec   : > { %1107 = vmatpush2.msra.mxu0 %v6683_v22  ;;  %1158 = vmatprep.mubr.f32.mxu0 %v4445_v48  ;;  %v6690_v48 = vld [vmem:[#allocation103_spill] sm:$0xff] }
  0xed   : > { %1110 = vmatprep.subr.mxu0 %v6684_v8  ;;  %1278 = vmatpush2.msra.mxu1 %v6685_v21  ;;  %v6691_v21 = vld [vmem:[#allocation104_spill] sm:$0xff] }
  0xee   : > { %1113 = vmatpush2.msra.mxu0 %v6686_v36  ;;  %1280 = vmatprep.subr.mxu1 %v4242_v62  ;;  %v6692_v62 = vld [vmem:[#allocation105_spill] sm:$0xff] }
  0xef   : > { %1116 = vmatprep.subr.mxu0 %v6687_v1  ;;  %1282 = vmatpush2.msra.mxu1 %v4253_v46 }
  0xf0   : > { %1119 = vmatpush2.msra.mxu0 %v6688_v4  ;;  %1284 = vmatprep.subr.mxu1 %v4266_v10 }
  0xf1   : > { %1122 = vmatprep.subr.mxu0 %v6689_v7  ;;  %1286 = vmatpush2.msra.mxu1 %v4278_v16  ;;  %v6693_v16 = vand.u32 4294901760, %v4448_v27 }
  0xf2   : > { %1125 = vmatpush2.msra.mxu0 %v6690_v48  ;;  %1288 = vmatprep.subr.mxu1 %v4289_v52 }
  0xf3   : > { %1128 = vmatprep.subr.mxu0 %v6691_v21  ;;  %1290 = vmatpush2.msra.mxu1 %v4308_v3 }
  0xf4   : > { %1131 = vmatpush2.msra.mxu0 %v6692_v62  ;;  %1292 = vmatprep.subr.mxu1 %v4321_v47 }
  0xf5   : > { %1134 = vmatprep.subr.mxu0 %v4363_v38  ;;  %1294 = vmatpush2.msra.mxu1 %v4338_v58 }
  0xf6   : > { %1137 = vmatpush2.msra.mxu0 %v4367_v61  ;;  %1302 = vmatmul.mubr.f32.vlgmr.msra.gmra.mxu1 %v6693_v16  ;;  %v6696_v16 = vand.u32 4294901760, %v3591_v32  ;;  %v6705_v32 = vand.u32 4294901760, %v6609_v2 }
  0xf7   : > { %1140 = vmatprep.subr.mxu0 %v4372_v0  ;;  %1574 = vmatprep.subr.mxu1 %v3552_v11  ;;  %v6694_v11 = vld [vmem:[#allocation16_spill] sm:$0xff] }
  0xf8   : > { %1143 = vmatpush2.msra.mxu0 %v4377_v60  ;;  %1576 = vmatpush1.msra.mxu1 %v3554_v12  ;;  %v6695_v12 = vand.u32 4294901760, %v6694_v11 }
  0xf9   : > { %1146 = vmatprep.subr.mxu0 %v4395_v30  ;;  %1578 = vmatprep.subr.mxu1 %v3556_v13  ;;  %v6697_v13 = vand.u32 4294901760, %v3597_v34  ;;  %v6707_v34 = vand.u32 4294901760, %v6613_v53  ;;  %v6729_v53 = vld [vmem:[#allocation36_spill] sm:$0xff] }
  0xfa   : > { %1149 = vmatpush2.msra.mxu0 %v4399_v29  ;;  %1580 = vmatpush1.msra.mxu1 %v3558_v17  ;;  %v6698_v17 = vand.u32 4294901760, %v3611_v40  ;;  %v6709_v40 = vand.u32 4294901760, %v6617_v15 }
  0xfb   : > { %1152 = vmatprep.subr.mxu0 %v4404_v63  ;;  %1582 = vmatprep.subr.mxu1 %v3560_v18  ;;  %v6699_v18 = vand.u32 4294901760, %v3620_v44  ;;  %v6711_v44 = vld [vmem:[#allocation24_spill] sm:$0xff] }
  0xfc   : > { %1155 = vmatpush2.msra.mxu0 %v4408_v55  ;;  %1584 = vmatpush1.msra.mxu1 %v3562_v19  ;;  %v6700_v19 = vand.u32 4294901760, %v3633_v49 }
  0xfd   : > { %1161 = vmatmul.mubr.f32.vlgmr.msra.gmra.mxu0 %v4448_v27  ;;  %1311 = vmatprep.subr.mxu0 %v6695_v12  ;;  %v6720_v27 = vld [vmem:[#allocation30_spill] sm:$0xff] }
  0xfe   : > { %1315 = vmatpush1.msra.mxu0 %v6696_v16  ;;  %1586 = vmatprep.subr.mxu1 %v3570_v24  ;;  %v6701_v24 = vand.u32 4294901760, %v3647_v54  ;;  %v6715_v54 = vld [vmem:[#allocation35_spill] sm:$0xff]  ;;  %v6732_v12 = vld [vmem:[#allocation38_spill] sm:$0xff] }
  0xff   : > { %1319 = vmatprep.subr.mxu0 %v6697_v13  ;;  %1588 = vmatpush1.msra.mxu1 %v3572_v25  ;;  %v6702_v25 = vand.u32 4294901760, %v3673_v5  ;;  %v6717_v5 = vld [vmem:[#allocation28_spill] sm:$0xff]  ;;  %v6733_v16 = vld [vmem:[#allocation47_spill] sm:$0xff] }
 0x100   : > { %1323 = vmatpush1.msra.mxu0 %v6698_v17  ;;  %1590 = vmatprep.subr.mxu1 %v3575_v26  ;;  %v6703_v26 = vand.u32 4294901760, %v3686_v14  ;;  %v6718_v14 = vld [vmem:[#allocation37_spill] sm:$0xff]  ;;  %v6734_v13 = vand.u32 4294901760, %v6733_v16  ;;  %v6735_v17 = vld [vmem:[#allocation40_spill] sm:$0xff] }
 0x101   : > { %1327 = vmatprep.subr.mxu0 %v6699_v18  ;;  %1592 = vmatpush1.msra.mxu1 %v3588_v31  ;;  %v6704_v31 = vand.u32 4294901760, %v6607_v51  ;;  %v6719_v15 = vand.u32 4294901760, %v6718_v14  ;;  %v6723_v51 = vld [vmem:[#allocation32_spill] sm:$0xff]  ;;  %v6736_v18 = vld [vmem:[#allocation49_spill] sm:$0xff] }
 0x102   : > { %1331 = vmatpush1.msra.mxu0 %v6700_v19  ;;  %1594 = vmatprep.subr.mxu1 %v3594_v33  ;;  %v6706_v33 = vand.u32 4294901760, %v6611_v6  ;;  %v6727_v6 = vld [vmem:[#allocation43_spill] sm:$0xff]  ;;  %v6737_v19 = vand.u32 4294901760, %v6736_v18  ;;  %v283_v18 = vld [vmem:[#allocation2] sm:$0x3] }
 0x103   : > { %1335 = vmatprep.subr.mxu0 %v6701_v24  ;;  %1596 = vmatpush1.msra.mxu1 %v3608_v39  ;;  %v6708_v39 = vand.u32 4294901760, %v6615_v57  ;;  %v6730_v57 = vld [vmem:[#allocation45_spill] sm:$0xff]  ;;  %v6738_v24 = vld [vmem:[#allocation42_spill] sm:$0xff] }
 0x104   : > { %1339 = vmatpush1.msra.mxu0 %v6702_v25  ;;  %1598 = vmatprep.subr.mxu1 %v3614_v41  ;;  %v6710_v41 = vand.u32 4294901760, %v6619_v28  ;;  %v6731_v11 = vand.u32 4294901760, %v6730_v57  ;;  %v6739_v25 = vld [vmem:[#allocation51_spill] sm:$0xff] }
 0x105   : > { %1343 = vmatprep.subr.mxu0 %v6703_v26  ;;  %1600 = vmatpush1.msra.mxu1 %v3623_v45  ;;  %v6712_v45 = vld [vmem:[#allocation33_spill] sm:$0xff]  ;;  %v6740_v26 = vand.u32 4294901760, %v6739_v25  ;;  %v313_v57 = vld [vmem:[#allocation7 + $0xd8] sm:$0xff] }
 0x106   : > { %1347 = vmatpush1.msra.mxu0 %v6704_v31  ;;  %1602 = vmatprep.subr.mxu1 %v3636_v50  ;;  %v6713_v49 = vand.u32 4294901760, %v6712_v45  ;;  %v6714_v50 = vld [vmem:[#allocation26_spill] sm:$0xff]  ;;  %v6741_v31 = vld [vmem:[#allocation44_spill] sm:$0xff] }
 0x107   : > { %1351 = vmatprep.subr.mxu0 %v6705_v32  ;;  %1604 = vmatpush1.msra.mxu1 %v3657_v59  ;;  %v6716_v59 = vand.u32 4294901760, %v6715_v54  ;;  %v6742_v32 = vld [vmem:[#allocation53_spill] sm:$0xff]  ;;  %v6747_v45 = vld [vmem:[#allocation48_spill] sm:$0xff]  ;;  %v6750_v54 = vld [vmem:[#allocation50_spill] sm:$0xff] }
 0x108   : > { %1355 = vmatpush1.msra.mxu0 %v6706_v33  ;;  %1606 = vmatprep.subr.mxu1 %v6606_v43  ;;  %v6721_v43 = vld [vmem:[#allocation39_spill] sm:$0xff]  ;;  %v6743_v33 = vand.u32 4294901760, %v6742_v32  ;;  %v6768_v25 = vld [vmem:[#allocation60_spill] sm:$0xff]  ;;  %v6771_v32 = vld [vmem:[#allocation69_spill] sm:$0xff] }
 0x109   : > { %1359 = vmatprep.subr.mxu0 %v6707_v34  ;;  %1608 = vmatpush1.msra.mxu1 %v6608_v35  ;;  %v6722_v28 = vand.u32 4294901760, %v6721_v43  ;;  %v6724_v35 = vld [vmem:[#allocation41_spill] sm:$0xff]  ;;  %v6744_v34 = vld [vmem:[#allocation46_spill] sm:$0xff] }
 0x10a   : > { %1363 = vmatpush1.msra.mxu0 %v6708_v39  ;;  %1610 = vmatprep.subr.mxu1 %v6610_v56  ;;  %v6725_v2 = vand.u32 4294901760, %v6724_v35  ;;  %v6726_v56 = vld [vmem:[#allocation34_spill] sm:$0xff]  ;;  %v317_v39 = vld [vmem:[#allocation7 + $0xf8] sm:$0xff] }
 0x10b   : > { %1367 = vmatprep.subr.mxu0 %v6709_v40  ;;  %1612 = vmatpush1.msra.mxu1 %v6612_v9  ;;  %v6728_v9 = vand.u32 4294901760, %v6727_v6  ;;  %v316_v40 = vld [vmem:[#allocation7 + $0xf0] sm:$0xff] }
 0x10c   : > { %1371 = vmatpush1.msra.mxu0 %v6710_v41  ;;  %1614 = vmatprep.subr.mxu1 %v6711_v44  ;;  %v6745_v41 = vld [vmem:[#allocation55_spill] sm:$0xff]  ;;  %v4685_v43 = vand.u32 4294901760, %v316_v40 }
 0x10d   : > { %1375 = vmatprep.subr.mxu0 %v6713_v49  ;;  %1616 = vmatpush1.msra.mxu1 %v6714_v50  ;;  %v6746_v44 = vand.u32 4294901760, %v6745_v41  ;;  %v6748_v49 = vld [vmem:[#allocation57_spill] sm:$0xff]  ;;  %v4712_v41 = vand.u32 4294901760, %v313_v57 }
 0x10e   : > { %1379 = vmatpush1.msra.mxu0 %v6716_v59  ;;  %1618 = vmatprep.subr.mxu1 %v6717_v5  ;;  %v6749_v50 = vand.u32 4294901760, %v6748_v49  ;;  %v315_v59 = vld [vmem:[#allocation7 + $0xe8] sm:$0xff]  ;;  %v6751_v5 = vld [vmem:[#allocation59_spill] sm:$0xff]  ;;  %6754 = vst [vmem:[#allocation17_spill] sm:$0xff] %v4685_v43 }
 0x10f   : > { %1383 = vmatprep.subr.mxu0 %v6719_v15  ;;  %1620 = vmatpush1.msra.mxu1 %v6720_v27  ;;  %v6752_v14 = vand.u32 4294901760, %v6751_v5  ;;  %v6753_v15 = vld [vmem:[#allocation52_spill] sm:$0xff]  ;;  %v4683_v27 = vand.u32 4294901760, %v317_v39  ;;  %6774 = vst [vmem:[#allocation23_spill] sm:$0xff] %v4712_v41  ;;  %v6776_v49 = vld [vmem:[#allocation71_spill] sm:$0xff] }
 0x110   : > { %1387 = vmatpush1.msra.mxu0 %v6722_v28  ;;  %1622 = vmatprep.subr.mxu1 %v6723_v51  ;;  %v314_v28 = vld [vmem:[#allocation7 + $0xe0] sm:$0xff] }
 0x111   : > { %1391 = vmatprep.subr.mxu0 %v6725_v2  ;;  %1624 = vmatpush1.msra.mxu1 %v6726_v56  ;;  %v6755_v51 = vld [vmem:[#allocation61_spill] sm:$0xff]  ;;  %v6757_v2 = vld [vmem:[#allocation54_spill] sm:$0xff]  ;;  %v6758_v56 = vld [vmem:[#allocation63_spill] sm:$0xff] }
 0x112   : > { %1395 = vmatpush1.msra.mxu0 %v6728_v9  ;;  %1626 = vmatprep.subr.mxu1 %v6729_v53  ;;  %v6756_v35 = vand.u32 4294901760, %v6755_v51  ;;  %v6759_v6 = vand.u32 4294901760, %v6758_v56  ;;  %v6760_v9 = vld [vmem:[#allocation56_spill] sm:$0xff]  ;;  %v4693_v53 = vand.u32 4294901760, %v315_v59  ;;  %v6783_v51 = vld [vmem:[#allocation66_spill] sm:$0xff] }
 0x113   : > { %1399 = vmatprep.subr.mxu0 %v6731_v11  ;;  %1628 = vmatpush1.msra.mxu1 %v6732_v12  ;;  %v312_v11 = vld [vmem:[#allocation7 + $0xd0] sm:$0xff]  ;;  %v6762_v12 = vld [vmem:[#allocation65_spill] sm:$0xff] }
 0x114   : > { %1403 = vmatpush1.msra.mxu0 %v6734_v13  ;;  %1630 = vmatprep.subr.mxu1 %v6735_v17  ;;  %6761 = vst [vmem:[#allocation19_spill] sm:$0xff] %v4693_v53  ;;  %v6763_v16 = vand.u32 4294901760, %v6762_v12  ;;  %v6764_v13 = vld [vmem:[#allocation58_spill] sm:$0xff]  ;;  %v4698_v17 = vand.u32 4294901760, %v314_v28  ;;  %v4720_v5 = vsub.f32 %v315_v59, %v4693_v53  ;;  %v6787_v12 = vld [vmem:[#allocation68_spill] sm:$0xff] }
 0x115   : > { %1407 = vmatprep.subr.mxu0 %v6737_v19  ;;  %1632 = vmatpush1.msra.mxu1 %v6738_v24  ;;  %v6766_v19 = vld [vmem:[#allocation67_spill] sm:$0xff] }
 0x116   : > { %1411 = vmatpush1.msra.mxu0 %v6740_v26  ;;  %1634 = vmatprep.subr.mxu1 %v6741_v31  ;;  %6765 = vst [vmem:[#allocation18_spill] sm:$0xff] %v4698_v17  ;;  %v6767_v24 = vand.u32 4294901760, %v6766_v19  ;;  %v4704_v26 = vsub.f32 %v316_v40, %v4685_v43  ;;  %v4707_v31 = vsub.f32 %v317_v39, %v4683_v27  ;;  %v311_v40 = vld [vmem:[#allocation7 + $0xc8] sm:$0xff]  ;;  %6779 = vst [vmem:[#allocation25_spill] sm:$0xff] %v4720_v5  ;;  %v308_v56 = vld [vmem:[#allocation7 + $0xb0] sm:$0xff] }
 0x117   : > { %1415 = vmatprep.subr.mxu0 %v6743_v33  ;;  %1636 = vmatpush1.msra.mxu1 %v6744_v34  ;;  %v6772_v33 = vand.u32 4294901760, %v6771_v32  ;;  %v6773_v34 = vld [vmem:[#allocation62_spill] sm:$0xff]  ;;  %v4722_v39 = vmul.f32 0.25, %v283_v18  ;;  %v6789_v18 = vld [vmem:[#allocation77_spill] sm:$0xff] }
 0x118   : > { %1419 = vmatpush1.msra.mxu0 %v6746_v44  ;;  %1638 = vmatprep.subr.mxu1 %v6747_v45  ;;  %6769 = vst [vmem:[#allocation21_spill] sm:$0xff] %v4704_v26  ;;  %6770 = vst [vmem:[#allocation20_spill] sm:$0xff] %v4707_v31  ;;  %v4714_v44 = vand.u32 4294901760, %v312_v11  ;;  %v310_v45 = vld [vmem:[#allocation7 + $0xc0] sm:$0xff]  ;;  %v6271_v59 = vand.u32 4294901760, %v4707_v31  ;;  %v6790_v19 = vand.u32 4294901760, %v6789_v18 }
 0x119   : > { %1423 = vmatprep.subr.mxu0 %v6749_v50  ;;  %1640 = vmatpush2.msra.mxu1 %v6750_v54  ;;  %v6777_v50 = vand.u32 4294901760, %v6776_v49  ;;  %v6778_v54 = vld [vmem:[#allocation64_spill] sm:$0xff]  ;;  %6780 = vst [vmem:[#allocation27_spill] sm:$0xff] %v4722_v39  ;;  %v307_v32 = vld [vmem:[#allocation7 + $0xa8] sm:$0xff] }
 0x11a   : > { %1427 = vmatpush1.msra.mxu0 %v6752_v14  ;;  %1642 = vmatprep.subr.mxu1 %v6753_v15  ;;  %6775 = vst [vmem:[#allocation22_spill] sm:$0xff] %v4714_v44  ;;  %v6781_v14 = vld [vmem:[#allocation73_spill] sm:$0xff]  ;;  %v6805_v18 = vld [vmem:[#allocation74_spill] sm:$0xff] }
 0x11b   : > { %1431 = vmatprep.subr.mxu0 %v6756_v35  ;;  %1644 = vmatpush2.msra.mxu1 %v6757_v2  ;;  %v6782_v15 = vand.u32 4294901760, %v6781_v14  ;;  %v4728_v35 = vsub.f32 %v314_v28, %v4698_v17  ;;  %v309_v2 = vld [vmem:[#allocation7 + $0xb8] sm:$0xff]  ;;  %v4741_v28 = vsub.f32 %v312_v11, %v4714_v44  ;;  %v4753_v14 = vand.u32 4294901760, %v308_v56  ;;  %v6800_v11 = vld [vmem:[#allocation14_spill] sm:$0xff] }
 0x11c   : > { %1435 = vmatpush1.msra.mxu0 %v6759_v6  ;;  %1646 = vmatprep.subr.mxu1 %v6760_v9  ;;  %v6785_v6 = vld [vmem:[#allocation75_spill] sm:$0xff] }
 0x11d   : > { %1439 = vmatprep.subr.mxu0 %v6763_v16  ;;  %1648 = vmatpush2.msra.mxu1 %v6764_v13  ;;  %6784 = vst [vmem:[#allocation29_spill] sm:$0xff] %v4728_v35  ;;  %v6786_v9 = vand.u32 4294901760, %v6785_v6  ;;  %v4733_v16 = vand.u32 4294901760, %v310_v45  ;;  %v6272_v13 = vand.u32 4294901760, %v4704_v26  ;;  %6792 = vst [vmem:[#allocation85_spill] sm:$0xff] %v4741_v28  ;;  %v6801_v6 = vsub.s32 0, %v6800_v11 }
 0x11e   : > { %1443 = vmatpush2.msra.mxu0 %v6767_v24  ;;  %1650 = vmatprep.subr.mxu1 %v6768_v25  ;;  %v6791_v24 = vld [vmem:[#allocation70_spill] sm:$0xff]  ;;  %v4743_v25 = vand.u32 4294901760, %v311_v40  ;;  %6799 = vst [vmem:[#allocation95_spill] sm:$0xff] %v4753_v14 }
 0x11f   : > { %1447 = vmatprep.subr.mxu0 %v6772_v33  ;;  %1652 = vmatpush2.msra.mxu1 %v6773_v34  ;;  %6788 = vst [vmem:[#allocation31_spill] sm:$0xff] %v4733_v16  ;;  %v4746_v33 = vsub.f32 %v313_v57, %v4712_v41  ;;  %v6795_v34 = vld [vmem:[#allocation79_spill] sm:$0xff] }
 0x120   : > { %1451 = vmatpush2.msra.mxu0 %v6777_v50  ;;  %1654 = vmatprep.subr.mxu1 %v6778_v54  ;;  %6793 = vst [vmem:[#allocation89_spill] sm:$0xff] %v4743_v25  ;;  %v6796_v49 = vand.u32 4294901760, %v6795_v34  ;;  %v6797_v50 = vld [vmem:[#allocation72_spill] sm:$0xff]  ;;  %v4751_v54 = vand.u32 4294901760, %v309_v2 }
 0x121   : > { %1455 = vmatprep.subr.mxu0 %v6782_v15  ;;  %1656 = vmatpush2.msra.mxu1 %v6783_v51  ;;  %6794 = vst [vmem:[#allocation91_spill] sm:$0xff] %v4746_v33  ;;  %v306_v51 = vld [vmem:[#allocation7 + $0xa0] sm:$0xff]  ;;  %v4791_v15 = vsub.f32 %v311_v40, %v4743_v25  ;;  %v6822_v40 = vand.u32 4294901760, %v6677_v37 }
 0x122   : > { %1459 = vmatpush2.msra.mxu0 %v6786_v9  ;;  %1658 = vmatprep.subr.mxu1 %v6787_v12  ;;  %6798 = vst [vmem:[#allocation93_spill] sm:$0xff] %v4751_v54  ;;  %v4759_v9 = vrot.slane %v4722_v39, %v6801_v6  ;;  %v6803_v12 = vld [vmem:[#allocation81_spill] sm:$0xff]  ;;  %v4774_v6 = vsub.f32 %v4707_v31, %v6271_v59  ;;  %v6817_v31 = vld [vmem:[#allocation80_spill] sm:$0xff] }
 0x123   : > { %1463 = vmatprep.subr.mxu0 %v6790_v19  ;;  %1660 = vmatpush2.msra.mxu1 %v6791_v24  ;;  %v6804_v57 = vand.u32 4294901760, %v6803_v12  ;;  %v6806_v24 = vld [vmem:[#allocation83_spill] sm:$0xff]  ;;  %v4779_v12 = vsub.f32 %v4704_v26, %v6272_v13  ;;  %6814 = vst [vmem:[#allocation102_spill] sm:$0xff] %v4791_v15  ;;  %v4797_v39 = vsub.f32 %v308_v56, %v4753_v14  ;;  %v303_v19 = vld [vmem:[#allocation7 + $0x88] sm:$0xff] }
 0x124   : > { %1467 = vmatpush2.msra.mxu0 %v6796_v49  ;;  %1662 = vmatprep.subr.mxu1 %v6797_v50  ;;  %6802 = vst [vmem:[#allocation97_spill] sm:$0xff] %v4759_v9  ;;  %v6807_v34 = vand.u32 4294901760, %v6806_v24  ;;  %v6808_v49 = vld [vmem:[#allocation76_spill] sm:$0xff]  ;;  %v4769_v50 = vsub.f32 %v310_v45, %v4733_v16  ;;  %v304_v24 = vld [vmem:[#allocation7 + $0x90] sm:$0xff]  ;;  %v4786_v45 = vand.u32 4294901760, %v306_v51  ;;  %v4808_v59 = vand.u32 4294901760, %v4759_v9 }
 0x125   : > { %1471 = vmatprep.subr.mxu0 %v6804_v57  ;;  %1664 = vmatpush2.msra.mxu1 %v6805_v18  ;;  %v4781_v57 = vand.u32 4294901760, %v307_v32  ;;  %v305_v18 = vld [vmem:[#allocation7 + $0x98] sm:$0xff]  ;;  %6818 = vst [vmem:[#allocation103_spill] sm:$0xff] %v4797_v39  ;;  %v4852_v11 = vand.u32 4294901760, %v303_v19 }
 0x126   : > { %1475 = vmatpush2.msra.mxu0 %v6807_v34  ;;  %1666 = vmatprep.subr.mxu1 %v6808_v49  ;;  %6809 = vst [vmem:[#allocation98_spill] sm:$0xff] %v4769_v50  ;;  %v6811_v34 = vand.u32 4294901760, %v6673_v20  ;;  %v6812_v49 = vld [vmem:[#allocation78_spill] sm:$0xff]  ;;  %6813 = vst [vmem:[#allocation101_spill] sm:$0xff] %v4786_v45  ;;  %v6815_v13 = vld [vmem:[#allocation87_spill] sm:$0xff]  ;;  %v6819_v20 = vand.u32 4294901760, %v4720_v5 }
 0x127   : > { %6810 = vst [vmem:[#allocation99_spill] sm:$0xff] %v4781_v57  ;;  %1668 = vmatpush2.msra.mxu1 %v6812_v49  ;;  %v6816_v26 = vand.u32 4294901760, %v6815_v13  ;;  %v4805_v49 = vsub.f32 %v309_v2, %v4751_v54  ;;  %6821 = vst [vmem:[#allocation105_spill] sm:$0xff] %v4808_v59  ;;  %v4818_v13 = vand.u32 4294901760, %v305_v18  ;;  %v6827_v2 = vand.u32 4294901760, %v6679_v23  ;;  %v6831_v59 = vld [vmem:[#allocation86_spill] sm:$0xff] }
 0x128   : > { %1479 = vmatprep.subr.mxu0 %v6811_v34  ;;  %1670 = vmatprep.subr.mxu1 %v6817_v31  ;;  %v4802_v34 = vsub.f32 %v4720_v5, %v6819_v20  ;;  %v6824_v31 = vand.u32 4294901760, %v4728_v35  ;;  %v4820_v20 = vand.u32 4294901760, %v304_v24  ;;  %v6828_v5 = vld [vmem:[#allocation84_spill] sm:$0xff]  ;;  %v4835_v23 = vsub.f32 %v306_v51, %v4786_v45  ;;  %6837 = vst [vmem:[#allocation35_spill] sm:$0xff] %v4852_v11 }
 0x129   : > { %1483 = vmatpush2.msra.mxu0 %v6816_v26  ;;  %6820 = vst [vmem:[#allocation104_spill] sm:$0xff] %v4805_v49  ;;  %v6823_v26 = vld [vmem:[#allocation82_spill] sm:$0xff]  ;;  %6825 = vst [vmem:[#allocation16_spill] sm:$0xff] %v4818_v13  ;;  %v301_v9 = vld [vmem:[#allocation7 + $0x78] sm:$0xff]  ;;  %v4866_v51 = vsub.f32 %v305_v18, %v4818_v13  ;;  %v6848_v18 = vand.u32 4294901760, %v6687_v1  ;;  %v6851_v45 = vand.u32 4294901760, %v6688_v4 }
 0x12a   : > { %1487 = vmatprep.subr.mxu0 %v6822_v40  ;;  %1672 = vmatpush2.msra.mxu1 %v6823_v26  ;;  %v4816_v56 = vsub.f32 %v4728_v35, %v6824_v31  ;;  %6826 = vst [vmem:[#allocation24_spill] sm:$0xff] %v4820_v20  ;;  %v302_v26 = vld [vmem:[#allocation7 + $0x80] sm:$0xff]  ;;  %v4829_v31 = vsub.f32 %v307_v32, %v4781_v57  ;;  %v6830_v35 = vand.u32 4294901760, %v6681_v42  ;;  %6832 = vst [vmem:[#allocation26_spill] sm:$0xff] %v4835_v23  ;;  %v300_v42 = vld [vmem:[#allocation7 + $0x70] sm:$0xff] }
 0x12b   : > { %1491 = vmatpush2.msra.mxu0 %v6827_v2  ;;  %1674 = vmatprep.subr.mxu1 %v6828_v5  ;;  %v6833_v5 = vand.u32 4294901760, %v4746_v33  ;;  %v6834_v40 = vand.u32 4294901760, %v4741_v28  ;;  %6842 = vst [vmem:[#allocation30_spill] sm:$0xff] %v4866_v51  ;;  %v299_v32 = vld [vmem:[#allocation7 + $0x68] sm:$0xff]  ;;  %v6853_v1 = vand.u32 4294901760, %v4805_v49  ;;  %v6857_v4 = vand.u32 4294901760, %v6689_v7 }
 0x12c   : > { %6829 = vst [vmem:[#allocation33_spill] sm:$0xff] %v4829_v31  ;;  %1495 = vmatprep.subr.mxu0 %v6830_v35  ;;  %1676 = vmatpush2.msra.mxu1 %v6831_v59  ;;  %v6835_v35 = vand.u32 4294901760, %v6683_v22  ;;  %v6836_v59 = vld [vmem:[#allocation88_spill] sm:$0xff]  ;;  %v4861_v22 = vsub.f32 %v304_v24, %v4820_v20  ;;  %v4878_v24 = vand.u32 4294901760, %v300_v42  ;;  %v6849_v13 = vld [vmem:[#allocation106_spill] sm:$0xff] }
 0x12d   : > { %v4840_v2 = vsub.f32 %v4746_v33, %v6833_v5  ;;  %v4845_v37 = vsub.f32 %v4741_v28, %v6834_v40  ;;  %1678 = vmatprep.subr.mxu1 %v6836_v59  ;;  %v6838_v40 = vand.u32 4294901760, %v6684_v8  ;;  %v6839_v28 = vld [vmem:[#allocation90_spill] sm:$0xff]  ;;  %v298_v59 = vld [vmem:[#allocation7 + $0x60] sm:$0xff]  ;;  %v6843_v5 = vand.u32 4294901760, %v6686_v36  ;;  %1565 = vmatprep.mubr.f32.mxu0 %v6849_v13 }
 0x12e   : > { %1499 = vmatpush2.msra.mxu0 %v6835_v35  ;;  %1680 = vmatpush2.msra.mxu1 %v6839_v28  ;;  %6840 = vst [vmem:[#allocation28_spill] sm:$0xff] %v4861_v22  ;;  %v4863_v35 = vand.u32 4294901760, %v302_v26  ;;  %v6844_v33 = vld [vmem:[#allocation92_spill] sm:$0xff]  ;;  %v6845_v8 = vand.u32 4294901760, %v4769_v50  ;;  %6847 = vst [vmem:[#allocation32_spill] sm:$0xff] %v4878_v24  ;;  %v6852_v20 = vld [vmem:[#allocation94_spill] sm:$0xff]  ;;  %v4925_v7 = vsub.f32 %v300_v42, %v4878_v24 }
 0x12f   : > { %1503 = vmatprep.subr.mxu0 %v6838_v40  ;;  %1682 = vmatprep.subr.mxu1 %v6844_v33  ;;  %v4876_v40 = vand.u32 4294901760, %v301_v9  ;;  %v6854_v36 = vand.u32 4294901760, %v4797_v39  ;;  %v4905_v57 = vand.u32 4294901760, %v298_v59 }
 0x130   : > { %6841 = vst [vmem:[#allocation37_spill] sm:$0xff] %v4863_v35  ;;  %1507 = vmatpush2.msra.mxu0 %v6843_v5  ;;  %v4874_v28 = vsub.f32 %v4769_v50, %v6845_v8  ;;  %v6850_v5 = vand.u32 4294901760, %v4791_v15  ;;  %1684 = vmatpush2.msra.mxu1 %v6852_v20  ;;  %v4908_v50 = vsub.f32 %v303_v19, %v4852_v11  ;;  %6862 = vst [vmem:[#allocation45_spill] sm:$0xff] %v4925_v7 }
 0x131   : > { %6846 = vst [vmem:[#allocation39_spill] sm:$0xff] %v4876_v40  ;;  %1511 = vmatprep.subr.mxu0 %v6848_v18  ;;  %v4898_v18 = vsub.f32 %v4805_v49, %v6853_v1  ;;  %v4903_v33 = vsub.f32 %v4797_v39, %v6854_v36  ;;  %6855 = vst [vmem:[#allocation41_spill] sm:$0xff] %v4905_v57  ;;  %v4914_v20 = vsub.f32 %v302_v26, %v4863_v35  ;;  %v6870_v36 = vld [vmem:[#allocation100_spill] sm:$0xff] }
 0x132   : > { %v4889_v8 = vsub.f32 %v4791_v15, %v6850_v5  ;;  %1515 = vmatpush2.msra.mxu0 %v6851_v45  ;;  %v297_v5 = vld [vmem:[#allocation7 + $0x58] sm:$0xff]  ;;  %v296_v15 = vld [vmem:[#allocation7 + $0x50] sm:$0xff]  ;;  %6856 = vst [vmem:[#allocation34_spill] sm:$0xff] %v4908_v50  ;;  %v4916_v1 = vand.u32 4294901760, %v299_v32  ;;  %v6861_v49 = vand.u32 4294901760, %v6690_v48  ;;  %v6865_v39 = vand.u32 4294901760, %v6691_v21  ;;  %1702 = vmatprep.mubr.f32.mxu1 %v6849_v13 }
 0x133   : > { %1519 = vmatprep.subr.mxu0 %v6857_v4  ;;  %v6858_v45 = vld [vmem:[#allocation96_spill] sm:$0xff]  ;;  %6859 = vst [vmem:[#allocation43_spill] sm:$0xff] %v4914_v20  ;;  %v6863_v4 = vand.u32 4294901760, %v4829_v31  ;;  %v6866_v48 = vand.u32 4294901760, %v4835_v23  ;;  %v4944_v42 = vand.u32 4294901760, %v297_v5  ;;  %v4946_v19 = vand.u32 4294901760, %v296_v15 }
 0x134   : > { %1686 = vmatprep.subr.mxu1 %v6858_v45  ;;  %6860 = vst [vmem:[#allocation36_spill] sm:$0xff] %v4916_v1  ;;  %1523 = vmatpush2.msra.mxu0 %v6861_v49  ;;  %v4933_v45 = vsub.f32 %v301_v9, %v4876_v40  ;;  %v6869_v9 = vand.u32 4294901760, %v6692_v62  ;;  %v6873_v62 = vand.u32 4294901760, %v4866_v51  ;;  %v293_v21 = vld [vmem:[#allocation7 + $0x38] sm:$0xff] }
 0x135   : > { %1688 = vmatpush2.msra.mxu1 %v4253_v46  ;;  %v4930_v26 = vsub.f32 %v4829_v31, %v6863_v4  ;;  %1527 = vmatprep.subr.mxu0 %v6865_v39  ;;  %v4942_v49 = vsub.f32 %v4835_v23, %v6866_v48  ;;  %6867 = vst [vmem:[#allocation47_spill] sm:$0xff] %v4944_v42  ;;  %6868 = vst [vmem:[#allocation40_spill] sm:$0xff] %v4946_v19  ;;  %v294_v4 = vld [vmem:[#allocation7 + $0x40] sm:$0xff]  ;;  %v295_v46 = vld [vmem:[#allocation7 + $0x48] sm:$0xff]  ;;  %v6872_v23 = vand.u32 4294901760, %v4363_v38 }
 0x136   : > { %6864 = vst [vmem:[#allocation38_spill] sm:$0xff] %v4933_v45  ;;  %1690 = vmatprep.subr.mxu1 %v4266_v10  ;;  %1531 = vmatpush2.msra.mxu0 %v6869_v9  ;;  %v4954_v39 = vsub.f32 %v298_v59, %v4905_v57  ;;  %v4963_v9 = vsub.f32 %v4866_v51, %v6873_v62  ;;  %v292_v31 = vld [vmem:[#allocation7 + $0x30] sm:$0xff]  ;;  %v6876_v38 = vand.u32 4294901760, %v4367_v61  ;;  %v6878_v59 = vand.u32 4294901760, %v4372_v0 }
 0x137   : > { %1692 = vmatpush2.msra.mxu1 %v6870_v36  ;;  %1535 = vmatprep.subr.mxu0 %v6872_v23  ;;  %v6874_v36 = vand.u32 4294901760, %v4861_v22  ;;  %v4972_v48 = vsub.f32 %v299_v32, %v4916_v1  ;;  %v4978_v23 = vand.u32 4294901760, %v294_v4  ;;  %v4987_v61 = vsub.f32 %v296_v15, %v4946_v19  ;;  %v291_v32 = vld [vmem:[#allocation7 + $0x28] sm:$0xff] }
 0x138   : > { %6871 = vst [vmem:[#allocation49_spill] sm:$0xff] %v4954_v39  ;;  %1694 = vmatprep.subr.mxu1 %v4289_v52  ;;  %1539 = vmatpush2.msra.mxu0 %v6876_v38  ;;  %v4989_v38 = vand.u32 4294901760, %v295_v46  ;;  %v4992_v52 = vsub.f32 %v297_v5, %v4944_v42  ;;  %v6882_v62 = vand.u32 4294901760, %v4377_v60  ;;  %v6883_v0 = vand.u32 4294901760, %v4908_v50 }
 0x139   : > { %v4968_v10 = vsub.f32 %v4861_v22, %v6874_v36  ;;  %6875 = vst [vmem:[#allocation42_spill] sm:$0xff] %v4972_v48  ;;  %1696 = vmatpush2.msra.mxu1 %v4308_v3  ;;  %6877 = vst [vmem:[#allocation51_spill] sm:$0xff] %v4978_v23  ;;  %1543 = vmatprep.subr.mxu0 %v6878_v59  ;;  %v290_v3 = vld [vmem:[#allocation7 + $0x20] sm:$0xff]  ;;  %v5002_v59 = vand.u32 4294901760, %v293_v21  ;;  %v5004_v15 = vand.u32 4294901760, %v292_v31  ;;  %v6886_v5 = vand.u32 4294901760, %v4395_v30 }
 0x13a   : > { %1698 = vmatprep.subr.mxu1 %v4321_v47  ;;  %6879 = vst [vmem:[#allocation44_spill] sm:$0xff] %v4987_v61  ;;  %6880 = vst [vmem:[#allocation53_spill] sm:$0xff] %v4989_v38  ;;  %1547 = vmatpush2.msra.mxu0 %v6882_v62  ;;  %v5000_v47 = vsub.f32 %v4908_v50, %v6883_v0  ;;  %v6887_v62 = vand.u32 4294901760, %v4914_v20  ;;  %v6888_v22 = vand.u32 4294901760, %v4399_v29  ;;  %v6889_v36 = vld [vmem:[#allocation107_spill] sm:$0xff]  ;;  %v6891_v13 = vand.u32 4294901760, %v4933_v45 }
 0x13b   : > { %6881 = vst [vmem:[#allocation46_spill] sm:$0xff] %v4992_v52  ;;  %1700 = vmatpush2.msra.mxu1 %v4338_v58  ;;  %6884 = vst [vmem:[#allocation55_spill] sm:$0xff] %v5002_v59  ;;  %1551 = vmatprep.subr.mxu0 %v6886_v5  ;;  %v5022_v30 = vsub.f32 %v294_v4, %v4978_v23  ;;  %v6892_v58 = vand.u32 4294901760, %v4925_v7  ;;  %v5034_v60 = vand.u32 4294901760, %v290_v3  ;;  %v289_v50 = vld [vmem:[#allocation7 + $0x18] sm:$0xff]  ;;  %v288_v29 = vld [vmem:[#allocation7 + $0x10] sm:$0xff] }
 0x13c   : > { %6885 = vst [vmem:[#allocation48_spill] sm:$0xff] %v5004_v15  ;;  %v5015_v0 = vsub.f32 %v4914_v20, %v6887_v62  ;;  %1555 = vmatpush2.msra.mxu0 %v6888_v22  ;;  %1704 = vmatmul.mubr.f32.vlgmr.msra.gmra.mxu1 %v6889_v36  ;;  %v5027_v5 = vsub.f32 %v4933_v45, %v6891_v13  ;;  %v6894_v22 = vand.u32 4294901760, %v4404_v63  ;;  %v6895_v4 = vand.u32 4294901760, %v4774_v6  ;;  %v286_v45 = vld [vmem:[#allocation7] sm:$0xff] }
 0x13d   : > { %6890 = vst [vmem:[#allocation57_spill] sm:$0xff] %v5022_v30  ;;  %v5032_v62 = vsub.f32 %v4925_v7, %v6892_v58  ;;  %6893 = vst [vmem:[#allocation50_spill] sm:$0xff] %v5034_v60  ;;  %v5040_v20 = vand.u32 4294901760, %v291_v32  ;;  %v5045_v51 = vsub.f32 %v295_v46, %v4989_v38  ;;  %v6898_v58 = vand.u32 4294901760, %v4408_v55 }
 0x13e   : > { %1559 = vmatprep.subr.mxu0 %v6894_v22  ;;  %1871 = vmatprep.subr.mxu1 %v6895_v4  ;;  %v6899_v7 = vand.u32 4294901760, %v4779_v12  ;;  %v5053_v6 = vsub.f32 %v292_v31, %v5004_v15  ;;  %v6901_v22 = vand.u32 4294901760, %v4954_v39  ;;  %v5061_v46 = vsub.f32 %v293_v21, %v5002_v59 }
 0x13f   : > { %6896 = vst [vmem:[#allocation59_spill] sm:$0xff] %v5040_v20  ;;  %6897 = vst [vmem:[#allocation52_spill] sm:$0xff] %v5045_v51  ;;  %1563 = vmatpush2.msra.mxu0 %v6898_v58  ;;  %v6903_v12 = vand.u32 4294901760, %v4972_v48  ;;  %v5073_v58 = vand.u32 4294901760, %v288_v29  ;;  %v6906_v21 = vand.u32 4294901760, %v4802_v34  ;;  %v5081_v55 = vsub.f32 %v290_v3, %v5034_v60 }
 0x140   : > { %1877 = vmatpush1.msra.mxu1 %v6899_v7  ;;  %6900 = vst [vmem:[#allocation61_spill] sm:$0xff] %v5053_v6  ;;  %v5058_v4 = vsub.f32 %v4954_v39, %v6901_v22  ;;  %6902 = vst [vmem:[#allocation54_spill] sm:$0xff] %v5061_v46  ;;  %1567 = vmatmul.mubr.f32.vlgmr.msra.gmra.mxu0 %v6889_v36  ;;  %v5071_v7 = vand.u32 4294901760, %v289_v50  ;;  %v287_v22 = vld [vmem:[#allocation7 + $0x8] sm:$0xff]  ;;  %v6908_v13 = vand.u32 4294901760, %v4816_v56  ;;  %v6909_v39 = vand.u32 4294901760, %v4992_v52 }
 0x141   : > { %1722 = vmatprep.subr.mxu0 %v4683_v27  ;;  %v5069_v31 = vsub.f32 %v4972_v48, %v6903_v12  ;;  %6905 = vst [vmem:[#allocation56_spill] sm:$0xff] %v5073_v58  ;;  %1883 = vmatprep.subr.mxu1 %v6906_v21  ;;  %6907 = vst [vmem:[#allocation65_spill] sm:$0xff] %v5081_v55  ;;  %v6910_v34 = vand.u32 4294901760, %v4987_v61  ;;  %v5098_v63 = vand.u32 4294901760, %v286_v45  ;;  %v349_v36 = vld [vmem:[#allocation7 + $0x1f8] sm:$0xff]  ;;  %v348_v12 = vld [vmem:[#allocation7 + $0x1f0] sm:$0xff] }
 0x142   : > { %6904 = vst [vmem:[#allocation63_spill] sm:$0xff] %v5071_v7  ;;  %1724 = vmatpush1.msra.mxu0 %v4685_v43  ;;  %1889 = vmatpush1.msra.mxu1 %v6908_v13  ;;  %v5090_v48 = vsub.f32 %v4992_v52, %v6909_v39  ;;  %v6912_v56 = vand.u32 4294901760, %v4840_v2  ;;  %v5104_v39 = vand.u32 4294901760, %v287_v22  ;;  %v6915_v3 = vand.u32 4294901760, %v4845_v37  ;;  %v346_v13 = vld [vmem:[#allocation7 + $0x1e0] sm:$0xff] }
 0x143   : > { %1726 = vmatprep.subr.mxu0 %v4693_v53  ;;  %v5095_v21 = vsub.f32 %v4987_v61, %v6910_v34  ;;  %6911 = vst [vmem:[#allocation58_spill] sm:$0xff] %v5098_v63  ;;  %v5108_v34 = vsub.f32 %v291_v32, %v5040_v20  ;;  %v5119_v53 = vsub.f32 %v289_v50, %v5071_v7  ;;  %v6918_v32 = vand.u32 4294901760, %v4889_v8 }
 0x144   : > { %1728 = vmatpush1.msra.mxu0 %v4698_v17  ;;  %1895 = vmatprep.subr.mxu1 %v6912_v56  ;;  %6913 = vst [vmem:[#allocation67_spill] sm:$0xff] %v5104_v39  ;;  %v5115_v17 = vsub.f32 %v288_v29, %v5073_v58  ;;  %v347_v56 = vld [vmem:[#allocation7 + $0x1e8] sm:$0xff]  ;;  %v6919_v37 = vand.u32 4294901760, %v5022_v30  ;;  %v5129_v61 = vand.u32 4294901760, %v349_v36  ;;  %v5131_v29 = vand.u32 4294901760, %v348_v12 }
 0x145   : > { %6914 = vst [vmem:[#allocation60_spill] sm:$0xff] %v5108_v34  ;;  %1730 = vmatprep.subr.mxu0 %v4712_v41  ;;  %1901 = vmatpush1.msra.mxu1 %v6915_v3  ;;  %6917 = vst [vmem:[#allocation62_spill] sm:$0xff] %v5119_v53  ;;  %v6922_v50 = vand.u32 4294901760, %v4874_v28  ;;  %v6925_v2 = vand.u32 4294901760, %v4898_v18  ;;  %v6926_v28 = vand.u32 4294901760, %v5061_v46  ;;  %v5155_v52 = vand.u32 4294901760, %v347_v56 }
 0x146   : > { %6916 = vst [vmem:[#allocation69_spill] sm:$0xff] %v5115_v17  ;;  %1732 = vmatpush1.msra.mxu0 %v4714_v44  ;;  %1907 = vmatprep.subr.mxu1 %v6918_v32  ;;  %v5127_v3 = vsub.f32 %v5022_v30, %v6919_v37  ;;  %6920 = vst [vmem:[#allocation71_spill] sm:$0xff] %v5129_v61  ;;  %v6923_v32 = vand.u32 4294901760, %v5045_v51  ;;  %v5145_v30 = vsub.f32 %v286_v45, %v5098_v63  ;;  %v6940_v44 = vld [vmem:[#allocation101_spill] sm:$0xff]  ;;  %v6949_v41 = vld [vmem:[#allocation24_spill] sm:$0xff] }
 0x147   : > { %6921 = vst [vmem:[#allocation64_spill] sm:$0xff] %v5131_v29  ;;  %1734 = vmatprep.subr.mxu0 %v4743_v25  ;;  %1913 = vmatpush1.msra.mxu1 %v6922_v50  ;;  %v5153_v50 = vsub.f32 %v5061_v46, %v6926_v28  ;;  %6927 = vst [vmem:[#allocation66_spill] sm:$0xff] %v5155_v52  ;;  %v5158_v25 = vand.u32 4294901760, %v346_v13  ;;  %v6929_v45 = vand.u32 4294901760, %v4903_v33  ;;  %v6930_v18 = vand.u32 4294901760, %v5053_v6 }
 0x148   : > { %v5142_v37 = vsub.f32 %v5045_v51, %v6923_v32  ;;  %6924 = vst [vmem:[#allocation73_spill] sm:$0xff] %v5145_v30  ;;  %1736 = vmatpush1.msra.mxu0 %v4733_v16  ;;  %1919 = vmatprep.subr.mxu1 %v6925_v2  ;;  %v345_v32 = vld [vmem:[#allocation7 + $0x1d8] sm:$0xff]  ;;  %v344_v51 = vld [vmem:[#allocation7 + $0x1d0] sm:$0xff]  ;;  %v5171_v8 = vsub.f32 %v287_v22, %v5104_v39  ;;  %v342_v16 = vld [vmem:[#allocation7 + $0x1c0] sm:$0xff] }
 0x149   : > { %6928 = vst [vmem:[#allocation75_spill] sm:$0xff] %v5158_v25  ;;  %1738 = vmatprep.subr.mxu0 %v4751_v54  ;;  %1925 = vmatpush1.msra.mxu1 %v6929_v45  ;;  %v5166_v2 = vsub.f32 %v5053_v6, %v6930_v18  ;;  %v6932_v54 = vand.u32 4294901760, %v4930_v26  ;;  %v5178_v45 = vsub.f32 %v348_v12, %v5131_v29  ;;  %v6934_v18 = vand.u32 4294901760, %v5081_v55  ;;  %v6936_v22 = vld [vmem:[#allocation99_spill] sm:$0xff]  ;;  %v343_v12 = vld [vmem:[#allocation7 + $0x1c8] sm:$0xff] }
 0x14a   : > { %6931 = vst [vmem:[#allocation68_spill] sm:$0xff] %v5171_v8  ;;  %1740 = vmatpush1.msra.mxu0 %v4753_v14  ;;  %v5186_v46 = vsub.f32 %v349_v36, %v5129_v61  ;;  %v6937_v6 = vand.u32 4294901760, %v4942_v49  ;;  %v5192_v26 = vand.u32 4294901760, %v345_v32  ;;  %v5194_v33 = vand.u32 4294901760, %v344_v51 }
 0x14b   : > { %1931 = vmatprep.subr.mxu1 %v6932_v54  ;;  %6933 = vst [vmem:[#allocation77_spill] sm:$0xff] %v5178_v45  ;;  %v5183_v28 = vsub.f32 %v5081_v55, %v6934_v18  ;;  %1742 = vmatprep.subr.mxu0 %v6936_v22  ;;  %v6941_v18 = vand.u32 4294901760, %v4963_v9  ;;  %v6942_v55 = vand.u32 4294901760, %v5108_v34  ;;  %v5209_v54 = vand.u32 4294901760, %v342_v16  ;;  %v6945_v22 = vld [vmem:[#allocation16_spill] sm:$0xff] }
 0x14c   : > { %6935 = vst [vmem:[#allocation70_spill] sm:$0xff] %v5186_v46  ;;  %1937 = vmatpush1.msra.mxu1 %v6937_v6  ;;  %6938 = vst [vmem:[#allocation79_spill] sm:$0xff] %v5192_v26  ;;  %1744 = vmatpush1.msra.mxu0 %v6940_v44  ;;  %v5207_v6 = vsub.f32 %v346_v13, %v5158_v25  ;;  %v6946_v14 = vand.u32 4294901760, %v4968_v10  ;;  %v340_v44 = vld [vmem:[#allocation7 + $0x1b0] sm:$0xff]  ;;  %v6950_v10 = vand.u32 4294901760, %v5000_v47  ;;  %v5230_v9 = vand.u32 4294901760, %v343_v12 }
 0x14d   : > { %6939 = vst [vmem:[#allocation72_spill] sm:$0xff] %v5194_v33  ;;  %1943 = vmatprep.subr.mxu1 %v6941_v18  ;;  %v5204_v49 = vsub.f32 %v5108_v34, %v6942_v55  ;;  %6944 = vst [vmem:[#allocation74_spill] sm:$0xff] %v5209_v54  ;;  %1746 = vmatprep.subr.mxu0 %v6945_v22  ;;  %v6947_v18 = vand.u32 4294901760, %v5119_v53  ;;  %v6948_v55 = vand.u32 4294901760, %v5115_v17  ;;  %v341_v22 = vld [vmem:[#allocation7 + $0x1b8] sm:$0xff]  ;;  %v6955_v47 = vand.u32 4294901760, %v5145_v30 }
 0x14e   : > { %6943 = vst [vmem:[#allocation81_spill] sm:$0xff] %v5207_v6  ;;  %1949 = vmatpush1.msra.mxu1 %v6946_v14  ;;  %1748 = vmatpush1.msra.mxu0 %v6949_v41  ;;  %6951 = vst [vmem:[#allocation83_spill] sm:$0xff] %v5230_v9  ;;  %v5240_v13 = vsub.f32 %v344_v51, %v5194_v33  ;;  %v5256_v51 = vsub.f32 %v342_v16, %v5209_v54  ;;  %v5271_v16 = vand.u32 4294901760, %v341_v22 }
 0x14f   : > { %v5218_v36 = vsub.f32 %v5119_v53, %v6947_v18  ;;  %v5223_v34 = vsub.f32 %v5115_v17, %v6948_v55  ;;  %1955 = vmatprep.subr.mxu1 %v6950_v10  ;;  %v5234_v53 = vsub.f32 %v347_v56, %v5155_v52  ;;  %1750 = vmatprep.subr.mxu0 %v4852_v11  ;;  %v6953_v55 = vand.u32 4294901760, %v5015_v0  ;;  %v338_v17 = vld [vmem:[#allocation7 + $0x1a0] sm:$0xff] }
 0x150   : > { %6954 = vst [vmem:[#allocation78_spill] sm:$0xff] %v5240_v13  ;;  %v5245_v10 = vsub.f32 %v5145_v30, %v6955_v47  ;;  %v5249_v18 = vsub.f32 %v345_v32, %v5192_v26  ;;  %1752 = vmatpush1.msra.mxu0 %v4863_v35  ;;  %v6957_v56 = vand.u32 4294901760, %v5027_v5  ;;  %6958 = vst [vmem:[#allocation80_spill] sm:$0xff] %v5256_v51  ;;  %v339_v47 = vld [vmem:[#allocation7 + $0x1a8] sm:$0xff]  ;;  %v6960_v32 = vand.u32 4294901760, %v5032_v62  ;;  %v336_v35 = vld [vmem:[#allocation7 + $0x190] sm:$0xff] }
 0x151   : > { %6952 = vst [vmem:[#allocation76_spill] sm:$0xff] %v5234_v53  ;;  %1961 = vmatpush1.msra.mxu1 %v6953_v55  ;;  %v5258_v55 = vand.u32 4294901760, %v340_v44  ;;  %1754 = vmatprep.subr.mxu0 %v4876_v40  ;;  %6962 = vst [vmem:[#allocation84_spill] sm:$0xff] %v5271_v16  ;;  %v6963_v30 = vand.u32 4294901760, %v5069_v31  ;;  %v6964_v62 = vand.u32 4294901760, %v5186_v46  ;;  %v5282_v14 = vand.u32 4294901760, %v338_v17 }
 0x152   : > { %6956 = vst [vmem:[#allocation87_spill] sm:$0xff] %v5249_v18  ;;  %1967 = vmatprep.subr.mxu1 %v6957_v56  ;;  %v6961_v56 = vand.u32 4294901760, %v5171_v8  ;;  %1756 = vmatpush1.msra.mxu0 %v4878_v24  ;;  %v337_v40 = vld [vmem:[#allocation7 + $0x198] sm:$0xff]  ;;  %v6967_v31 = vand.u32 4294901760, %v5178_v45  ;;  %v6972_v5 = vand.u32 4294901760, %v5095_v21  ;;  %v6975_v21 = vand.u32 4294901760, %v5234_v53 }
 0x153   : > { %6959 = vst [vmem:[#allocation82_spill] sm:$0xff] %v5258_v55  ;;  %1973 = vmatpush1.msra.mxu1 %v6960_v32  ;;  %v5279_v32 = vsub.f32 %v5186_v46, %v6964_v62  ;;  %1758 = vmatprep.subr.mxu0 %v4916_v1  ;;  %v5296_v46 = vand.u32 4294901760, %v339_v47  ;;  %v5303_v1 = vsub.f32 %v340_v44, %v5258_v55  ;;  %v335_v44 = vld [vmem:[#allocation7 + $0x188] sm:$0xff] }
 0x154   : > { %v5269_v0 = vsub.f32 %v5171_v8, %v6961_v56  ;;  %1979 = vmatprep.subr.mxu1 %v6963_v30  ;;  %v5285_v56 = vsub.f32 %v343_v12, %v5230_v9  ;;  %v6966_v8 = vand.u32 4294901760, %v5058_v4  ;;  %v5294_v62 = vsub.f32 %v5178_v45, %v6967_v31  ;;  %1760 = vmatpush1.msra.mxu0 %v4905_v57  ;;  %v334_v45 = vld [vmem:[#allocation7 + $0x180] sm:$0xff] }
 0x155   : > { %6968 = vst [vmem:[#allocation88_spill] sm:$0xff] %v5296_v46  ;;  %v6969_v12 = vand.u32 4294901760, %v5090_v48  ;;  %6970 = vst [vmem:[#allocation90_spill] sm:$0xff] %v5303_v1  ;;  %v6971_v4 = vand.u32 4294901760, %v5207_v6  ;;  %v5310_v30 = vand.u32 4294901760, %v336_v35  ;;  %1762 = vmatprep.subr.mxu0 %v4944_v42  ;;  %v6974_v31 = vand.u32 4294901760, %v5142_v37 }
 0x156   : > { %6965 = vst [vmem:[#allocation86_spill] sm:$0xff] %v5285_v56  ;;  %1985 = vmatpush1.msra.mxu1 %v6966_v8  ;;  %v2050_v48 = vand.u32 4294901760, %v5269_v0  ;;  %1764 = vmatpush1.msra.mxu0 %v4946_v19  ;;  %v5333_v0 = vsub.f32 %v338_v17, %v5282_v14  ;;  %v5345_v19 = vand.u32 4294901760, %v334_v45  ;;  %v5348_v17 = vsub.f32 %v339_v47, %v5296_v46 }
 0x157   : > { %1991 = vmatprep.subr.mxu1 %v6969_v12  ;;  %v5308_v8 = vsub.f32 %v5207_v6, %v6971_v4  ;;  %v5317_v12 = vand.u32 4294901760, %v337_v40  ;;  %v5321_v4 = vsub.f32 %v341_v22, %v5271_v16  ;;  %1766 = vmatprep.subr.mxu0 %v4989_v38  ;;  %v6977_v22 = vand.u32 4294901760, %v5127_v3 }
 0x158   : > { %1997 = vmatpush1.msra.mxu1 %v6972_v5  ;;  %v5330_v5 = vsub.f32 %v5234_v53, %v6975_v21  ;;  %6976 = vst [vmem:[#allocation106_spill] sm:$0xff] %v5333_v0  ;;  %v332_v21 = vld [vmem:[#allocation7 + $0x170] sm:$0xff]  ;;  %6979 = vst [vmem:[#allocation94_spill] sm:$0xff] %v5348_v17  ;;  %1768 = vmatpush1.msra.mxu0 %v4978_v23  ;;  %v6980_v57 = vand.u32 4294901760, %v5153_v50  ;;  %v6982_v37 = vand.u32 4294901760, %v5240_v13  ;;  %v333_v53 = vld [vmem:[#allocation7 + $0x178] sm:$0xff] }
 0x159   : > { %6973 = vst [vmem:[#allocation92_spill] sm:$0xff] %v5321_v4  ;;  %2003 = vmatprep.subr.mxu1 %v6974_v31  ;;  %v6978_v31 = vand.u32 4294901760, %v5249_v18  ;;  %1770 = vmatprep.subr.mxu0 %v5002_v59  ;;  %v6984_v47 = vand.u32 4294901760, %v5166_v2  ;;  %v331_v23 = vld [vmem:[#allocation7 + $0x168] sm:$0xff]  ;;  %v6987_v59 = vand.u32 4294901760, %v5204_v49  ;;  %v5396_v49 = vand.u32 4294901760, %v333_v53 }
 0x15a   : > { %2009 = vmatpush1.msra.mxu1 %v6977_v22  ;;  %v5355_v22 = vsub.f32 %v336_v35, %v5310_v30  ;;  %1772 = vmatpush1.msra.mxu0 %v5004_v15  ;;  %v2074_v2 = vand.u32 4294901760, %v5330_v5  ;;  %v5386_v35 = vand.u32 4294901760, %v332_v21  ;;  %v6998_v5 = vand.u32 4294901760, %v5333_v0 }
 0x15b   : > { %v5343_v6 = vsub.f32 %v5249_v18, %v6978_v31  ;;  %2015 = vmatprep.subr.mxu1 %v6980_v57  ;;  %v5360_v31 = vsub.f32 %v5240_v13, %v6982_v37  ;;  %v5362_v18 = vand.u32 4294901760, %v335_v44  ;;  %v6985_v57 = vand.u32 4294901760, %v5256_v51  ;;  %v330_v37 = vld [vmem:[#allocation7 + $0x160] sm:$0xff]  ;;  %1774 = vmatprep.subr.mxu0 %v5040_v20  ;;  %v329_v20 = vld [vmem:[#allocation7 + $0x158] sm:$0xff] }
 0x15c   : > { %6981 = vst [vmem:[#allocation96_spill] sm:$0xff] %v5355_v22  ;;  %2021 = vmatpush1.msra.mxu1 %v6984_v47  ;;  %v5375_v13 = vsub.f32 %v337_v40, %v5317_v12  ;;  %v6988_v47 = vand.u32 4294901760, %v5285_v56  ;;  %6989 = vst [vmem:[#allocation108_spill] sm:$0xff] %v5386_v35  ;;  %v6990_v40 = vand.u32 4294901760, %v5183_v28  ;;  %1776 = vmatpush1.msra.mxu0 %v5034_v60  ;;  %v5405_v28 = vand.u32 4294901760, %v330_v37 }
 0x15d   : > { %6983 = vst [vmem:[#allocation100_spill] sm:$0xff] %v5362_v18  ;;  %v5370_v50 = vsub.f32 %v5256_v51, %v6985_v57  ;;  %2027 = vmatprep.subr.mxu1 %v6987_v59  ;;  %v2086_v51 = vand.u32 4294901760, %v5343_v6  ;;  %v5394_v59 = vsub.f32 %v334_v45, %v5345_v19  ;;  %v2092_v3 = vand.u32 4294901760, %v5360_v31  ;;  %1778 = vmatprep.subr.mxu0 %v5071_v7  ;;  %v7003_v7 = vld [vmem:[#allocation27_spill] sm:$0xff] }
 0x15e   : > { %6986 = vst [vmem:[#allocation107_spill] sm:$0xff] %v5375_v13  ;;  %v5384_v57 = vsub.f32 %v5285_v56, %v6988_v47  ;;  %2033 = vmatpush1.msra.mxu1 %v6990_v40  ;;  %v6992_v47 = vand.u32 4294901760, %v5218_v36  ;;  %v5403_v56 = vand.u32 4294901760, %v331_v23  ;;  %v328_v40 = vld [vmem:[#allocation7 + $0x150] sm:$0xff]  ;;  %v5408_v6 = vsub.f32 %v335_v44, %v5362_v18  ;;  %1780 = vmatpush1.msra.mxu0 %v5073_v58 }
 0x15f   : > { %6991 = vst [vmem:[#allocation109_spill] sm:$0xff] %v5394_v59  ;;  %v6994_v45 = vand.u32 4294901760, %v5223_v34  ;;  %v6995_v36 = vand.u32 4294901760, %v5321_v4  ;;  %v6996_v31 = vand.u32 4294901760, %v5303_v1  ;;  %1782 = vmatprep.subr.mxu0 %v5104_v39  ;;  %v6999_v44 = vand.u32 4294901760, %v5245_v10 }
 0x160   : > { %2039 = vmatprep.subr.mxu1 %v6992_v47  ;;  %6993 = vst [vmem:[#allocation110_spill] sm:$0xff] %v5408_v6  ;;  %v2098_v34 = vand.u32 4294901760, %v5384_v57  ;;  %1784 = vmatpush1.msra.mxu0 %v5098_v63  ;;  %v7004_v39 = vand.u32 4294901760, %v5279_v32  ;;  %v5454_v10 = vsub.f32 %v330_v37, %v5405_v28  ;;  %v5484_v58 = vsub.f32 %v331_v23, %v5403_v56 }
 0x161   : > { %2045 = vmatpush1.msra.mxu1 %v6994_v45  ;;  %v5417_v47 = vsub.f32 %v5321_v4, %v6995_v36  ;;  %v5422_v60 = vsub.f32 %v5303_v1, %v6996_v31  ;;  %v5428_v45 = vsub.f32 %v332_v21, %v5386_v35  ;;  %v5433_v36 = vsub.f32 %v5333_v0, %v6998_v5  ;;  %v326_v31 = vld [vmem:[#allocation7 + $0x140] sm:$0xff]  ;;  %v327_v1 = vld [vmem:[#allocation7 + $0x148] sm:$0xff] }
 0x162   : > { %2051 = vmatprep.subr.mxu1 %v2050_v48  ;;  %v7000_v48 = vand.u32 4294901760, %v5348_v17  ;;  %v5444_v21 = vand.u32 4294901760, %v328_v40  ;;  %v7001_v5 = vld [vmem:[#allocation14_spill] sm:$0xff]  ;;  %1786 = vmatprep.subr.mxu0 %v5129_v61  ;;  %v5472_v37 = vand.u32 4294901760, %v326_v31  ;;  %7012 = vst [vmem:[#allocation114_spill] sm:$0xff] %v5484_v58  ;;  %v7016_v23 = vand.u32 4294901760, %v5408_v6 }
 0x163   : > { %6997 = vst [vmem:[#allocation111_spill] sm:$0xff] %v5428_v45  ;;  %2057 = vmatpush1.msra.mxu1 %v6999_v44  ;;  %v7002_v0 = vsub.s32 1, %v7001_v5  ;;  %7005 = vst [vmem:[#allocation14_spill] sm:$0xff] %v5454_v10  ;;  %v5456_v44 = vand.u32 4294901760, %v329_v20  ;;  %v7007_v5 = vand.u32 4294901760, %v5294_v62  ;;  %v2116_v32 = vand.u32 4294901760, %v5422_v60  ;;  %1788 = vmatpush2.msra.mxu0 %v5131_v29 }
 0x164   : > { %v5442_v57 = vsub.f32 %v5348_v17, %v7000_v48  ;;  %2063 = vmatprep.subr.mxu1 %v7004_v39  ;;  %v5460_v17 = vsub.f32 %v333_v53, %v5396_v49  ;;  %v7008_v39 = vand.u32 4294901760, %v5375_v13  ;;  %7009 = vst [vmem:[#allocation112_spill] sm:$0xff] %v5472_v37  ;;  %v324_v48 = vld [vmem:[#allocation7 + $0x130] sm:$0xff]  ;;  %v2128_v53 = vand.u32 4294901760, %v5433_v36  ;;  %v325_v60 = vld [vmem:[#allocation7 + $0x138] sm:$0xff]  ;;  %1790 = vmatprep.subr.mxu0 %v5155_v52 }
 0x165   : > { %v1718_v4 = vrot.slane %v7003_v7, %v7002_v0  ;;  %2069 = vmatpush2.msra.mxu1 %v7007_v5  ;;  %v2110_v7 = vand.u32 4294901760, %v5417_v47  ;;  %v7010_v62 = vand.u32 4294901760, %v5355_v22  ;;  %v5481_v47 = vand.u32 4294901760, %v327_v1  ;;  %1792 = vmatpush2.msra.mxu0 %v5158_v25 }
 0x166   : > { %7006 = vst [vmem:[#allocation27_spill] sm:$0xff] %v5460_v17  ;;  %v5470_v0 = vsub.f32 %v5375_v13, %v7008_v39  ;;  %2075 = vmatprep.subr.mxu1 %v2074_v2  ;;  %v7013_v39 = vand.u32 4294901760, %v5308_v8  ;;  %v2122_v2 = vand.u32 4294901760, %v5442_v57  ;;  %v5491_v36 = vsub.f32 %v328_v40, %v5444_v21  ;;  %1794 = vmatprep.subr.mxu0 %v5192_v26  ;;  %v321_v26 = vld [vmem:[#allocation7 + $0x118] sm:$0xff] }
 0x167   : > { %v5479_v5 = vsub.f32 %v5355_v22, %v7010_v62  ;;  %7011 = vst [vmem:[#allocation113_spill] sm:$0xff] %v5481_v47  ;;  %v7014_v13 = vand.u32 4294901760, %v5394_v59  ;;  %v322_v22 = vld [vmem:[#allocation7 + $0x120] sm:$0xff]  ;;  %v5498_v29 = vand.u32 4294901760, %v1718_v4  ;;  %v5504_v8 = vsub.f32 %v5408_v6, %v7016_v23  ;;  %1796 = vmatpush2.msra.mxu0 %v5194_v33  ;;  %v319_v33 = vld [vmem:[#allocation7 + $0x108] sm:$0xff] }
 0x168   : > { %2081 = vmatpush2.msra.mxu1 %v7013_v39  ;;  %v5507_v40 = vand.u32 4294901760, %v324_v48  ;;  %v323_v39 = vld [vmem:[#allocation7 + $0x128] sm:$0xff]  ;;  %v5510_v52 = vsub.f32 %v329_v20, %v5456_v44  ;;  %v5523_v6 = vand.u32 4294901760, %v322_v22  ;;  %1798 = vmatprep.subr.mxu0 %v5230_v9  ;;  %v7023_v9 = vand.u32 4294901760, %v5460_v17 }
 0x169   : > { %v5496_v62 = vsub.f32 %v5394_v59, %v7014_v13  ;;  %7015 = vst [vmem:[#allocation115_spill] sm:$0xff] %v5498_v29  ;;  %2087 = vmatprep.subr.mxu1 %v2086_v51  ;;  %v2134_v13 = vand.u32 4294901760, %v5470_v0  ;;  %v5515_v51 = vsub.f32 %v326_v31, %v5472_v37  ;;  %v5517_v59 = vand.u32 4294901760, %v325_v60  ;;  %1800 = vmatpush2.msra.mxu0 %v5209_v54  ;;  %v318_v54 = vld [vmem:[#allocation7 + $0x100] sm:$0xff] }
 0x16a   : > { %7017 = vst [vmem:[#allocation116_spill] sm:$0xff] %v5507_v40  ;;  %2093 = vmatpush2.msra.mxu1 %v2092_v3  ;;  %v2140_v57 = vand.u32 4294901760, %v5479_v5  ;;  %7019 = vst [vmem:[#allocation118_spill] sm:$0xff] %v5523_v6  ;;  %v5526_v3 = vsub.f32 %v327_v1, %v5481_v47  ;;  %v7020_v31 = vand.u32 4294901760, %v5370_v50  ;;  %v5532_v23 = vand.u32 4294901760, %v323_v39  ;;  %v320_v5 = vld [vmem:[#allocation7 + $0x110] sm:$0xff]  ;;  %1802 = vmatprep.subr.mxu0 %v5271_v16 }
 0x16b   : > { %7018 = vst [vmem:[#allocation117_spill] sm:$0xff] %v5515_v51  ;;  %2099 = vmatprep.subr.mxu1 %v2098_v34  ;;  %v2152_v0 = vand.u32 4294901760, %v5496_v62  ;;  %v5536_v20 = vsub.f32 %v1718_v4, %v5498_v29  ;;  %v2146_v1 = vand.u32 4294901760, %v5504_v8  ;;  %v2157_v50 = vsub.f32 %v5460_v17, %v7023_v9  ;;  %1804 = vmatpush2.msra.mxu0 %v5258_v55 }
 0x16c   : > { %2105 = vmatpush2.msra.mxu1 %v7020_v31  ;;  %7021 = vst [vmem:[#allocation119_spill] sm:$0xff] %v5532_v23  ;;  %v5544_v31 = vsub.f32 %v324_v48, %v5507_v40  ;;  %v7024_v4 = vand.u32 4294901760, %v5428_v45  ;;  %v5555_v9 = vsub.f32 %v325_v60, %v5517_v59  ;;  %v7025_v48 = vand.u32 4294901760, %v5484_v58  ;;  %1806 = vmatprep.subr.mxu0 %v5296_v46 }
 0x16d   : > { %7022 = vst [vmem:[#allocation120_spill] sm:$0xff] %v5536_v20  ;;  %2111 = vmatprep.subr.mxu1 %v2110_v7  ;;  %v5551_v7 = vand.u32 4294901760, %v321_v26  ;;  %v5564_v17 = vand.u32 4294901760, %v320_v5  ;;  %v7026_v60 = vand.u32 4294901760, %v5454_v10  ;;  %1808 = vmatpush2.msra.mxu0 %v5282_v14  ;;  %v7029_v46 = vand.u32 4294901760, %v5526_v3 }
 0x16e   : > { %2117 = vmatpush2.msra.mxu1 %v2116_v32  ;;  %v2163_v34 = vsub.f32 %v5428_v45, %v7024_v4  ;;  %v2169_v62 = vsub.f32 %v5484_v58, %v7025_v48  ;;  %v5562_v32 = vsub.f32 %v322_v22, %v5523_v6  ;;  %v5571_v45 = vand.u32 4294901760, %v319_v33  ;;  %1810 = vmatprep.subr.mxu0 %v5317_v12 }
 0x16f   : > { %2123 = vmatprep.subr.mxu1 %v2122_v2  ;;  %v2175_v8 = vsub.f32 %v5454_v10, %v7026_v60  ;;  %v5575_v48 = vsub.f32 %v323_v39, %v5532_v23  ;;  %v2158_v22 = vand.u32 4294901760, %v2157_v50  ;;  %v7027_v4 = vand.u32 4294901760, %v5510_v52  ;;  %1812 = vmatpush2.msra.mxu0 %v5310_v30 }
 0x170   : > { %2129 = vmatpush2.msra.mxu1 %v2128_v53  ;;  %v5581_v53 = vand.u32 4294901760, %v318_v54  ;;  %v2164_v60 = vand.u32 4294901760, %v2163_v34  ;;  %v7028_v2 = vand.u32 4294901760, %v5491_v36  ;;  %v2170_v50 = vand.u32 4294901760, %v2169_v62  ;;  %1814 = vmatprep.subr.mxu0 %v5362_v18 }
 0x171   : > { %2135 = vmatprep.subr.mxu1 %v2134_v13  ;;  %v2181_v58 = vsub.f32 %v5510_v52, %v7027_v4  ;;  %v5590_v13 = vsub.f32 %v321_v26, %v5551_v7  ;;  %v5594_v4 = vsub.f32 %v320_v5, %v5564_v17  ;;  %v7030_v26 = vand.u32 4294901760, %v5536_v20  ;;  %1816 = vmatpush2.msra.mxu0 %v5345_v19 }
 0x172   : > { %2141 = vmatpush2.msra.mxu1 %v2140_v57  ;;  %v2187_v39 = vsub.f32 %v5491_v36, %v7028_v2  ;;  %v2193_v57 = vsub.f32 %v5526_v3, %v7029_v46  ;;  %v2176_v2 = vand.u32 4294901760, %v2175_v8  ;;  %v5606_v62 = vsub.f32 %v319_v33, %v5571_v45  ;;  %1818 = vmatprep.subr.mxu0 %v5396_v49  ;;  %v7033_v33 = vld [vmem:[#allocation97_spill] sm:$0xff] }
 0x173   : > { %2147 = vmatprep.subr.mxu1 %v2146_v1  ;;  %v1852_v10 = vsub.f32 %v5536_v20, %v7030_v26  ;;  %v2182_v5 = vand.u32 4294901760, %v2181_v58  ;;  %v5610_v46 = vsub.f32 %v318_v54, %v5581_v53  ;;  %v7031_v34 = vand.u32 4294901760, %v5515_v51  ;;  %v7032_v1 = vld [vmem:[#allocation105_spill] sm:$0xff]  ;;  %1820 = vmatpush2.msra.mxu0 %v5386_v35 }
 0x174   : > { %2153 = vmatpush2.msra.mxu1 %v2152_v0  ;;  %v2188_v26 = vand.u32 4294901760, %v2187_v39  ;;  %v5619_v20 = vsub.f32 %v7033_v33, %v7032_v1  ;;  %v7035_v8 = vand.u32 4294901760, %v5544_v31  ;;  %1822 = vmatprep.subr.mxu0 %v5403_v56  ;;  %v7036_v33 = vand.u32 4294901760, %v5575_v48 }
 0x175   : > { %2159 = vmatprep.subr.mxu1 %v2158_v22  ;;  %v2199_v0 = vsub.f32 %v5515_v51, %v7031_v34  ;;  %v7034_v22 = vand.u32 4294901760, %v5555_v9  ;;  %v2194_v34 = vand.u32 4294901760, %v2193_v57  ;;  %v1853_v39 = vand.u32 4294901760, %v1852_v10  ;;  %1824 = vmatpush2.msra.mxu0 %v5405_v28 }
 0x176   : > { %2165 = vmatpush2.msra.mxu1 %v2164_v60  ;;  %v2211_v51 = vsub.f32 %v5544_v31, %v7035_v8  ;;  %v7037_v57 = vand.u32 4294901760, %v5562_v32  ;;  %1826 = vmatprep.subr.mxu0 %v5456_v44  ;;  %v7041_v10 = vand.u32 4294901760, %v5610_v46 }
 0x177   : > { %v2205_v58 = vsub.f32 %v5555_v9, %v7034_v22  ;;  %2171 = vmatprep.subr.mxu1 %v2170_v50  ;;  %v2217_v22 = vsub.f32 %v5575_v48, %v7036_v33  ;;  %v2200_v50 = vand.u32 4294901760, %v2199_v0  ;;  %v7038_v33 = vand.u32 4294901760, %v5590_v13  ;;  %1828 = vmatpush2.msra.mxu0 %v5444_v21 }
 0x178   : > { %2177 = vmatpush2.msra.mxu1 %v2176_v2  ;;  %v2223_v8 = vsub.f32 %v5562_v32, %v7037_v57  ;;  %v7039_v0 = vand.u32 4294901760, %v5594_v4  ;;  %1830 = vmatprep.subr.mxu0 %v5481_v47 }
 0x179   : > { %2183 = vmatprep.subr.mxu1 %v2182_v5  ;;  %v2206_v2 = vand.u32 4294901760, %v2205_v58  ;;  %v2229_v54 = vsub.f32 %v5590_v13, %v7038_v33  ;;  %v2212_v5 = vand.u32 4294901760, %v2211_v51  ;;  %1854 = vmatprep.mubr.f32.mxu0 %v1853_v39  ;;  %v2218_v60 = vand.u32 4294901760, %v2217_v22 }
 0x17a   : > { %2189 = vmatpush2.msra.mxu1 %v2188_v26  ;;  %v2235_v57 = vsub.f32 %v5594_v4, %v7039_v0  ;;  %v7040_v26 = vand.u32 4294901760, %v5606_v62  ;;  %1832 = vmatpush2.msra.mxu0 %v5472_v37  ;;  %v2224_v33 = vand.u32 4294901760, %v2223_v8  ;;  %v2247_v51 = vsub.f32 %v5610_v46, %v7041_v10 }
 0x17b   : > { %2195 = vmatprep.subr.mxu1 %v2194_v34  ;;  %1834 = vmatprep.subr.mxu0 %v5517_v59  ;;  %v7042_v34 = vand.u32 4294901760, %v5619_v20  ;;  %v2230_v39 = vand.u32 4294901760, %v2229_v54  ;;  %v7043_v54 = vld [vmem:[#allocation20_spill] sm:$0xff] }
 0x17c   : > { %v2241_v58 = vsub.f32 %v5606_v62, %v7040_v26  ;;  %2201 = vmatpush2.msra.mxu1 %v2200_v50  ;;  %1836 = vmatpush2.msra.mxu0 %v5507_v40  ;;  %v2236_v22 = vand.u32 4294901760, %v2235_v57  ;;  %v2248_v8 = vand.u32 4294901760, %v2247_v51  ;;  %v7047_v57 = vld [vmem:[#allocation91_spill] sm:$0xff]  ;;  %v7048_v26 = vld [vmem:[#allocation85_spill] sm:$0xff]  ;;  %v7051_v51 = vld [vmem:[#allocation18_spill] sm:$0xff] }
 0x17d   : > { %v1858_v0 = vsub.f32 %v5619_v20, %v7042_v34  ;;  %2207 = vmatprep.subr.mxu1 %v2206_v2  ;;  %1838 = vmatprep.subr.mxu0 %v5532_v23  ;;  %v7045_v2 = vld [vmem:[#allocation25_spill] sm:$0xff]  ;;  %v7052_v34 = vld [vmem:[#allocation98_spill] sm:$0xff] }
 0x17e   : > { %2213 = vmatpush2.msra.mxu1 %v2212_v5  ;;  %v2242_v50 = vand.u32 4294901760, %v2241_v58  ;;  %1840 = vmatpush2.msra.mxu0 %v5523_v6  ;;  %v7046_v5 = vld [vmem:[#allocation29_spill] sm:$0xff]  ;;  %v7049_v58 = vld [vmem:[#allocation19_spill] sm:$0xff] }
 0x17f   : > { %2219 = vmatprep.subr.mxu1 %v2218_v60  ;;  %1842 = vmatprep.subr.mxu0 %v5551_v7  ;;  %v1859_v10 = vand.u32 4294901760, %v1858_v0  ;;  %v7044_v60 = vld [vmem:[#allocation21_spill] sm:$0xff]  ;;  %v7053_v0 = vld [vmem:[#allocation23_spill] sm:$0xff] }
 0x180   : > { %2225 = vmatpush2.msra.mxu1 %v2224_v33  ;;  %1844 = vmatpush2.msra.mxu0 %v5564_v17  ;;  %v7050_v33 = vld [vmem:[#allocation102_spill] sm:$0xff] }
 0x181   : > { %2231 = vmatprep.subr.mxu1 %v2230_v39  ;;  %1846 = vmatprep.subr.mxu0 %v5571_v45  ;;  %v7054_v39 = vld [vmem:[#allocation104_spill] sm:$0xff] }
 0x182   : > { %2237 = vmatpush2.msra.mxu1 %v2236_v22  ;;  %1848 = vmatpush2.msra.mxu0 %v5581_v53  ;;  %v7055_v22 = vld [vmem:[#allocation22_spill] sm:$0xff] }
 0x183   : > { %2243 = vmatprep.subr.mxu1 %v2242_v50  ;;  %1860 = vmatmul.mubr.f32.vlgmr.msra.gmra.mxu0 %v1859_v10  ;;  %v7056_v50 = vld [vmem:[#allocation103_spill] sm:$0xff]  ;;  %v7058_v10 = vld [vmem:[#allocation33_spill] sm:$0xff] }
 0x184   : > { %2249 = vmatpush2.msra.mxu1 %v2248_v8  ;;  %2261 = vmatprep.subr.mxu0 %v7043_v54  ;;  %v7057_v8 = vld [vmem:[#allocation89_spill] sm:$0xff] }
 0x185   : > { %2264 = vmatpush1.msra.mxu0 %v7044_v60  ;;  %2251 = vmatprep.mubr.f32.mxu1 %v5498_v29  ;;  %v7060_v29 = vld [vmem:[#allocation26_spill] sm:$0xff] }
 0x186   : > { %2267 = vmatprep.subr.mxu0 %v7045_v2  ;;  %2253 = vmatmul.mubr.f32.vlgmr.msra.gmra.mxu1 %v7032_v1  ;;  %v7059_v1 = vld [vmem:[#allocation31_spill] sm:$0xff] }
 0x187   : > { %2270 = vmatpush1.msra.mxu0 %v7046_v5  ;;  %2463 = vmatprep.subr.mxu1 %v4683_v27 }
 0x188   : > { %2273 = vmatprep.subr.mxu0 %v7047_v57  ;;  %2465 = vmatpush1.msra.mxu1 %v4685_v43  ;;  %v7063_v43 = vld [vmem:[#allocation95_spill] sm:$0xff] }
 0x189   : > { %2276 = vmatpush1.msra.mxu0 %v7048_v26  ;;  %2467 = vmatprep.subr.mxu1 %v7049_v58  ;;  %v7061_v58 = vld [vmem:[#allocation93_spill] sm:$0xff] }
 0x18a   : > { %2279 = vmatprep.subr.mxu0 %v7050_v33  ;;  %2469 = vmatpush1.msra.mxu1 %v7051_v51  ;;  %v7062_v51 = vld [vmem:[#allocation30_spill] sm:$0xff] }
 0x18b   : > { %2282 = vmatpush1.msra.mxu0 %v7052_v34  ;;  %2471 = vmatprep.subr.mxu1 %v7053_v0  ;;  %v7064_v0 = vld [vmem:[#allocation28_spill] sm:$0xff] }
 0x18c   : > { %2285 = vmatprep.subr.mxu0 %v7054_v39  ;;  %2473 = vmatpush1.msra.mxu1 %v7055_v22  ;;  %v7065_v39 = vld [vmem:[#allocation99_spill] sm:$0xff]  ;;  %v7066_v22 = vld [vmem:[#allocation34_spill] sm:$0xff] }
 0x18d   : > { %2288 = vmatpush1.msra.mxu0 %v7056_v50  ;;  %2475 = vmatprep.subr.mxu1 %v7057_v8  ;;  %v7067_v50 = vld [vmem:[#allocation101_spill] sm:$0xff]  ;;  %v7068_v8 = vld [vmem:[#allocation43_spill] sm:$0xff] }
 0x18e   : > { %2291 = vmatprep.subr.mxu0 %v7058_v10  ;;  %2477 = vmatpush1.msra.mxu1 %v7059_v1  ;;  %v7069_v10 = vld [vmem:[#allocation16_spill] sm:$0xff]  ;;  %v7070_v1 = vld [vmem:[#allocation38_spill] sm:$0xff] }
 0x18f   : > { %2294 = vmatpush1.msra.mxu0 %v7060_v29  ;;  %2479 = vmatprep.subr.mxu1 %v7061_v58  ;;  %v7071_v58 = vld [vmem:[#allocation45_spill] sm:$0xff] }
 0x190   : > { %2297 = vmatprep.subr.mxu0 %v7062_v51  ;;  %2481 = vmatpush1.msra.mxu1 %v7063_v43  ;;  %v7072_v43 = vld [vmem:[#allocation42_spill] sm:$0xff] }
 0x191   : > { %2300 = vmatpush1.msra.mxu0 %v7064_v0  ;;  %2483 = vmatprep.subr.mxu1 %v7065_v39  ;;  %v7073_v0 = vld [vmem:[#allocation37_spill] sm:$0xff] }
 0x192   : > { %2303 = vmatprep.subr.mxu0 %v7066_v22  ;;  %2485 = vmatpush1.msra.mxu1 %v7067_v50  ;;  %v7074_v39 = vld [vmem:[#allocation49_spill] sm:$0xff]  ;;  %v7075_v22 = vld [vmem:[#allocation39_spill] sm:$0xff]  ;;  %v7076_v50 = vld [vmem:[#allocation46_spill] sm:$0xff] }
 0x193   : > { %2306 = vmatpush1.msra.mxu0 %v7068_v8  ;;  %2487 = vmatprep.subr.mxu1 %v7069_v10  ;;  %v7077_v10 = vld [vmem:[#allocation44_spill] sm:$0xff] }
 0x194   : > { %2309 = vmatprep.subr.mxu0 %v7070_v1  ;;  %2489 = vmatpush1.msra.mxu1 %v6949_v41  ;;  %v7078_v1 = vld [vmem:[#allocation36_spill] sm:$0xff] }
 0x195   : > { %2312 = vmatpush1.msra.mxu0 %v7071_v58  ;;  %2491 = vmatprep.subr.mxu1 %v4852_v11  ;;  %v7079_v41 = vld [vmem:[#allocation52_spill] sm:$0xff]  ;;  %v7080_v58 = vld [vmem:[#allocation41_spill] sm:$0xff] }
 0x196   : > { %2315 = vmatprep.subr.mxu0 %v7072_v43  ;;  %2493 = vmatpush1.msra.mxu1 %v7073_v0  ;;  %v7081_v11 = vld [vmem:[#allocation57_spill] sm:$0xff]  ;;  %v7082_v0 = vld [vmem:[#allocation54_spill] sm:$0xff] }
 0x197   : > { %2318 = vmatpush1.msra.mxu0 %v7074_v39  ;;  %2495 = vmatprep.subr.mxu1 %v7075_v22  ;;  %v7083_v39 = vld [vmem:[#allocation40_spill] sm:$0xff]  ;;  %v7084_v22 = vld [vmem:[#allocation61_spill] sm:$0xff] }
 0x198   : > { %2321 = vmatprep.subr.mxu0 %v7076_v50  ;;  %2497 = vmatpush1.msra.mxu1 %v4878_v24  ;;  %v7085_v24 = vld [vmem:[#allocation60_spill] sm:$0xff] }
 0x199   : > { %2324 = vmatpush1.msra.mxu0 %v7077_v10  ;;  %2499 = vmatprep.subr.mxu1 %v7078_v1  ;;  %v7086_v10 = vld [vmem:[#allocation51_spill] sm:$0xff]  ;;  %v7087_v1 = vld [vmem:[#allocation65_spill] sm:$0xff] }
 0x19a   : > { %2327 = vmatprep.subr.mxu0 %v7079_v41  ;;  %2501 = vmatpush1.msra.mxu1 %v7080_v58  ;;  %v7088_v41 = vld [vmem:[#allocation55_spill] sm:$0xff]  ;;  %v7089_v58 = vld [vmem:[#allocation62_spill] sm:$0xff] }
 0x19b   : > { %2330 = vmatpush1.msra.mxu0 %v7081_v11  ;;  %2503 = vmatprep.subr.mxu1 %v4944_v42  ;;  %v7090_v42 = vld [vmem:[#allocation69_spill] sm:$0xff] }
 0x19c   : > { %2333 = vmatprep.subr.mxu0 %v7082_v0  ;;  %2505 = vmatpush1.msra.mxu1 %v7083_v39  ;;  %v7091_v0 = vld [vmem:[#allocation59_spill] sm:$0xff]  ;;  %v7092_v39 = vld [vmem:[#allocation68_spill] sm:$0xff] }
 0x19d   : > { %2336 = vmatpush1.msra.mxu0 %v7084_v22  ;;  %2507 = vmatprep.subr.mxu1 %v4989_v38  ;;  %v7093_v22 = vld [vmem:[#allocation50_spill] sm:$0xff]  ;;  %v7094_v38 = vld [vmem:[#allocation73_spill] sm:$0xff] }
 0x19e   : > { %2339 = vmatprep.subr.mxu0 %v7085_v24  ;;  %2509 = vmatpush1.msra.mxu1 %v7086_v10  ;;  %v7095_v24 = vld [vmem:[#allocation63_spill] sm:$0xff]  ;;  %v7096_v10 = vld [vmem:[#allocation70_spill] sm:$0xff] }
 0x19f   : > { %2342 = vmatpush1.msra.mxu0 %v7087_v1  ;;  %2511 = vmatprep.subr.mxu1 %v7088_v41  ;;  %v7097_v1 = vld [vmem:[#allocation56_spill] sm:$0xff]  ;;  %v7098_v41 = vld [vmem:[#allocation77_spill] sm:$0xff] }
 0x1a0   : > { %2345 = vmatprep.subr.mxu0 %v7089_v58  ;;  %2513 = vmatpush1.msra.mxu1 %v5004_v15  ;;  %v7099_v58 = vld [vmem:[#allocation67_spill] sm:$0xff]  ;;  %v7100_v15 = vld [vmem:[#allocation76_spill] sm:$0xff] }
 0x1a1   : > { %2348 = vmatpush1.msra.mxu0 %v7090_v42  ;;  %2515 = vmatprep.subr.mxu1 %v7091_v0  ;;  %v7101_v0 = vld [vmem:[#allocation81_spill] sm:$0xff] }
 0x1a2   : > { %2351 = vmatprep.subr.mxu0 %v7092_v39  ;;  %2517 = vmatpush1.msra.mxu1 %v7093_v22  ;;  %v7102_v22 = vld [vmem:[#allocation87_spill] sm:$0xff] }
 0x1a3   : > { %2354 = vmatpush1.msra.mxu0 %v7094_v38  ;;  %2519 = vmatprep.subr.mxu1 %v7095_v24  ;;  %v7103_v38 = vld [vmem:[#allocation64_spill] sm:$0xff]  ;;  %v7104_v24 = vld [vmem:[#allocation78_spill] sm:$0xff] }
 0x1a4   : > { %2357 = vmatprep.subr.mxu0 %v7096_v10  ;;  %2521 = vmatpush1.msra.mxu1 %v7097_v1  ;;  %v7105_v10 = vld [vmem:[#allocation66_spill] sm:$0xff] }
 0x1a5   : > { %2360 = vmatpush2.msra.mxu0 %v7098_v41  ;;  %2523 = vmatprep.subr.mxu1 %v7099_v58  ;;  %v7106_v1 = vld [vmem:[#allocation86_spill] sm:$0xff]  ;;  %v7107_v58 = vld [vmem:[#allocation80_spill] sm:$0xff] }
 0x1a6   : > { %2363 = vmatprep.subr.mxu0 %v7100_v15  ;;  %2525 = vmatpush1.msra.mxu1 %v5098_v63  ;;  %v7108_v15 = vld [vmem:[#allocation79_spill] sm:$0xff]  ;;  %v7109_v63 = vld [vmem:[#allocation92_spill] sm:$0xff] }
 0x1a7   : > { %2366 = vmatpush2.msra.mxu0 %v7101_v0  ;;  %2527 = vmatprep.subr.mxu1 %v5129_v61  ;;  %v7110_v0 = vld [vmem:[#allocation72_spill] sm:$0xff]  ;;  %v7111_v61 = vld [vmem:[#allocation90_spill] sm:$0xff] }
 0x1a8   : > { %2369 = vmatprep.subr.mxu0 %v7102_v22  ;;  %2529 = vmatpush2.msra.mxu1 %v7103_v38  ;;  %v7112_v22 = vld [vmem:[#allocation83_spill] sm:$0xff]  ;;  %v7113_v38 = vld [vmem:[#allocation94_spill] sm:$0xff] }
 0x1a9   : > { %2372 = vmatpush2.msra.mxu0 %v7104_v24  ;;  %2531 = vmatprep.subr.mxu1 %v7105_v10  ;;  %v7114_v24 = vld [vmem:[#allocation74_spill] sm:$0xff] }
 0x1aa   : > { %2375 = vmatprep.subr.mxu0 %v7106_v1  ;;  %2533 = vmatpush2.msra.mxu1 %v5158_v25  ;;  %v7115_v10 = vld [vmem:[#allocation106_spill] sm:$0xff]  ;;  %v7116_v25 = vld [vmem:[#allocation107_spill] sm:$0xff] }
 0x1ab   : > { %2378 = vmatpush2.msra.mxu0 %v7107_v58  ;;  %2535 = vmatprep.subr.mxu1 %v7108_v15  ;;  %v7117_v15 = vld [vmem:[#allocation96_spill] sm:$0xff] }
 0x1ac   : > { %2381 = vmatprep.subr.mxu0 %v7109_v63  ;;  %2537 = vmatpush2.msra.mxu1 %v7110_v0  ;;  %v7118_v63 = vld [vmem:[#allocation88_spill] sm:$0xff]  ;;  %v7119_v0 = vld [vmem:[#allocation110_spill] sm:$0xff] }
 0x1ad   : > { %2384 = vmatpush2.msra.mxu0 %v7111_v61  ;;  %2539 = vmatprep.subr.mxu1 %v7112_v22  ;;  %v7120_v22 = vld [vmem:[#allocation109_spill] sm:$0xff] }
 0x1ae   : > { %2387 = vmatprep.subr.mxu0 %v7113_v38  ;;  %2541 = vmatpush2.msra.mxu1 %v7114_v24  ;;  %v7121_v24 = vld [vmem:[#allocation27_spill] sm:$0xff] }
 0x1af   : > { %2390 = vmatpush2.msra.mxu0 %v7115_v10  ;;  %2543 = vmatprep.subr.mxu1 %v5271_v16  ;;  %v7122_v16 = vld [vmem:[#allocation111_spill] sm:$0xff] }
 0x1b0   : > { %2393 = vmatprep.subr.mxu0 %v7116_v25  ;;  %2545 = vmatpush2.msra.mxu1 %v5258_v55  ;;  %v7123_v55 = vld [vmem:[#allocation114_spill] sm:$0xff] }
 0x1b1   : > { %2396 = vmatpush2.msra.mxu0 %v7117_v15  ;;  %2547 = vmatprep.subr.mxu1 %v7118_v63  ;;  %v7124_v63 = vld [vmem:[#allocation14_spill] sm:$0xff] }
 0x1b2   : > { %2399 = vmatprep.subr.mxu0 %v7119_v0  ;;  %2549 = vmatpush2.msra.mxu1 %v5282_v14 }
 0x1b3   : > { %2402 = vmatpush2.msra.mxu0 %v7120_v22  ;;  %2551 = vmatprep.subr.mxu1 %v5317_v12 }
 0x1b4   : > { %2405 = vmatprep.subr.mxu0 %v7121_v24  ;;  %2553 = vmatpush2.msra.mxu1 %v5310_v30 }
 0x1b5   : > { %2408 = vmatpush2.msra.mxu0 %v7122_v16  ;;  %2555 = vmatprep.subr.mxu1 %v5362_v18  ;;  %v7125_v18 = vld [vmem:[#allocation117_spill] sm:$0xff] }
 0x1b6   : > { %2411 = vmatprep.subr.mxu0 %v7123_v55  ;;  %2557 = vmatpush2.msra.mxu1 %v5345_v19 }
 0x1b7   : > { %2414 = vmatpush2.msra.mxu0 %v7124_v63  ;;  %2559 = vmatprep.subr.mxu1 %v5396_v49 }
 0x1b8   : > { %2417 = vmatprep.subr.mxu0 %v5510_v52  ;;  %2561 = vmatpush2.msra.mxu1 %v5386_v35  ;;  %v7126_v35 = vld [vmem:[#allocation120_spill] sm:$0xff] }
 0x1b9   : > { %2420 = vmatpush2.msra.mxu0 %v5491_v36  ;;  %2563 = vmatprep.subr.mxu1 %v5403_v56 }
 0x1ba   : > { %2423 = vmatprep.subr.mxu0 %v5526_v3  ;;  %2565 = vmatpush2.msra.mxu1 %v5405_v28 }
 0x1bb   : > { %2426 = vmatpush2.msra.mxu0 %v7125_v18  ;;  %2567 = vmatprep.subr.mxu1 %v5456_v44 }
 0x1bc   : > { %2429 = vmatprep.subr.mxu0 %v5555_v9  ;;  %2569 = vmatpush2.msra.mxu1 %v5444_v21 }
 0x1bd   : > { %2432 = vmatpush2.msra.mxu0 %v5544_v31  ;;  %2571 = vmatprep.subr.mxu1 %v5481_v47  ;;  %v7128_v47 = vand.u32 4294901760, %v7044_v60 }
 0x1be   : > { %2435 = vmatprep.subr.mxu0 %v5575_v48  ;;  %2453 = vmatprep.mubr.f32.mxu0 %v7126_v35 }
 0x1bf   : > { %2438 = vmatpush2.msra.mxu0 %v5562_v32  ;;  %2573 = vmatpush2.msra.mxu1 %v5472_v37  ;;  %v7127_v37 = vand.u32 4294901760, %v7043_v54  ;;  %v7135_v54 = vand.u32 4294901760, %v5619_v20 }
 0x1c0   : > { %2441 = vmatprep.subr.mxu0 %v5590_v13  ;;  %2575 = vmatprep.subr.mxu1 %v5517_v59 }
 0x1c1   : > { %2444 = vmatpush2.msra.mxu0 %v5594_v4  ;;  %2577 = vmatpush2.msra.mxu1 %v5507_v40  ;;  %v7129_v40 = vand.u32 4294901760, %v7045_v2  ;;  %v7139_v2 = vld [vmem:[#allocation17_spill] sm:$0xff] }
 0x1c2   : > { %2447 = vmatprep.subr.mxu0 %v5606_v62  ;;  %2579 = vmatprep.subr.mxu1 %v5532_v23  ;;  %v7130_v23 = vand.u32 4294901760, %v7046_v5  ;;  %v7140_v5 = vld [vmem:[#allocation103_spill] sm:$0xff] }
 0x1c3   : > { %2450 = vmatpush2.msra.mxu0 %v5610_v46  ;;  %2581 = vmatpush2.msra.mxu1 %v5523_v6  ;;  %v7131_v6 = vand.u32 4294901760, %v7047_v57  ;;  %v7141_v57 = vand.u32 4294901760, %v7140_v5  ;;  %v7157_v5 = vld [vmem:[#allocation93_spill] sm:$0xff] }
 0x1c4   : > { %2456 = vmatmul.mubr.f32.vlgmr.msra.gmra.mxu0 %v5619_v20  ;;  %2606 = vmatprep.subr.mxu0 %v7127_v37  ;;  %v7132_v37 = vand.u32 4294901760, %v7048_v26  ;;  %v7143_v26 = vld [vmem:[#allocation33_spill] sm:$0xff]  ;;  %v7145_v20 = vld [vmem:[#allocation18_spill] sm:$0xff] }
 0x1c5   : > { %2610 = vmatpush1.msra.mxu0 %v7128_v47  ;;  %2583 = vmatprep.subr.mxu1 %v5551_v7  ;;  %v7133_v47 = vand.u32 4294901760, %v7126_v35  ;;  %v7142_v35 = vld [vmem:[#allocation19_spill] sm:$0xff] }
 0x1c6   : > { %2614 = vmatprep.subr.mxu0 %v7129_v40  ;;  %2585 = vmatpush2.msra.mxu1 %v5564_v17  ;;  %v7134_v40 = vand.u32 4294901760, %v7050_v33  ;;  %v7144_v33 = vand.u32 4294901760, %v7143_v26  ;;  %v7161_v26 = vld [vmem:[#allocation45_spill] sm:$0xff] }
 0x1c7   : > { %2618 = vmatpush1.msra.mxu0 %v7130_v23  ;;  %2587 = vmatprep.subr.mxu1 %v5571_v45  ;;  %v7136_v23 = vand.u32 4294901760, %v7052_v34  ;;  %v7146_v34 = vand.u32 4294901760, %v7060_v29  ;;  %v7156_v29 = vand.u32 4294901760, %v7068_v8 }
 0x1c8   : > { %2622 = vmatprep.subr.mxu0 %v7131_v6  ;;  %2589 = vmatpush2.msra.mxu1 %v5581_v53  ;;  %v7137_v6 = vld [vmem:[#allocation104_spill] sm:$0xff] }
 0x1c9   : > { %2626 = vmatpush1.msra.mxu0 %v7132_v37  ;;  %2593 = vmatprep.mubr.f32.mxu1 %v7133_v47  ;;  %v7138_v60 = vand.u32 4294901760, %v7137_v6  ;;  %v7147_v37 = vld [vmem:[#allocation23_spill] sm:$0xff]  ;;  %v7149_v47 = vld [vmem:[#allocation22_spill] sm:$0xff] }
 0x1ca   : > { %2630 = vmatprep.subr.mxu0 %v7134_v40  ;;  %2597 = vmatmul.mubr.f32.vlgmr.msra.gmra.mxu1 %v7135_v54  ;;  %v7150_v40 = vld [vmem:[#allocation28_spill] sm:$0xff]  ;;  %v7153_v6 = vld [vmem:[#allocation34_spill] sm:$0xff] }
 0x1cb   : > { %2634 = vmatpush1.msra.mxu0 %v7136_v23  ;;  %2869 = vmatprep.subr.mxu1 %v4683_v27  ;;  %v7148_v27 = vand.u32 4294901760, %v7062_v51  ;;  %v7151_v54 = vand.u32 4294901760, %v7150_v40  ;;  %v7152_v23 = vld [vmem:[#allocation89_spill] sm:$0xff]  ;;  %v7169_v40 = vand.u32 4294901760, %v7076_v50 }
 0x1cc   : > { %2638 = vmatprep.subr.mxu0 %v7138_v60  ;;  %2871 = vmatpush1.msra.mxu1 %v7139_v2  ;;  %v7154_v60 = vand.u32 4294901760, %v7153_v6  ;;  %v7155_v2 = vld [vmem:[#allocation31_spill] sm:$0xff] }
 0x1cd   : > { %2642 = vmatpush1.msra.mxu0 %v7141_v57  ;;  %2873 = vmatprep.subr.mxu1 %v7142_v35  ;;  %v7158_v57 = vld [vmem:[#allocation38_spill] sm:$0xff]  ;;  %v7160_v35 = vld [vmem:[#allocation95_spill] sm:$0xff] }
 0x1ce   : > { %2646 = vmatprep.subr.mxu0 %v7144_v33  ;;  %2875 = vmatpush1.msra.mxu1 %v7145_v20  ;;  %v7159_v51 = vand.u32 4294901760, %v7158_v57  ;;  %v7162_v33 = vand.u32 4294901760, %v7161_v26  ;;  %v7163_v20 = vld [vmem:[#allocation99_spill] sm:$0xff]  ;;  %v7182_v26 = vld [vmem:[#allocation61_spill] sm:$0xff] }
 0x1cf   : > { %2650 = vmatpush1.msra.mxu0 %v7146_v34  ;;  %2877 = vmatprep.subr.mxu1 %v7147_v37  ;;  %v7164_v34 = vand.u32 4294901760, %v7072_v43  ;;  %v7165_v37 = vld [vmem:[#allocation101_spill] sm:$0xff]  ;;  %v7178_v57 = vld [vmem:[#allocation39_spill] sm:$0xff] }
 0x1d0   : > { %2654 = vmatprep.subr.mxu0 %v7148_v27  ;;  %2879 = vmatpush1.msra.mxu1 %v7149_v47  ;;  %v7166_v27 = vld [vmem:[#allocation49_spill] sm:$0xff]  ;;  %v7168_v47 = vld [vmem:[#allocation16_spill] sm:$0xff] }
 0x1d1   : > { %2658 = vmatpush1.msra.mxu0 %v7151_v54  ;;  %2881 = vmatprep.subr.mxu1 %v7152_v23  ;;  %v7167_v8 = vand.u32 4294901760, %v7166_v27  ;;  %v7170_v54 = vld [vmem:[#allocation24_spill] sm:$0xff]  ;;  %v7187_v27 = vld [vmem:[#allocation41_spill] sm:$0xff] }
 0x1d2   : > { %2662 = vmatprep.subr.mxu0 %v7154_v60  ;;  %2883 = vmatpush1.msra.mxu1 %v7155_v2  ;;  %v7171_v23 = vld [vmem:[#allocation44_spill] sm:$0xff]  ;;  %v7173_v60 = vld [vmem:[#allocation35_spill] sm:$0xff] }
 0x1d3   : > { %2666 = vmatpush1.msra.mxu0 %v7156_v29  ;;  %2885 = vmatprep.subr.mxu1 %v7157_v5  ;;  %v7172_v6 = vand.u32 4294901760, %v7171_v23  ;;  %v7174_v2 = vld [vmem:[#allocation52_spill] sm:$0xff]  ;;  %v7176_v29 = vld [vmem:[#allocation37_spill] sm:$0xff]  ;;  %v7177_v5 = vand.u32 4294901760, %v7081_v11 }
 0x1d4   : > { %2670 = vmatprep.subr.mxu0 %v7159_v51  ;;  %2887 = vmatpush1.msra.mxu1 %v7160_v35  ;;  %v7175_v43 = vand.u32 4294901760, %v7174_v2  ;;  %v7179_v51 = vld [vmem:[#allocation54_spill] sm:$0xff]  ;;  %v7181_v35 = vld [vmem:[#allocation32_spill] sm:$0xff]  ;;  %v7196_v2 = vand.u32 4294901760, %v7092_v39 }
 0x1d5   : > { %2674 = vmatpush1.msra.mxu0 %v7162_v33  ;;  %2889 = vmatprep.subr.mxu1 %v7163_v20  ;;  %v7180_v50 = vand.u32 4294901760, %v7179_v51  ;;  %v7183_v33 = vand.u32 4294901760, %v7182_v26  ;;  %v7184_v20 = vld [vmem:[#allocation36_spill] sm:$0xff]  ;;  %v7201_v51 = vld [vmem:[#allocation70_spill] sm:$0xff]  ;;  %v7205_v26 = vld [vmem:[#allocation59_spill] sm:$0xff] }
 0x1d6   : > { %2678 = vmatprep.subr.mxu0 %v7164_v34  ;;  %2891 = vmatpush1.msra.mxu1 %v7165_v37  ;;  %v7185_v34 = vld [vmem:[#allocation60_spill] sm:$0xff] }
 0x1d7   : > { %2682 = vmatpush1.msra.mxu0 %v7167_v8  ;;  %2893 = vmatprep.subr.mxu1 %v7168_v47  ;;  %v7186_v37 = vand.u32 4294901760, %v7185_v34  ;;  %v7188_v8 = vld [vmem:[#allocation65_spill] sm:$0xff]  ;;  %v7190_v47 = vld [vmem:[#allocation47_spill] sm:$0xff]  ;;  %v7193_v23 = vld [vmem:[#allocation40_spill] sm:$0xff] }
 0x1d8   : > { %2686 = vmatprep.subr.mxu0 %v7169_v40  ;;  %2895 = vmatpush1.msra.mxu1 %v7170_v54  ;;  %v7189_v11 = vand.u32 4294901760, %v7188_v8  ;;  %v7191_v40 = vld [vmem:[#allocation62_spill] sm:$0xff]  ;;  %v7209_v34 = vld [vmem:[#allocation81_spill] sm:$0xff]  ;;  %v7212_v8 = vld [vmem:[#allocation87_spill] sm:$0xff] }
 0x1d9   : > { %2690 = vmatpush1.msra.mxu0 %v7172_v6  ;;  %2897 = vmatprep.subr.mxu1 %v7173_v60  ;;  %v7192_v54 = vand.u32 4294901760, %v7191_v40  ;;  %v7194_v6 = vand.u32 4294901760, %v7090_v42  ;;  %v7195_v60 = vld [vmem:[#allocation53_spill] sm:$0xff]  ;;  %v7204_v42 = vand.u32 4294901760, %v7098_v41  ;;  %v7215_v40 = vld [vmem:[#allocation78_spill] sm:$0xff] }
 0x1da   : > { %2694 = vmatprep.subr.mxu0 %v7175_v43  ;;  %2899 = vmatpush1.msra.mxu1 %v7176_v29  ;;  %v7197_v43 = vld [vmem:[#allocation51_spill] sm:$0xff]  ;;  %v7198_v29 = vld [vmem:[#allocation73_spill] sm:$0xff]  ;;  %v7216_v41 = vand.u32 4294901760, %v7215_v40 }
 0x1db   : > { %2698 = vmatpush1.msra.mxu0 %v7177_v5  ;;  %2901 = vmatprep.subr.mxu1 %v7178_v57  ;;  %v7199_v5 = vand.u32 4294901760, %v7198_v29  ;;  %v7200_v57 = vld [vmem:[#allocation55_spill] sm:$0xff] }
 0x1dc   : > { %2702 = vmatprep.subr.mxu0 %v7180_v50  ;;  %2903 = vmatpush1.msra.mxu1 %v7181_v35  ;;  %v7202_v50 = vand.u32 4294901760, %v7201_v51  ;;  %v7203_v35 = vld [vmem:[#allocation48_spill] sm:$0xff]  ;;  %v7226_v51 = vld [vmem:[#allocation66_spill] sm:$0xff] }
 0x1dd   : > { %2706 = vmatpush1.msra.mxu0 %v7183_v33  ;;  %2905 = vmatprep.subr.mxu1 %v7184_v20  ;;  %v7206_v33 = vld [vmem:[#allocation76_spill] sm:$0xff]  ;;  %v7208_v20 = vld [vmem:[#allocation50_spill] sm:$0xff] }
 0x1de   : > { %2710 = vmatprep.subr.mxu0 %v7186_v37  ;;  %2907 = vmatpush1.msra.mxu1 %v7187_v27  ;;  %v7207_v39 = vand.u32 4294901760, %v7206_v33  ;;  %v7210_v37 = vand.u32 4294901760, %v7209_v34  ;;  %v7211_v27 = vld [vmem:[#allocation63_spill] sm:$0xff]  ;;  %v7240_v34 = vld [vmem:[#allocation82_spill] sm:$0xff] }
 0x1df   : > { %2714 = vmatpush1.msra.mxu0 %v7189_v11  ;;  %2909 = vmatprep.subr.mxu1 %v7190_v47  ;;  %v7213_v11 = vand.u32 4294901760, %v7212_v8  ;;  %v7214_v47 = vld [vmem:[#allocation56_spill] sm:$0xff]  ;;  %v7234_v33 = vld [vmem:[#allocation83_spill] sm:$0xff] }
 0x1e0   : > { %2718 = vmatprep.subr.mxu0 %v7192_v54  ;;  %2911 = vmatpush1.msra.mxu1 %v7193_v23  ;;  %v7217_v54 = vld [vmem:[#allocation67_spill] sm:$0xff]  ;;  %v7218_v23 = vand.u32 4294901760, %v7106_v1  ;;  %v7227_v1 = vand.u32 4294901760, %v7113_v38  ;;  %v7235_v38 = vand.u32 4294901760, %v7119_v0  ;;  %v7243_v0 = vand.u32 4294901760, %v7123_v55 }
 0x1e1   : > { %2722 = vmatpush1.msra.mxu0 %v7194_v6  ;;  %2913 = vmatprep.subr.mxu1 %v7195_v60  ;;  %v7219_v6 = vld [vmem:[#allocation58_spill] sm:$0xff]  ;;  %v7220_v60 = vand.u32 4294901760, %v7107_v58  ;;  %v7229_v58 = vand.u32 4294901760, %v7115_v10  ;;  %v7237_v10 = vand.u32 4294901760, %v7120_v22  ;;  %v7244_v22 = vand.u32 4294901760, %v7124_v63 }
 0x1e2   : > { %2726 = vmatprep.subr.mxu0 %v7196_v2  ;;  %2915 = vmatpush1.msra.mxu1 %v7197_v43  ;;  %v7221_v2 = vld [vmem:[#allocation71_spill] sm:$0xff]  ;;  %v7222_v43 = vld [vmem:[#allocation92_spill] sm:$0xff]  ;;  %v7248_v55 = vand.u32 4294901760, %v5526_v3  ;;  %v7249_v63 = vand.u32 4294901760, %v7125_v18  ;;  %v7255_v18 = vand.u32 4294901760, %v5590_v13  ;;  %v959_v13 = vpop.f32.mrf.mxu1 }
 0x1e3   : > { %2730 = vmatpush1.msra.mxu0 %v7199_v5  ;;  %2917 = vmatprep.subr.mxu1 %v7200_v57  ;;  %v7223_v29 = vand.u32 4294901760, %v7222_v43  ;;  %v7224_v5 = vld [vmem:[#allocation64_spill] sm:$0xff]  ;;  %v7225_v57 = vand.u32 4294901760, %v7111_v61  ;;  %v7233_v61 = vand.u32 4294901760, %v7117_v15  ;;  %v7241_v15 = vand.u32 4294901760, %v7122_v16  ;;  %v7259_v3 = vld [vmem:[#allocation115_spill] sm:$0xff] }
 0x1e4   : > { %2734 = vmatprep.subr.mxu0 %v7202_v50  ;;  %2919 = vmatpush1.msra.mxu1 %v7203_v35  ;;  %v7228_v50 = vld [vmem:[#allocation75_spill] sm:$0xff]  ;;  %v7246_v16 = vand.u32 4294901760, %v5491_v36  ;;  %v7257_v36 = vld [vmem:[#allocation113_spill] sm:$0xff] }
 0x1e5   : > { %2738 = vmatpush2.msra.mxu0 %v7204_v42  ;;  %2921 = vmatprep.subr.mxu1 %v7205_v26  ;;  %v7230_v35 = vld [vmem:[#allocation79_spill] sm:$0xff]  ;;  %v7231_v42 = vand.u32 4294901760, %v7116_v25  ;;  %v7232_v26 = vld [vmem:[#allocation72_spill] sm:$0xff]  ;;  %v7239_v25 = vand.u32 4294901760, %v7121_v24  ;;  %v7245_v24 = vand.u32 4294901760, %v5510_v52  ;;  %v7250_v52 = vand.u32 4294901760, %v5555_v9 }
 0x1e6   : > { %2742 = vmatprep.subr.mxu0 %v7207_v39  ;;  %2923 = vmatpush1.msra.mxu1 %v7208_v20  ;;  %v7236_v39 = vld [vmem:[#allocation74_spill] sm:$0xff]  ;;  %v7238_v20 = vld [vmem:[#allocation84_spill] sm:$0xff]  ;;  %v7264_v9 = vld [vmem:[#allocation119_spill] sm:$0xff] }
 0x1e7   : > { %2746 = vmatpush2.msra.mxu0 %v7210_v37  ;;  %2925 = vmatprep.subr.mxu1 %v7211_v27  ;;  %v7242_v37 = vld [vmem:[#allocation88_spill] sm:$0xff] }
 0x1e8   : > { %2750 = vmatprep.subr.mxu0 %v7213_v11  ;;  %2927 = vmatpush1.msra.mxu1 %v7214_v47  ;;  %v7247_v27 = vld [vmem:[#allocation100_spill] sm:$0xff] }
 0x1e9   : > { %2754 = vmatpush2.msra.mxu0 %v7216_v41  ;;  %2929 = vmatprep.subr.mxu1 %v7217_v54 }
 0x1ea   : > { %2758 = vmatprep.subr.mxu0 %v7218_v23  ;;  %2931 = vmatpush1.msra.mxu1 %v7219_v6 }
 0x1eb   : > { %2762 = vmatpush2.msra.mxu0 %v7220_v60  ;;  %2933 = vmatprep.subr.mxu1 %v7221_v2 }
 0x1ec   : > { %2766 = vmatprep.subr.mxu0 %v7223_v29  ;;  %2935 = vmatpush2.msra.mxu1 %v7224_v5 }
 0x1ed   : > { %2770 = vmatpush2.msra.mxu0 %v7225_v57  ;;  %2937 = vmatprep.subr.mxu1 %v7226_v51 }
 0x1ee   : > { %2774 = vmatprep.subr.mxu0 %v7227_v1  ;;  %2939 = vmatpush2.msra.mxu1 %v7228_v50 }
 0x1ef   : > { %2778 = vmatpush2.msra.mxu0 %v7229_v58  ;;  %2941 = vmatprep.subr.mxu1 %v7230_v35 }
 0x1f0   : > { %2782 = vmatprep.subr.mxu0 %v7231_v42  ;;  %2943 = vmatpush2.msra.mxu1 %v7232_v26 }
 0x1f1   : > { %2786 = vmatpush2.msra.mxu0 %v7233_v61  ;;  %2945 = vmatprep.subr.mxu1 %v7234_v33 }
 0x1f2   : > { %2790 = vmatprep.subr.mxu0 %v7235_v38  ;;  %2947 = vmatpush2.msra.mxu1 %v7236_v39 }
 0x1f3   : > { %2794 = vmatpush2.msra.mxu0 %v7237_v10  ;;  %2949 = vmatprep.subr.mxu1 %v7238_v20 }
 0x1f4   : > { %2798 = vmatprep.subr.mxu0 %v7239_v25  ;;  %2951 = vmatpush2.msra.mxu1 %v7240_v34 }
 0x1f5   : > { %2802 = vmatpush2.msra.mxu0 %v7241_v15  ;;  %2953 = vmatprep.subr.mxu1 %v7242_v37 }
 0x1f6   : > { %2806 = vmatprep.subr.mxu0 %v7243_v0  ;;  %2955 = vmatpush2.msra.mxu1 %v5282_v14  ;;  %v7251_v14 = vld [vmem:[#allocation108_spill] sm:$0xff] }
 0x1f7   : > { %2810 = vmatpush2.msra.mxu0 %v7244_v22  ;;  %2957 = vmatprep.subr.mxu1 %v5317_v12  ;;  %v7253_v12 = vand.u32 4294901760, %v5575_v48  ;;  %v566_v48 = vpop.f32.mrf.mxu0 }
 0x1f8   : > { %2814 = vmatprep.subr.mxu0 %v7245_v24  ;;  %2959 = vmatpush2.msra.mxu1 %v5310_v30  ;;  %v7252_v30 = vand.u32 4294901760, %v5544_v31  ;;  %v7261_v31 = vld [vmem:[#allocation112_spill] sm:$0xff] }
 0x1f9   : > { %2818 = vmatpush2.msra.mxu0 %v7246_v16  ;;  %2961 = vmatprep.subr.mxu1 %v7247_v27 }
 0x1fa   : > { %2822 = vmatprep.subr.mxu0 %v7248_v55  ;;  %2963 = vmatpush2.msra.mxu1 %v5345_v19  ;;  %v7254_v19 = vand.u32 4294901760, %v5562_v32  ;;  %v7265_v32 = vld [vmem:[#allocation118_spill] sm:$0xff] }
 0x1fb   : > { %2826 = vmatpush2.msra.mxu0 %v7249_v63  ;;  %2965 = vmatprep.subr.mxu1 %v5396_v49  ;;  %v7256_v49 = vand.u32 4294901760, %v5594_v4 }
 0x1fc   : > { %2830 = vmatprep.subr.mxu0 %v7250_v52  ;;  %2967 = vmatpush2.msra.mxu1 %v7251_v14 }
 0x1fd   : > { %2834 = vmatpush2.msra.mxu0 %v7252_v30  ;;  %2969 = vmatprep.subr.mxu1 %v5403_v56  ;;  %v7258_v56 = vand.u32 4294901760, %v5606_v62  ;;  %v961_v62 = vpop.f32.mrf.mxu1 }
 0x1fe   : > { %2838 = vmatprep.subr.mxu0 %v7253_v12  ;;  %2971 = vmatpush2.msra.mxu1 %v5405_v28  ;;  %v7260_v28 = vand.u32 4294901760, %v5610_v46 }
 0x1ff   : > { %2842 = vmatpush2.msra.mxu0 %v7254_v19  ;;  %2973 = vmatprep.subr.mxu1 %v5456_v44  ;;  %v7262_v44 = vld [vmem:[#allocation105_spill] sm:$0xff]  ;;  %v1303_v8 = vpop.f32.mrf.mxu1 }
 0x200   : > { %2846 = vmatprep.subr.mxu0 %v7255_v18  ;;  %2975 = vmatpush2.msra.mxu1 %v5444_v21  ;;  %v7263_v21 = vld [vmem:[#allocation116_spill] sm:$0xff] }
 0x201   : > { %2850 = vmatpush2.msra.mxu0 %v7256_v49  ;;  %2977 = vmatprep.subr.mxu1 %v7257_v36  ;;  %v1305_v47 = vpop.f32.mrf.mxu1  ;;  %v7266_v36 = vld [vmem:[#allocation15_spill] sm:$0xff] }
 0x202   : > { %2854 = vmatprep.subr.mxu0 %v7258_v56  ;;  %2860 = vmatprep.mubr.f32.mxu0 %v7259_v3 }
 0x203   : > { %2858 = vmatpush2.msra.mxu0 %v7260_v28  ;;  %2979 = vmatpush2.msra.mxu1 %v7261_v31  ;;  %v1705_v41 = vpop.f32.mrf.mxu1 }
 0x204   : > { %2862 = vmatmul.mubr.f32.vlgmr.msra.gmra.mxu0 %v7262_v44  ;;  %2981 = vmatprep.subr.mxu1 %v5517_v59  ;;  %v568_v59 = vpop.f32.mrf.mxu0 }
 0x205   : > { %2983 = vmatpush2.msra.mxu1 %v7263_v21  ;;  %2997 = vmatprep.mubr.f32.mxu1 %v7259_v3 }
 0x206   : > { %2985 = vmatprep.subr.mxu1 %v7264_v9  ;;  %v1162_v4 = vpop.f32.mrf.mxu0 }
 0x207   : > { %2987 = vmatpush2.msra.mxu1 %v7265_v32 }
 0x208   : > { %2989 = vmatprep.subr.mxu1 %v5551_v7  ;;  %v1164_v46 = vpop.f32.mrf.mxu0  ;;  %v960_v7 = vadd.f32 %v959_v13, %v566_v48 }
 0x209   : > { %2991 = vmatpush2.msra.mxu1 %v5564_v17  ;;  %v962_v17 = vadd.f32 %v961_v62, %v568_v59 }
 0x20a   : > { %2993 = vmatprep.subr.mxu1 %v5571_v45  ;;  %v1568_v11 = vpop.f32.mrf.mxu0  ;;  %v1163_v23 = vadd.f32 %v1162_v4, %v960_v7  ;;  %v1707_v45 = vpop.f32.mrf.mxu1 }
 0x20b   : > { %2995 = vmatpush2.msra.mxu1 %v5581_v53  ;;  %v1165_v6 = vadd.f32 %v1164_v46, %v962_v17 }
 0x20c   : > { %2999 = vmatmul.mubr.f32.vlgmr.msra.gmra.mxu1 %v7262_v44  ;;  %v1570_v40 = vpop.f32.mrf.mxu0  ;;  %v1304_v53 = vadd.f32 %v1303_v8, %v1163_v23 }
 0x20d   : > { %v1306_v43 = vadd.f32 %v1305_v47, %v1165_v6 }
 0x20e   : > { %v1569_v29 = vadd.f32 %v1568_v11, %v1304_v53 }
 0x20f   : > { %v1571_v57 = vadd.f32 %v1570_v40, %v1306_v43 }
 0x210   : > { %v1706_v51 = vadd.f32 %v1705_v41, %v1569_v29 }
 0x211   : > { %v1708_v50 = vadd.f32 %v1707_v45, %v1571_v57 }
 0x243   : > { %v1861_v54 = vpop.f32.mrf.mxu0 }
 0x244   : > { %v1862_v58 = vadd.f32 %v1861_v54, %v1706_v51 }
 0x245   : > { %v1863_v60 = vpop.f32.mrf.mxu0 }
 0x246   : > { %v2254_v2 = vpop.f32.mrf.mxu1  ;;  %v1864_v26 = vadd.f32 %v1863_v60, %v1708_v50 }
 0x247   : > { %v2255_v61 = vadd.f32 %v2254_v2, %v1862_v58 }
 0x248   : > { %v2256_v1 = vpop.f32.mrf.mxu1 }
 0x249   : > { %v2257_v38 = vadd.f32 %v2256_v1, %v1864_v26 }
 0x284   : > { %v2457_v5 = vpop.f32.mrf.mxu0 }
 0x285   : > { %v2458_v39 = vadd.f32 %v2457_v5, %v2255_v61 }
 0x286   : > { %v2459_v35 = vpop.f32.mrf.mxu0 }
 0x287   : > { %v2460_v20 = vadd.f32 %v2459_v35, %v2257_v38 }
 0x28a   : > { %v2598_v42 = vpop.f32.mrf.mxu1 }
 0x28b   : > { %v2599_v25 = vadd.f32 %v2598_v42, %v2458_v39 }
 0x28c   : > { %v2600_v10 = vpop.f32.mrf.mxu1 }
 0x28d   : > { %v2601_v15 = vadd.f32 %v2600_v10, %v2460_v20 }
 0x2c4   : > { %v2863_v33 = vpop.f32.mrf.mxu0 }
 0x2c5   : > { %v2864_v37 = vadd.f32 %v2863_v33, %v2599_v25 }
 0x2c6   : > { %v2865_v34 = vpop.f32.mrf.mxu0 }
 0x2c7   : > { %v2866_v22 = vadd.f32 %v2865_v34, %v2601_v15 }
 0x2cc   : > { %v3000_v0 = vpop.f32.mrf.mxu1 }
 0x2cd   : > { %v3001_v24 = vadd.f32 %v3000_v0, %v2864_v37 }
 0x2ce   : > { %v3002_v16 = vpop.f32.mrf.mxu1 }
 0x2cf   : > { %v3154_v27 = vmul.f32 -1.442695, %v3001_v24  ;;  %v3003_v55 = vadd.f32 %v3002_v16, %v2866_v22 }
 0x2d1   : > { %3242 = vpow2.f32 %v3154_v27  ;;  %v3155_v63 = vmul.f32 -1.442695, %v3003_v55 }
 0x2d3   : > { %3244 = vpow2.f32 %v3155_v63 }
 0x2de   : > { %v3243_v52 = vpop.eup %3242 }
 0x2df   : > { %v3011_v14 = vadd.f32 1.0, %v3243_v52 }
 0x2e0   : > { %v3245_v30 = vpop.eup %3244 }
 0x2e1   : > { %v3012_v12 = vadd.f32 1.0, %v3245_v30  ;;  %3246 = vrcp.f32 %v3011_v14 }
 0x2e3   : > { %3248 = vrcp.f32 %v3012_v12 }
 0x2ee   : > { %v3247_v19 = vpop.eup %3246 }
 0x2f0   : > { %v3249_v18 = vpop.eup %3248 }
 0x2f1   : > { %v3019_v49 = vcombine.low %v3247_v19, %v3249_v18 }
 0x2f3   : > { %v3026_v56 = vrot.slane %v3019_v49, %v7266_v36 }
 0x2f5   : > { %v3033_v3 = vrot.slane %v3026_v56, %v7266_v36 }
 0x2f7   : > { %3035 = vst.msk [vmem:[%s190_s21] sm:$0x3] %vm3542_vm0, %v3033_v3 }
 0x2f8   : > { %3317 = shalt.err (!%p3314_p5)
}
 0x2f9   : > { %s3318_s30 = scalar_lea.hbm %s3049_s26, 32  ;;  %s3322_s4 = scalar_lea.hbm %s6047_s2, 64 }
 0x2fa   : > { %p3319_p7 = scmp.ne.s32.totalorder %s3049_s26, %s3318_s30  ;;  %p3323_p9 = scmp.lt.s32.totalorder %s3049_s26, %s6047_s2 }
 0x2fb   : > { %p3324_p11 = scmp.lt.s32.totalorder %s3322_s4, %s3318_s30 }
 0x2fc   : > { %p3320_p6 = pnand %p3319_p7, %p3500_p13 }
 0x2fd   : > { %p3325_p12 = por %p3324_p11, %p3323_p9 }
 0x2fe   : > { %p3321_p4 = pneg %p3320_p6 }
 0x300   : > { %p3326_p1 = pnand %p3325_p12, %p3321_p4 }
 0x302   : > { %3329 = shalt.err (!%p3326_p1)
}
 0x303   : > { %3169 = dma.vmem_to_hbm [thread:$0]  (%p3500_p13), %s3052_s22, 32, %s3049_s26, %s3037_s27  }
 0x304 PF: > { %s3063_s16 = sand.u32 1, %s3368_s9   ;;  %p7268_p8 = scmp.ne.s32.totalorder %s6471_s20, 0 }
 0x305   : > { %p7269_p10 = scmp.ge.s32.totalorder %s3388_s14, 2  ;;  %s3064_s17 = scalar_lea.sflag [#allocation6], %s3063_s16 }
 0x307   : > { %p3180_p0 = pnand %p7269_p10, %p7268_p8 }
 0x309   : > { %p3181_p2 = pneg %p3180_p0 }
 0x30b   : > { %3363 = dma.done.wait (%p3181_p2), %s3064_s17, 32  }
 0x30c   : > { %3365 = vsyncadd (%p3181_p2), %s3064_s17, 4294967264  ;;  %s19_s14 = sadd.s32 1, %s3388_s14   ;;  %s7270_s9 = smov %s3372_s10 }
 0x30d   : > { %p16_p3 = scmp.ge.s32.totalorder %s19_s14, 4   ;;  %s7271_s10 = smov %s3376_s11 }
 0x30e   : > { %s7272_s11 = smov %s3509_s15  ;;  %s7273_s12 = smov %s3384_s13 }
 0x30f   : > { %s7274_s13 = smov %s7276_s25  ;;  %18 = sbr.rel (!%p16_p3) target bundleno = 7 (0x7), region = 86 }
 0x314   :  { %3069 = vsyncpa [#allocation5], 1 }
 0x315   :  { %3071 = vsyncpa [#allocation5 + $0x1], 1 }
 0x316   :  { %3072 = vsyncpa [#allocation8], 1 }
 0x317   :  { %3073 = vsyncpa [#allocation6], 1 }
 0x318   :  { %3075 = vsyncpa [#allocation6 + $0x1], 1 }

</bundles_post_ra>
